<compile_context>
chip_gen: v5e
topology: v5e:2x2
jax: 0.10.0
libtpu: 0.0.40
codegen_flags: <defaults>
</compile_context>

<pallas_src>
import numpy as np

import jax
import jax.numpy as jnp
from jax.experimental import pallas as pl
from jax.experimental.pallas import tpu as pltpu


# ----------------------------------------------------------------------------
# Host-side parameter preparation: conv -> Toeplitz matmul matrices
# ----------------------------------------------------------------------------
def _smear_flat(L, ng):
    """GaussianSmearing(0,1,ng) applied to linspace(0,1,L), flattened channel-major (ng*L,)."""
    offset = np.linspace(0.0, 1.0, ng)
    coeff = -0.5 / (offset[1] - offset[0]) ** 2
    dist = np.linspace(0.0, 1.0, L)
    sm = np.exp(coeff * (dist[:, None] - offset[None, :]) ** 2)      # (L, ng)
    return sm.T.reshape(-1)                                          # [g*L + l]


def _conv_matrix(W, Lin, stride, padding, Lout):
    """Conv1d weight (Cout,Cin,K) -> matrix M so that out_flat = x_flat @ M (flattened NCW)."""
    Cout, Cin, K = W.shape
    M = np.zeros((Cin * Lin, Cout * Lout), np.float64)
    for l in range(Lout):
        for k in range(K):
            i = l * stride + k - padding
            if 0 <= i < Lin:
                M[np.ix_(np.arange(Cin) * Lin + i,
                         np.arange(Cout) * Lout + l)] = W[:, :, k].T
    return M


def _convT_matrix(Wt, Lin, stride, padding, Lout):
    """ConvTranspose1d weight (Cin,Cout,K) -> matrix M so that out_flat = x_flat @ M."""
    Cin, Cout, K = Wt.shape
    M = np.zeros((Cin * Lin, Cout * Lout), np.float64)
    for l in range(Lin):
        for k in range(K):
            n = l * stride - padding + k
            if 0 <= n < Lout:
                M[np.ix_(np.arange(Cin) * Lin + l,
                         np.arange(Cout) * Lout + n)] = Wt[:, :, k]
    return M


def prepare_params(params, cfg, num_bins, dtype=jnp.float32):
    """Raw PyTorch-layout conv weights -> flat matmul matrices + effective biases.

    dtype=jnp.bfloat16 halves weight VMEM/HBM footprint (useful on v6e/v7x); default f32
    keeps the error budget tight.
    """
    ng = cfg["num_gaussians"]
    H = cfg["hidden_sizes"][-1]
    Lc = cfg["num_compressed_bins"]
    ks, ss, ps = cfg["kernel_sizes"], cfg["strides"], cfg["paddings"]
    n_down = len(params["down"])
    n_up = len(params["up"])
    cell_in = 2                                   # MOMO3 always feeds [x_t, x_t - prev]
    HLc = H * Lc

    flat = []
    lens = [num_bins]
    Lin = num_bins
    # ---- input gate: DownBlocks chain ----
    for i, (W, b) in enumerate(params["down"]):
        W = np.asarray(W, np.float64)
        b = np.asarray(b, np.float64)
        Cout, Cin, K = W.shape
        Lout = (Lin + 2 * ps[i] - K) // ss[i] + 1
        M = _conv_matrix(W, Lin, ss[i], ps[i], Lout)
        bflat = np.repeat(b, Lout)
        if i == 0:
            # input channels are [x_t, x_t-prev, smear(ng)]; smear is constant -> bias;
            # keep the [x_t ; x_t-prev] rows stacked (one matmul on a lane concat).
            assert Cin == cell_in + ng
            bflat = bflat + _smear_flat(Lin, ng) @ M[cell_in * Lin:]
            M = M[:cell_in * Lin]
        if i == n_down - 1:
            # last layer produces the 3 GRU gate chunks -> split columns per gate so the
            # gates come out as separate matmul results (no per-step lane extracts).
            assert Cout * Lout == 3 * HLc
            flat += [M[:, g * HLc:(g + 1) * HLc] for g in range(3)]
            flat += [bflat[None, g * HLc:(g + 1) * HLc] for g in range(3)]
        else:
            flat += [M, bflat[None, :]]
        Lin = Lout
        lens.append(Lin)
    assert Lin == Lc, (Lin, Lc)

    # ---- reset gate: Conv1d(H+ng -> 3H, k=3, s=1, p=1); smear folded; per-gate split ----
    Wr = np.asarray(params["reset"][0], np.float64)
    br = np.asarray(params["reset"][1], np.float64)
    assert Wr.shape == (3 * H, H + ng, 3)
    Mr = _conv_matrix(Wr, Lc, 1, 1, Lc)
    br_eff = np.repeat(br, Lc) + _smear_flat(Lc, ng) @ Mr[H * Lc:]
    Mr = Mr[:H * Lc]
    flat += [Mr[:, g * HLc:(g + 1) * HLc] for g in range(3)]
    flat += [br_eff[None, g * HLc:(g + 1) * HLc] for g in range(3)]

    # ---- output gate: ConvTranspose1d chain; skip concat fused into one matmul per layer ----
    Lin = Lc
    ks_r, ss_r, ps_r = ks[::-1], ss[::-1], ps[::-1]
    for j, (Wt, bu) in enumerate(params["up"]):
        Wt = np.asarray(Wt, np.float64)
        bu = np.asarray(bu, np.float64)
        Cin, Cout, K = Wt.shape
        assert K == ks_r[j]
        Lout = lens[n_down - 1 - j]                # PyTorch output_size = skip length
        M = _convT_matrix(Wt, Lin, ss_r[j], ps_r[j], Lout)
        flat += [M, np.repeat(bu, Lout)[None, :]]
        Lin = Lout

    flat = tuple(jnp.asarray(a, dtype) for a in flat)
    meta = dict(n_down=n_down, n_up=n_up, num_bins=num_bins, HLc=HLc)
    return flat, meta


# ----------------------------------------------------------------------------
# Fused Pallas kernel: streamed time-chunks, recurrent state in VMEM scratch
# ----------------------------------------------------------------------------
def _build_kernel(chunk, NB, HLc, n_down, n_up):
    def kernel(*refs):
        it = iter(refs)
        hx0_ref = next(it)                       # (Bp, H*Lc)  flattened NCW
        prev0_ref = next(it)                     # (Bp, NB)
        x_ref = next(it)                         # (Bp, chunk*NB)   current time-chunk
        down = [(next(it), next(it)) for _ in range(n_down - 1)]
        gate_w = tuple(next(it) for _ in range(3))
        gate_b = tuple(next(it) for _ in range(3))
        reset_w = tuple(next(it) for _ in range(3))
        reset_b = tuple(next(it) for _ in range(3))
        up = [(next(it), next(it)) for _ in range(n_up)]
        out_ref = next(it)                       # (Bp, chunk*NB)
        hT_ref = next(it)                        # (Bp, H*Lc)
        hx_scr = next(it)                        # VMEM (Bp, H*Lc) f32
        prev_scr = next(it)                      # VMEM (Bp, NB)   f32

        @pl.when(pl.program_id(0) == 0)
        def _():
            hx_scr[...] = hx0_ref[...].astype(jnp.float32)
            prev_scr[...] = prev0_ref[...].astype(jnp.float32)

        def mm(a, m_ref):
            return jnp.dot(a, m_ref[...], preferred_element_type=jnp.float32)

        def sigmoid(z):                          # exact: errors would compound over T
            return 1.0 / (1.0 + jnp.exp(-z))

        # hoist small bias loads out of the unrolled time loop
        down_b = [b[...] for _, b in down]
        gb = [b[...] for b in gate_b]
        rb = [b[...] for b in reset_b]
        ub = [b[...] for _, b in up]

        x_chunk = x_ref[...].astype(jnp.float32)           # one dense 128-lane-multiple load
        hx = hx_scr[...]
        prev = prev_scr[...]

        ys = []
        # Fully unrolled chunk loop: the down-conv chain of step t+1 depends only on the input
        # sequence (never on hx), so the scheduler can overlap it with step t's reset/GRU/up
        # matmuls (cross-timestep pipelining of the MXU).
        for s in range(chunk):
            x_t = x_chunk[:, s * NB:(s + 1) * NB]

            # ---- input gate: DownBlocks chain (smear folded into bias; x/diff fused) ----
            h = jnp.concatenate([x_t, x_t - prev], axis=1)
            acts = []
            for i in range(n_down - 1):
                h = jnp.maximum(mm(h, down[i][0]) + down_b[i], 0.0)
                acts.append(h)
            i_r = jnp.maximum(mm(h, gate_w[0]) + gb[0], 0.0)
            i_i = jnp.maximum(mm(h, gate_w[1]) + gb[1], 0.0)
            i_n = jnp.maximum(mm(h, gate_w[2]) + gb[2], 0.0)

            # ---- reset gate (per-gate split matmuls on hx) ----
            h_r = jnp.maximum(mm(hx, reset_w[0]) + rb[0], 0.0)
            h_i = jnp.maximum(mm(hx, reset_w[1]) + rb[1], 0.0)
            h_n = jnp.maximum(mm(hx, reset_w[2]) + rb[2], 0.0)

            # ---- GRU-style gating ----
            inputgate = sigmoid(i_i + h_i)
            resetgate = sigmoid(i_r + h_r)
            newgate = jnp.tanh(i_n + resetgate * h_n)
            hi = newgate + inputgate * (hx - newgate)

            # ---- output gate: UpBlocks; skip concat fused into one matmul per layer ----
            y = mm(hi, up[0][0]) + ub[0]
            for j in range(1, n_up):
                skip = acts[n_up - 1 - j]
                y = mm(jnp.concatenate([jnp.maximum(y, 0.0), skip], axis=1), up[j][0]) + ub[j]

            ys.append(y)
            prev = x_t
            hx = hi

        # one lane-dense store per chunk (chunk*NB is a multiple of 128 when possible)
        out_ref[...] = jnp.concatenate(ys, axis=1).astype(out_ref.dtype)
        hx_scr[...] = hx
        prev_scr[...] = prev
        hT_ref[...] = hx.astype(hT_ref.dtype)

    return kernel


def _pick_chunk(T, NB):
    """Largest divisor of T whose lane width is a multiple of 128 (bounded unroll)."""
    best = None
    for d in range(1, T + 1):
        if T % d == 0 and (d * NB) % 128 == 0 and d * NB <= 1024 and d <= 32:
            best = d
    return best if best is not None else T       # fallback: whole sequence as one block


def make_momo3(params, cfg, num_bins, weight_dtype=jnp.float32):
    """Build a jitted MOMO3 forward: (B, T, num_bins) -> ((B, T, num_bins), (B, H, Lc))."""
    flat, meta = prepare_params(params, cfg, num_bins, dtype=weight_dtype)
    H = cfg["hidden_sizes"][-1]
    Lc = cfg["num_compressed_bins"]
    HLc = H * Lc
    n_down, n_up = meta["n_down"], meta["n_up"]

    mat_flops = sum(int(np.prod(a.shape)) for a in flat if a.shape[0] > 1)
    weight_bytes = sum(int(a.size) * a.dtype.itemsize for a in flat)

    @jax.jit
    def forward(inp, hx=None, prev=None):
        two_dimmed = inp.ndim == 2
        if two_dimmed:
            inp = inp[None]
        B, T, NB = inp.shape
        assert NB == meta["num_bins"]

        Bp = max(8, ((B + 7) // 8) * 8)          # fill sublanes
        chunk = _pick_chunk(T, NB)
        n_chunks = T // chunk

        x2d = inp.reshape(B, T * NB)             # lane-dense, no transpose
        hx0 = (jnp.zeros((B, HLc), inp.dtype) if hx is None
               else hx.reshape(B, HLc).astype(inp.dtype))
        prev0 = (inp[:, 0, :] if prev is None
                 else prev.reshape(B, NB).astype(inp.dtype))
        if Bp != B:
            pad = ((0, Bp - B), (0, 0))
            x2d = jnp.pad(x2d, pad)
            hx0 = jnp.pad(hx0, pad)
            prev0 = jnp.pad(prev0, pad)

        kernel = _build_kernel(chunk, NB, HLc, n_down, n_up)

        const = lambda c: (0, 0)
        in_specs = [pl.BlockSpec((Bp, HLc), const),
                    pl.BlockSpec((Bp, NB), const),
                    pl.BlockSpec((Bp, chunk * NB), lambda c: (0, c))]
        in_specs += [pl.BlockSpec(a.shape, const) for a in flat]
        out_specs = (pl.BlockSpec((Bp, chunk * NB), lambda c: (0, c)),
                     pl.BlockSpec((Bp, HLc), const))

        cost = pl.CostEstimate(
            flops=int(2 * T * Bp * mat_flops),
            transcendentals=int(4 * T * Bp * HLc),
            bytes_accessed=int(2 * x2d.size * x2d.dtype.itemsize
                               + weight_bytes + 2 * Bp * HLc * 4),
        )

        out2d, hT = pl.pallas_call(
            kernel,
            grid=(n_chunks,),
            in_specs=in_specs,
            out_specs=out_specs,
            out_shape=(jax.ShapeDtypeStruct((Bp, T * NB), inp.dtype),
                       jax.ShapeDtypeStruct((Bp, HLc), inp.dtype)),
            scratch_shapes=[pltpu.VMEM((Bp, HLc), jnp.float32),
                            pltpu.VMEM((Bp, NB), jnp.float32)],
            compiler_params=pltpu.CompilerParams(
                dimension_semantics=("arbitrary",),        # sequential: recurrence carry
                vmem_limit_bytes=64 * 1024 * 1024),
            cost_estimate=cost,
        )(hx0, prev0, x2d, *flat)

        a = out2d[:B].reshape(B, T, NB)
        if two_dimmed:
            a = a[0]
        return a, hT[:B].reshape(B, H, Lc)

    return forward


# ----------------------------------------------------------------------------
# Parameter init (same layouts/ranges as PyTorch Conv1d / ConvTranspose1d defaults)
# ----------------------------------------------------------------------------
def init_params(key, *, in_size, hidden_sizes, kernel_sizes, num_gaussians, dtype=jnp.float32):
    cell_in = in_size + 1
    H = hidden_sizes[-1]
    hs2 = list(hidden_sizes)
    hs2[-1] = 3 * hs2[-1]

    def uinit(k, shape, fan_in):
        bound = 1.0 / (fan_in ** 0.5)
        return jax.random.uniform(k, shape, dtype, -bound, bound)

    keys = iter(jax.random.split(key, 32))
    params = {}

    sizes = [cell_in + num_gaussians] + hs2
    down = []
    for i in range(len(sizes) - 1):
        cin, cout, k = sizes[i], sizes[i + 1], kernel_sizes[i]
        down.append((uinit(next(keys), (cout, cin, k), cin * k),
                     uinit(next(keys), (cout,), cin * k)))
    params["down"] = down

    cin = H + num_gaussians
    params["reset"] = (uinit(next(keys), (3 * H, cin, 3), cin * 3),
                       uinit(next(keys), (3 * H,), cin * 3))

    up_sizes = [1] + list(hidden_sizes)
    rs = up_sizes[::-1]
    ks = kernel_sizes[::-1]
    ups = []
    for i in range(len(up_sizes) - 1):
        cin = rs[i] if i == 0 else 2 * rs[i]
        cout = rs[i + 1]
        k = ks[i]
        ups.append((uinit(next(keys), (cin, cout, k), cin * k),   # ConvTranspose layout (Cin,Cout,K)
                    uinit(next(keys), (cout,), cin * k)))
    params["up"] = ups
    return params


# ----------------------------------------------------------------------------
# Plain-JAX reference (mirrors the PyTorch module, NCW layout) for a sanity check
# ----------------------------------------------------------------------------
def _gs_ref(L, ng, dtype):
    offset = jnp.linspace(0.0, 1.0, ng, dtype=dtype)
    coeff = -0.5 / (1.0 / (ng - 1)) ** 2
    dist = jnp.linspace(0.0, 1.0, L, dtype=dtype)
    return jnp.exp(coeff * (dist[:, None] - offset[None, :]) ** 2)        # (L, ng)


def _conv1d_ref(x, W, b, stride, padding):
    Cout, Cin, K = W.shape
    L = x.shape[-1]
    Lout = (L + 2 * padding - K) // stride + 1
    xp = jnp.pad(x, ((0, 0), (0, 0), (padding, padding)))
    cols = jnp.stack([xp[:, :, k:k + (Lout - 1) * stride + 1:stride] for k in range(K)], axis=-1)
    y = jnp.einsum("bclk,ock->bol", cols, W, precision=jax.lax.Precision.HIGHEST)
    return y + b[None, :, None]


def _convT1d_ref(x, Wt, b, stride, padding, out_len):
    Cin, Cout, K = Wt.shape
    B, _, L = x.shape
    y = jnp.zeros((B, Cout, (L - 1) * stride + K), x.dtype)
    for k in range(K):
        contrib = jnp.einsum("bcl,co->bol", x, Wt[:, :, k], precision=jax.lax.Precision.HIGHEST)
        y = y.at[:, :, k:k + (L - 1) * stride + 1:stride].add(contrib)
    return y[:, :, padding:padding + out_len] + b[None, :, None]


def _momo3_ref(inp, params, cfg, hx=None, prev=None):
    B, T, NB = inp.shape
    ng = cfg["num_gaussians"]
    H = cfg["hidden_sizes"][-1]
    Lc = cfg["num_compressed_bins"]
    ss, ps = cfg["strides"], cfg["paddings"]
    if hx is None:
        hx = jnp.zeros((B, H, Lc), inp.dtype)
    smear_x = _gs_ref(NB, ng, inp.dtype)
    smear_h = _gs_ref(Lc, ng, inp.dtype)
    n_up = len(params["up"])
    outs = []
    for t in range(T):
        x_t = inp[:, t, :][:, None, :]
        if prev is None:
            prev = x_t
        xc = jnp.concatenate([x_t, x_t - prev], axis=1)
        prev = x_t
        informed = jnp.concatenate([xc, jnp.broadcast_to(smear_x.T[None], (B, ng, NB))], axis=1)
        gate_x = [informed]
        h = informed
        for i, (W, b) in enumerate(params["down"]):
            h = jax.nn.relu(_conv1d_ref(h, W, b, ss[i], ps[i]))
            gate_x.append(h)
        informed_h = jnp.concatenate([hx, jnp.broadcast_to(smear_h.T[None], (B, ng, Lc))], axis=1)
        Wr, br = params["reset"]
        gate_h = jax.nn.relu(_conv1d_ref(informed_h, Wr, br, 1, 1))
        i_r, i_i, i_n = jnp.split(gate_x[-1], 3, axis=1)
        h_r, h_i, h_n = jnp.split(gate_h, 3, axis=1)
        inputgate = jax.nn.sigmoid(i_i + h_i)
        resetgate = jax.nn.sigmoid(i_r + h_r)
        newgate = jnp.tanh(i_n + resetgate * h_n)
        hi = newgate + inputgate * (hx - newgate)
        res = gate_x[:-1] + [hi]
        h = hi
        for j in range(n_up):
            s = res[n_up - 1 - j]
            Wt, bu = params["up"][j]
            y = _convT1d_ref(h, Wt, bu, ss[::-1][j], ps[::-1][j], s.shape[-1])
            h = jnp.concatenate([jax.nn.relu(y), s], axis=1) if j < n_up - 1 else y
        outs.append(h[:, 0, :])
        hx = hi
    return jnp.stack(outs, axis=1), hx


# ----------------------------------------------------------------------------
if __name__ == "__main__":
    cfg = dict(num_compressed_bins=4, in_size=1, hidden_sizes=[8, 16],
               kernel_sizes=[4, 4], strides=[2, 2], paddings=[1, 1],
               num_gaussians=6)
    B, T, NB = 2, 8, 16                 # conv chain 16 -> 8 -> 4 == num_compressed_bins
    x = jax.random.normal(jax.random.PRNGKey(0), (B, T, NB), dtype=jnp.float32)
    params = init_params(jax.random.PRNGKey(1),
                         in_size=cfg["in_size"],
                         hidden_sizes=cfg["hidden_sizes"],
                         kernel_sizes=cfg["kernel_sizes"],
                         num_gaussians=cfg["num_gaussians"])

    fwd = make_momo3(params, cfg, num_bins=NB)
    a, hT = fwd(x)
    jax.block_until_ready((a, hT))
    assert a.shape == (B, T, NB), a.shape
    assert hT.shape == (B, cfg["hidden_sizes"][-1], cfg["num_compressed_bins"]), hT.shape

    # sanity check against a plain-JAX reference of the PyTorch module
    a_ref, h_ref = _momo3_ref(x, params, cfg)
    np.testing.assert_allclose(np.asarray(a), np.asarray(a_ref), rtol=2e-2, atol=2e-2)
    np.testing.assert_allclose(np.asarray(hT), np.asarray(h_ref), rtol=2e-2, atol=2e-2)

    print("KERNEL_OK")
</pallas_src>

<mosaic_0001>
module attributes {stable_mosaic.version = 11 : i64} {
  func.func @kernel(%arg0: i32, %arg1: memref<8x64xf32, #tpu.memory_space<vmem>>, %arg2: memref<8x16xf32, #tpu.memory_space<vmem>>, %arg3: memref<8x128xf32, #tpu.memory_space<vmem>>, %arg4: memref<32x64xf32, #tpu.memory_space<vmem>>, %arg5: memref<1x64xf32, #tpu.memory_space<vmem>>, %arg6: memref<64x64xf32, #tpu.memory_space<vmem>>, %arg7: memref<64x64xf32, #tpu.memory_space<vmem>>, %arg8: memref<64x64xf32, #tpu.memory_space<vmem>>, %arg9: memref<1x64xf32, #tpu.memory_space<vmem>>, %arg10: memref<1x64xf32, #tpu.memory_space<vmem>>, %arg11: memref<1x64xf32, #tpu.memory_space<vmem>>, %arg12: memref<64x64xf32, #tpu.memory_space<vmem>>, %arg13: memref<64x64xf32, #tpu.memory_space<vmem>>, %arg14: memref<64x64xf32, #tpu.memory_space<vmem>>, %arg15: memref<1x64xf32, #tpu.memory_space<vmem>>, %arg16: memref<1x64xf32, #tpu.memory_space<vmem>>, %arg17: memref<1x64xf32, #tpu.memory_space<vmem>>, %arg18: memref<64x64xf32, #tpu.memory_space<vmem>>, %arg19: memref<1x64xf32, #tpu.memory_space<vmem>>, %arg20: memref<128x16xf32, #tpu.memory_space<vmem>>, %arg21: memref<1x16xf32, #tpu.memory_space<vmem>>, %arg22: memref<8x128xf32, #tpu.memory_space<vmem>>, %arg23: memref<8x64xf32, #tpu.memory_space<vmem>>, %arg24: memref<8x64xf32, #tpu.memory_space<vmem>>, %arg25: memref<8x16xf32, #tpu.memory_space<vmem>>) attributes {dimension_semantics = [#tpu.dimension_semantics<arbitrary>], iteration_bounds = array<i64: 1>, scalar_prefetch = 0 : i64, scratch_operands = 2 : i64, tpu.core_type = #tpu.core_type<tc>, window_params = [{pipeline_mode = #tpu.pipeline_mode<synchronous>, transform_indices = @transform_0, window_bounds = array<i64: 8, 64>}, {pipeline_mode = #tpu.pipeline_mode<synchronous>, transform_indices = @transform_1, window_bounds = array<i64: 8, 16>}, {transform_indices = @transform_2, window_bounds = array<i64: 8, 128>}, {pipeline_mode = #tpu.pipeline_mode<synchronous>, transform_indices = @transform_3, window_bounds = array<i64: 32, 64>}, {pipeline_mode = #tpu.pipeline_mode<synchronous>, transform_indices = @transform_4, window_bounds = array<i64: 1, 64>}, {pipeline_mode = #tpu.pipeline_mode<synchronous>, transform_indices = @transform_5, window_bounds = array<i64: 64, 64>}, {pipeline_mode = #tpu.pipeline_mode<synchronous>, transform_indices = @transform_6, window_bounds = array<i64: 64, 64>}, {pipeline_mode = #tpu.pipeline_mode<synchronous>, transform_indices = @transform_7, window_bounds = array<i64: 64, 64>}, {pipeline_mode = #tpu.pipeline_mode<synchronous>, transform_indices = @transform_8, window_bounds = array<i64: 1, 64>}, {pipeline_mode = #tpu.pipeline_mode<synchronous>, transform_indices = @transform_9, window_bounds = array<i64: 1, 64>}, {pipeline_mode = #tpu.pipeline_mode<synchronous>, transform_indices = @transform_10, window_bounds = array<i64: 1, 64>}, {pipeline_mode = #tpu.pipeline_mode<synchronous>, transform_indices = @transform_11, window_bounds = array<i64: 64, 64>}, {pipeline_mode = #tpu.pipeline_mode<synchronous>, transform_indices = @transform_12, window_bounds = array<i64: 64, 64>}, {pipeline_mode = #tpu.pipeline_mode<synchronous>, transform_indices = @transform_13, window_bounds = array<i64: 64, 64>}, {pipeline_mode = #tpu.pipeline_mode<synchronous>, transform_indices = @transform_14, window_bounds = array<i64: 1, 64>}, {pipeline_mode = #tpu.pipeline_mode<synchronous>, transform_indices = @transform_15, window_bounds = array<i64: 1, 64>}, {pipeline_mode = #tpu.pipeline_mode<synchronous>, transform_indices = @transform_16, window_bounds = array<i64: 1, 64>}, {pipeline_mode = #tpu.pipeline_mode<synchronous>, transform_indices = @transform_17, window_bounds = array<i64: 64, 64>}, {pipeline_mode = #tpu.pipeline_mode<synchronous>, transform_indices = @transform_18, window_bounds = array<i64: 1, 64>}, {pipeline_mode = #tpu.pipeline_mode<synchronous>, transform_indices = @transform_19, window_bounds = array<i64: 128, 16>}, {pipeline_mode = #tpu.pipeline_mode<synchronous>, transform_indices = @transform_20, window_bounds = array<i64: 1, 16>}, {transform_indices = @transform_21, window_bounds = array<i64: 8, 128>}, {pipeline_mode = #tpu.pipeline_mode<synchronous>, transform_indices = @transform_22, window_bounds = array<i64: 8, 64>}]} {
    %c0_i32 = arith.constant 0 : i32
    %0 = arith.cmpi eq, %arg0, %c0_i32 : i32
    %1 = arith.extui %0 : i1 to i32
    %c0_i32_0 = arith.constant 0 : i32
    %2 = arith.cmpi ne, %1, %c0_i32_0 : i32
    scf.if %2 {
      %c0_359 = arith.constant 0 : index
      %c0_360 = arith.constant 0 : index
      %644 = vector.load %arg1[%c0_359, %c0_360] : memref<8x64xf32, #tpu.memory_space<vmem>>, vector<8x64xf32>
      %c0_361 = arith.constant 0 : index
      %c0_362 = arith.constant 0 : index
      %645 = vector.load %arg24[%c0_361, %c0_362] : memref<8x64xf32, #tpu.memory_space<vmem>>, vector<8x64xf32>
      tpu.vector_store %arg24[%c0_361, %c0_362], %644 {strides = array<i32>} : memref<8x64xf32, #tpu.memory_space<vmem>>, vector<8x64xf32>,
      %c0_363 = arith.constant 0 : index
      %c0_364 = arith.constant 0 : index
      %646 = vector.load %arg2[%c0_363, %c0_364] : memref<8x16xf32, #tpu.memory_space<vmem>>, vector<8x16xf32>
      %c0_365 = arith.constant 0 : index
      %c0_366 = arith.constant 0 : index
      %647 = vector.load %arg25[%c0_365, %c0_366] : memref<8x16xf32, #tpu.memory_space<vmem>>, vector<8x16xf32>
      tpu.vector_store %arg25[%c0_365, %c0_366], %646 {strides = array<i32>} : memref<8x16xf32, #tpu.memory_space<vmem>>, vector<8x16xf32>,
    } else {
    }
    %c0 = arith.constant 0 : index
    %c0_1 = arith.constant 0 : index
    %3 = vector.load %arg5[%c0, %c0_1] : memref<1x64xf32, #tpu.memory_space<vmem>>, vector<1x64xf32>
    %c0_2 = arith.constant 0 : index
    %c0_3 = arith.constant 0 : index
    %4 = vector.load %arg9[%c0_2, %c0_3] : memref<1x64xf32, #tpu.memory_space<vmem>>, vector<1x64xf32>
    %c0_4 = arith.constant 0 : index
    %c0_5 = arith.constant 0 : index
    %5 = vector.load %arg10[%c0_4, %c0_5] : memref<1x64xf32, #tpu.memory_space<vmem>>, vector<1x64xf32>
    %c0_6 = arith.constant 0 : index
    %c0_7 = arith.constant 0 : index
    %6 = vector.load %arg11[%c0_6, %c0_7] : memref<1x64xf32, #tpu.memory_space<vmem>>, vector<1x64xf32>
    %c0_8 = arith.constant 0 : index
    %c0_9 = arith.constant 0 : index
    %7 = vector.load %arg15[%c0_8, %c0_9] : memref<1x64xf32, #tpu.memory_space<vmem>>, vector<1x64xf32>
    %c0_10 = arith.constant 0 : index
    %c0_11 = arith.constant 0 : index
    %8 = vector.load %arg16[%c0_10, %c0_11] : memref<1x64xf32, #tpu.memory_space<vmem>>, vector<1x64xf32>
    %c0_12 = arith.constant 0 : index
    %c0_13 = arith.constant 0 : index
    %9 = vector.load %arg17[%c0_12, %c0_13] : memref<1x64xf32, #tpu.memory_space<vmem>>, vector<1x64xf32>
    %c0_14 = arith.constant 0 : index
    %c0_15 = arith.constant 0 : index
    %10 = vector.load %arg19[%c0_14, %c0_15] : memref<1x64xf32, #tpu.memory_space<vmem>>, vector<1x64xf32>
    %c0_16 = arith.constant 0 : index
    %c0_17 = arith.constant 0 : index
    %11 = vector.load %arg21[%c0_16, %c0_17] : memref<1x16xf32, #tpu.memory_space<vmem>>, vector<1x16xf32>
    %c0_18 = arith.constant 0 : index
    %c0_19 = arith.constant 0 : index
    %12 = vector.load %arg3[%c0_18, %c0_19] : memref<8x128xf32, #tpu.memory_space<vmem>>, vector<8x128xf32>
    %c0_20 = arith.constant 0 : index
    %c0_21 = arith.constant 0 : index
    %13 = vector.load %arg24[%c0_20, %c0_21] : memref<8x64xf32, #tpu.memory_space<vmem>>, vector<8x64xf32>
    %c0_22 = arith.constant 0 : index
    %c0_23 = arith.constant 0 : index
    %14 = vector.load %arg25[%c0_22, %c0_23] : memref<8x16xf32, #tpu.memory_space<vmem>>, vector<8x16xf32>
    %15 = vector.extract_strided_slice %12 {offsets = [0, 0], sizes = [8, 16], strides = [1, 1]} : vector<8x128xf32> to vector<8x16xf32>
    %16 = arith.subf %15, %14 : vector<8x16xf32>
    %17 = tpu.concatenate %15, %16 in 1 : vector<8x16xf32>, vector<8x16xf32> -> vector<8x32xf32>
    %c0_24 = arith.constant 0 : index
    %c0_25 = arith.constant 0 : index
    %18 = vector.load %arg4[%c0_24, %c0_25] : memref<32x64xf32, #tpu.memory_space<vmem>>, vector<32x64xf32>
    %cst = arith.constant dense<0.000000e+00> : vector<8x64xf32>
    %19 = tpu.matmul %17, %18, %cst {dimension_numbers = #tpu.dot_dimension_numbers<[1], [0], [0], [1], [0, 0, 1, 1], [], []>} : vector<8x32xf32>, vector<32x64xf32>, vector<8x64xf32> -> vector<8x64xf32>
    %20 = vector.broadcast %3 : vector<1x64xf32> to vector<8x64xf32>
    %21 = arith.addf %19, %20 : vector<8x64xf32>
    %cst_26 = arith.constant 0.000000e+00 : f32
    %22 = vector.broadcast %cst_26 : f32 to vector<8x64xf32>
    %23 = arith.maximumf %21, %22 : vector<8x64xf32>
    %c0_27 = arith.constant 0 : index
    %c0_28 = arith.constant 0 : index
    %24 = vector.load %arg6[%c0_27, %c0_28] : memref<64x64xf32, #tpu.memory_space<vmem>>, vector<64x64xf32>
    %cst_29 = arith.constant dense<0.000000e+00> : vector<8x64xf32>
    %25 = tpu.matmul %23, %24, %cst_29 {dimension_numbers = #tpu.dot_dimension_numbers<[1], [0], [0], [1], [0, 0, 1, 1], [], []>} : vector<8x64xf32>, vector<64x64xf32>, vector<8x64xf32> -> vector<8x64xf32>
    %26 = vector.broadcast %4 : vector<1x64xf32> to vector<8x64xf32>
    %27 = arith.addf %25, %26 : vector<8x64xf32>
    %cst_30 = arith.constant 0.000000e+00 : f32
    %28 = vector.broadcast %cst_30 : f32 to vector<8x64xf32>
    %29 = arith.maximumf %27, %28 : vector<8x64xf32>
    %c0_31 = arith.constant 0 : index
    %c0_32 = arith.constant 0 : index
    %30 = vector.load %arg7[%c0_31, %c0_32] : memref<64x64xf32, #tpu.memory_space<vmem>>, vector<64x64xf32>
    %cst_33 = arith.constant dense<0.000000e+00> : vector<8x64xf32>
    %31 = tpu.matmul %23, %30, %cst_33 {dimension_numbers = #tpu.dot_dimension_numbers<[1], [0], [0], [1], [0, 0, 1, 1], [], []>} : vector<8x64xf32>, vector<64x64xf32>, vector<8x64xf32> -> vector<8x64xf32>
    %32 = vector.broadcast %5 : vector<1x64xf32> to vector<8x64xf32>
    %33 = arith.addf %31, %32 : vector<8x64xf32>
    %cst_34 = arith.constant 0.000000e+00 : f32
    %34 = vector.broadcast %cst_34 : f32 to vector<8x64xf32>
    %35 = arith.maximumf %33, %34 : vector<8x64xf32>
    %c0_35 = arith.constant 0 : index
    %c0_36 = arith.constant 0 : index
    %36 = vector.load %arg8[%c0_35, %c0_36] : memref<64x64xf32, #tpu.memory_space<vmem>>, vector<64x64xf32>
    %cst_37 = arith.constant dense<0.000000e+00> : vector<8x64xf32>
    %37 = tpu.matmul %23, %36, %cst_37 {dimension_numbers = #tpu.dot_dimension_numbers<[1], [0], [0], [1], [0, 0, 1, 1], [], []>} : vector<8x64xf32>, vector<64x64xf32>, vector<8x64xf32> -> vector<8x64xf32>
    %38 = vector.broadcast %6 : vector<1x64xf32> to vector<8x64xf32>
    %39 = arith.addf %37, %38 : vector<8x64xf32>
    %cst_38 = arith.constant 0.000000e+00 : f32
    %40 = vector.broadcast %cst_38 : f32 to vector<8x64xf32>
    %41 = arith.maximumf %39, %40 : vector<8x64xf32>
    %c0_39 = arith.constant 0 : index
    %c0_40 = arith.constant 0 : index
    %42 = vector.load %arg12[%c0_39, %c0_40] : memref<64x64xf32, #tpu.memory_space<vmem>>, vector<64x64xf32>
    %cst_41 = arith.constant dense<0.000000e+00> : vector<8x64xf32>
    %43 = tpu.matmul %13, %42, %cst_41 {dimension_numbers = #tpu.dot_dimension_numbers<[1], [0], [0], [1], [0, 0, 1, 1], [], []>} : vector<8x64xf32>, vector<64x64xf32>, vector<8x64xf32> -> vector<8x64xf32>
    %44 = vector.broadcast %7 : vector<1x64xf32> to vector<8x64xf32>
    %45 = arith.addf %43, %44 : vector<8x64xf32>
    %cst_42 = arith.constant 0.000000e+00 : f32
    %46 = vector.broadcast %cst_42 : f32 to vector<8x64xf32>
    %47 = arith.maximumf %45, %46 : vector<8x64xf32>
    %c0_43 = arith.constant 0 : index
    %c0_44 = arith.constant 0 : index
    %48 = vector.load %arg13[%c0_43, %c0_44] : memref<64x64xf32, #tpu.memory_space<vmem>>, vector<64x64xf32>
    %cst_45 = arith.constant dense<0.000000e+00> : vector<8x64xf32>
    %49 = tpu.matmul %13, %48, %cst_45 {dimension_numbers = #tpu.dot_dimension_numbers<[1], [0], [0], [1], [0, 0, 1, 1], [], []>} : vector<8x64xf32>, vector<64x64xf32>, vector<8x64xf32> -> vector<8x64xf32>
    %50 = vector.broadcast %8 : vector<1x64xf32> to vector<8x64xf32>
    %51 = arith.addf %49, %50 : vector<8x64xf32>
    %cst_46 = arith.constant 0.000000e+00 : f32
    %52 = vector.broadcast %cst_46 : f32 to vector<8x64xf32>
    %53 = arith.maximumf %51, %52 : vector<8x64xf32>
    %c0_47 = arith.constant 0 : index
    %c0_48 = arith.constant 0 : index
    %54 = vector.load %arg14[%c0_47, %c0_48] : memref<64x64xf32, #tpu.memory_space<vmem>>, vector<64x64xf32>
    %cst_49 = arith.constant dense<0.000000e+00> : vector<8x64xf32>
    %55 = tpu.matmul %13, %54, %cst_49 {dimension_numbers = #tpu.dot_dimension_numbers<[1], [0], [0], [1], [0, 0, 1, 1], [], []>} : vector<8x64xf32>, vector<64x64xf32>, vector<8x64xf32> -> vector<8x64xf32>
    %56 = vector.broadcast %9 : vector<1x64xf32> to vector<8x64xf32>
    %57 = arith.addf %55, %56 : vector<8x64xf32>
    %cst_50 = arith.constant 0.000000e+00 : f32
    %58 = vector.broadcast %cst_50 : f32 to vector<8x64xf32>
    %59 = arith.maximumf %57, %58 : vector<8x64xf32>
    %60 = arith.addf %35, %53 : vector<8x64xf32>
    %cst_51 = arith.constant 0.000000e+00 : f32
    %61 = vector.broadcast %cst_51 : f32 to vector<8x64xf32>
    %62 = arith.subf %61, %60 : vector<8x64xf32>
    %63 = math.exp %62 : vector<8x64xf32>
    %cst_52 = arith.constant 1.000000e+00 : f32
    %64 = vector.broadcast %cst_52 : f32 to vector<8x64xf32>
    %65 = arith.addf %64, %63 : vector<8x64xf32>
    %cst_53 = arith.constant 1.000000e+00 : f32
    %66 = vector.broadcast %cst_53 : f32 to vector<8x64xf32>
    %67 = arith.divf %66, %65 : vector<8x64xf32>
    %68 = arith.addf %29, %47 : vector<8x64xf32>
    %cst_54 = arith.constant 0.000000e+00 : f32
    %69 = vector.broadcast %cst_54 : f32 to vector<8x64xf32>
    %70 = arith.subf %69, %68 : vector<8x64xf32>
    %71 = math.exp %70 : vector<8x64xf32>
    %cst_55 = arith.constant 1.000000e+00 : f32
    %72 = vector.broadcast %cst_55 : f32 to vector<8x64xf32>
    %73 = arith.addf %72, %71 : vector<8x64xf32>
    %cst_56 = arith.constant 1.000000e+00 : f32
    %74 = vector.broadcast %cst_56 : f32 to vector<8x64xf32>
    %75 = arith.divf %74, %73 : vector<8x64xf32>
    %76 = arith.mulf %75, %59 : vector<8x64xf32>
    %77 = arith.addf %41, %76 : vector<8x64xf32>
    %78 = math.tanh %77 : vector<8x64xf32>
    %79 = arith.subf %13, %78 : vector<8x64xf32>
    %80 = arith.mulf %67, %79 : vector<8x64xf32>
    %81 = arith.addf %78, %80 : vector<8x64xf32>
    %c0_57 = arith.constant 0 : index
    %c0_58 = arith.constant 0 : index
    %82 = vector.load %arg18[%c0_57, %c0_58] : memref<64x64xf32, #tpu.memory_space<vmem>>, vector<64x64xf32>
    %cst_59 = arith.constant dense<0.000000e+00> : vector<8x64xf32>
    %83 = tpu.matmul %81, %82, %cst_59 {dimension_numbers = #tpu.dot_dimension_numbers<[1], [0], [0], [1], [0, 0, 1, 1], [], []>} : vector<8x64xf32>, vector<64x64xf32>, vector<8x64xf32> -> vector<8x64xf32>
    %84 = vector.broadcast %10 : vector<1x64xf32> to vector<8x64xf32>
    %85 = arith.addf %83, %84 : vector<8x64xf32>
    %cst_60 = arith.constant 0.000000e+00 : f32
    %86 = vector.broadcast %cst_60 : f32 to vector<8x64xf32>
    %87 = arith.maximumf %85, %86 : vector<8x64xf32>
    %88 = tpu.concatenate %87, %23 in 1 : vector<8x64xf32>, vector<8x64xf32> -> vector<8x128xf32>
    %c0_61 = arith.constant 0 : index
    %c0_62 = arith.constant 0 : index
    %89 = vector.load %arg20[%c0_61, %c0_62] : memref<128x16xf32, #tpu.memory_space<vmem>>, vector<128x16xf32>
    %cst_63 = arith.constant dense<0.000000e+00> : vector<8x16xf32>
    %90 = tpu.matmul %88, %89, %cst_63 {dimension_numbers = #tpu.dot_dimension_numbers<[1], [0], [0], [1], [0, 0, 1, 1], [], []>} : vector<8x128xf32>, vector<128x16xf32>, vector<8x16xf32> -> vector<8x16xf32>
    %91 = vector.broadcast %11 : vector<1x16xf32> to vector<8x16xf32>
    %92 = arith.addf %90, %91 : vector<8x16xf32>
    %93 = vector.extract_strided_slice %12 {offsets = [0, 16], sizes = [8, 16], strides = [1, 1]} : vector<8x128xf32> to vector<8x16xf32>
    %94 = arith.subf %93, %15 : vector<8x16xf32>
    %95 = tpu.concatenate %93, %94 in 1 : vector<8x16xf32>, vector<8x16xf32> -> vector<8x32xf32>
    %c0_64 = arith.constant 0 : index
    %c0_65 = arith.constant 0 : index
    %96 = vector.load %arg4[%c0_64, %c0_65] : memref<32x64xf32, #tpu.memory_space<vmem>>, vector<32x64xf32>
    %cst_66 = arith.constant dense<0.000000e+00> : vector<8x64xf32>
    %97 = tpu.matmul %95, %96, %cst_66 {dimension_numbers = #tpu.dot_dimension_numbers<[1], [0], [0], [1], [0, 0, 1, 1], [], []>} : vector<8x32xf32>, vector<32x64xf32>, vector<8x64xf32> -> vector<8x64xf32>
    %98 = vector.broadcast %3 : vector<1x64xf32> to vector<8x64xf32>
    %99 = arith.addf %97, %98 : vector<8x64xf32>
    %cst_67 = arith.constant 0.000000e+00 : f32
    %100 = vector.broadcast %cst_67 : f32 to vector<8x64xf32>
    %101 = arith.maximumf %99, %100 : vector<8x64xf32>
    %c0_68 = arith.constant 0 : index
    %c0_69 = arith.constant 0 : index
    %102 = vector.load %arg6[%c0_68, %c0_69] : memref<64x64xf32, #tpu.memory_space<vmem>>, vector<64x64xf32>
    %cst_70 = arith.constant dense<0.000000e+00> : vector<8x64xf32>
    %103 = tpu.matmul %101, %102, %cst_70 {dimension_numbers = #tpu.dot_dimension_numbers<[1], [0], [0], [1], [0, 0, 1, 1], [], []>} : vector<8x64xf32>, vector<64x64xf32>, vector<8x64xf32> -> vector<8x64xf32>
    %104 = vector.broadcast %4 : vector<1x64xf32> to vector<8x64xf32>
    %105 = arith.addf %103, %104 : vector<8x64xf32>
    %cst_71 = arith.constant 0.000000e+00 : f32
    %106 = vector.broadcast %cst_71 : f32 to vector<8x64xf32>
    %107 = arith.maximumf %105, %106 : vector<8x64xf32>
    %c0_72 = arith.constant 0 : index
    %c0_73 = arith.constant 0 : index
    %108 = vector.load %arg7[%c0_72, %c0_73] : memref<64x64xf32, #tpu.memory_space<vmem>>, vector<64x64xf32>
    %cst_74 = arith.constant dense<0.000000e+00> : vector<8x64xf32>
    %109 = tpu.matmul %101, %108, %cst_74 {dimension_numbers = #tpu.dot_dimension_numbers<[1], [0], [0], [1], [0, 0, 1, 1], [], []>} : vector<8x64xf32>, vector<64x64xf32>, vector<8x64xf32> -> vector<8x64xf32>
    %110 = vector.broadcast %5 : vector<1x64xf32> to vector<8x64xf32>
    %111 = arith.addf %109, %110 : vector<8x64xf32>
    %cst_75 = arith.constant 0.000000e+00 : f32
    %112 = vector.broadcast %cst_75 : f32 to vector<8x64xf32>
    %113 = arith.maximumf %111, %112 : vector<8x64xf32>
    %c0_76 = arith.constant 0 : index
    %c0_77 = arith.constant 0 : index
    %114 = vector.load %arg8[%c0_76, %c0_77] : memref<64x64xf32, #tpu.memory_space<vmem>>, vector<64x64xf32>
    %cst_78 = arith.constant dense<0.000000e+00> : vector<8x64xf32>
    %115 = tpu.matmul %101, %114, %cst_78 {dimension_numbers = #tpu.dot_dimension_numbers<[1], [0], [0], [1], [0, 0, 1, 1], [], []>} : vector<8x64xf32>, vector<64x64xf32>, vector<8x64xf32> -> vector<8x64xf32>
    %116 = vector.broadcast %6 : vector<1x64xf32> to vector<8x64xf32>
    %117 = arith.addf %115, %116 : vector<8x64xf32>
    %cst_79 = arith.constant 0.000000e+00 : f32
    %118 = vector.broadcast %cst_79 : f32 to vector<8x64xf32>
    %119 = arith.maximumf %117, %118 : vector<8x64xf32>
    %c0_80 = arith.constant 0 : index
    %c0_81 = arith.constant 0 : index
    %120 = vector.load %arg12[%c0_80, %c0_81] : memref<64x64xf32, #tpu.memory_space<vmem>>, vector<64x64xf32>
    %cst_82 = arith.constant dense<0.000000e+00> : vector<8x64xf32>
    %121 = tpu.matmul %81, %120, %cst_82 {dimension_numbers = #tpu.dot_dimension_numbers<[1], [0], [0], [1], [0, 0, 1, 1], [], []>} : vector<8x64xf32>, vector<64x64xf32>, vector<8x64xf32> -> vector<8x64xf32>
    %122 = vector.broadcast %7 : vector<1x64xf32> to vector<8x64xf32>
    %123 = arith.addf %121, %122 : vector<8x64xf32>
    %cst_83 = arith.constant 0.000000e+00 : f32
    %124 = vector.broadcast %cst_83 : f32 to vector<8x64xf32>
    %125 = arith.maximumf %123, %124 : vector<8x64xf32>
    %c0_84 = arith.constant 0 : index
    %c0_85 = arith.constant 0 : index
    %126 = vector.load %arg13[%c0_84, %c0_85] : memref<64x64xf32, #tpu.memory_space<vmem>>, vector<64x64xf32>
    %cst_86 = arith.constant dense<0.000000e+00> : vector<8x64xf32>
    %127 = tpu.matmul %81, %126, %cst_86 {dimension_numbers = #tpu.dot_dimension_numbers<[1], [0], [0], [1], [0, 0, 1, 1], [], []>} : vector<8x64xf32>, vector<64x64xf32>, vector<8x64xf32> -> vector<8x64xf32>
    %128 = vector.broadcast %8 : vector<1x64xf32> to vector<8x64xf32>
    %129 = arith.addf %127, %128 : vector<8x64xf32>
    %cst_87 = arith.constant 0.000000e+00 : f32
    %130 = vector.broadcast %cst_87 : f32 to vector<8x64xf32>
    %131 = arith.maximumf %129, %130 : vector<8x64xf32>
    %c0_88 = arith.constant 0 : index
    %c0_89 = arith.constant 0 : index
    %132 = vector.load %arg14[%c0_88, %c0_89] : memref<64x64xf32, #tpu.memory_space<vmem>>, vector<64x64xf32>
    %cst_90 = arith.constant dense<0.000000e+00> : vector<8x64xf32>
    %133 = tpu.matmul %81, %132, %cst_90 {dimension_numbers = #tpu.dot_dimension_numbers<[1], [0], [0], [1], [0, 0, 1, 1], [], []>} : vector<8x64xf32>, vector<64x64xf32>, vector<8x64xf32> -> vector<8x64xf32>
    %134 = vector.broadcast %9 : vector<1x64xf32> to vector<8x64xf32>
    %135 = arith.addf %133, %134 : vector<8x64xf32>
    %cst_91 = arith.constant 0.000000e+00 : f32
    %136 = vector.broadcast %cst_91 : f32 to vector<8x64xf32>
    %137 = arith.maximumf %135, %136 : vector<8x64xf32>
    %138 = arith.addf %113, %131 : vector<8x64xf32>
    %cst_92 = arith.constant 0.000000e+00 : f32
    %139 = vector.broadcast %cst_92 : f32 to vector<8x64xf32>
    %140 = arith.subf %139, %138 : vector<8x64xf32>
    %141 = math.exp %140 : vector<8x64xf32>
    %cst_93 = arith.constant 1.000000e+00 : f32
    %142 = vector.broadcast %cst_93 : f32 to vector<8x64xf32>
    %143 = arith.addf %142, %141 : vector<8x64xf32>
    %cst_94 = arith.constant 1.000000e+00 : f32
    %144 = vector.broadcast %cst_94 : f32 to vector<8x64xf32>
    %145 = arith.divf %144, %143 : vector<8x64xf32>
    %146 = arith.addf %107, %125 : vector<8x64xf32>
    %cst_95 = arith.constant 0.000000e+00 : f32
    %147 = vector.broadcast %cst_95 : f32 to vector<8x64xf32>
    %148 = arith.subf %147, %146 : vector<8x64xf32>
    %149 = math.exp %148 : vector<8x64xf32>
    %cst_96 = arith.constant 1.000000e+00 : f32
    %150 = vector.broadcast %cst_96 : f32 to vector<8x64xf32>
    %151 = arith.addf %150, %149 : vector<8x64xf32>
    %cst_97 = arith.constant 1.000000e+00 : f32
    %152 = vector.broadcast %cst_97 : f32 to vector<8x64xf32>
    %153 = arith.divf %152, %151 : vector<8x64xf32>
    %154 = arith.mulf %153, %137 : vector<8x64xf32>
    %155 = arith.addf %119, %154 : vector<8x64xf32>
    %156 = math.tanh %155 : vector<8x64xf32>
    %157 = arith.subf %81, %156 : vector<8x64xf32>
    %158 = arith.mulf %145, %157 : vector<8x64xf32>
    %159 = arith.addf %156, %158 : vector<8x64xf32>
    %c0_98 = arith.constant 0 : index
    %c0_99 = arith.constant 0 : index
    %160 = vector.load %arg18[%c0_98, %c0_99] : memref<64x64xf32, #tpu.memory_space<vmem>>, vector<64x64xf32>
    %cst_100 = arith.constant dense<0.000000e+00> : vector<8x64xf32>
    %161 = tpu.matmul %159, %160, %cst_100 {dimension_numbers = #tpu.dot_dimension_numbers<[1], [0], [0], [1], [0, 0, 1, 1], [], []>} : vector<8x64xf32>, vector<64x64xf32>, vector<8x64xf32> -> vector<8x64xf32>
    %162 = vector.broadcast %10 : vector<1x64xf32> to vector<8x64xf32>
    %163 = arith.addf %161, %162 : vector<8x64xf32>
    %cst_101 = arith.constant 0.000000e+00 : f32
    %164 = vector.broadcast %cst_101 : f32 to vector<8x64xf32>
    %165 = arith.maximumf %163, %164 : vector<8x64xf32>
    %166 = tpu.concatenate %165, %101 in 1 : vector<8x64xf32>, vector<8x64xf32> -> vector<8x128xf32>
    %c0_102 = arith.constant 0 : index
    %c0_103 = arith.constant 0 : index
    %167 = vector.load %arg20[%c0_102, %c0_103] : memref<128x16xf32, #tpu.memory_space<vmem>>, vector<128x16xf32>
    %cst_104 = arith.constant dense<0.000000e+00> : vector<8x16xf32>
    %168 = tpu.matmul %166, %167, %cst_104 {dimension_numbers = #tpu.dot_dimension_numbers<[1], [0], [0], [1], [0, 0, 1, 1], [], []>} : vector<8x128xf32>, vector<128x16xf32>, vector<8x16xf32> -> vector<8x16xf32>
    %169 = vector.broadcast %11 : vector<1x16xf32> to vector<8x16xf32>
    %170 = arith.addf %168, %169 : vector<8x16xf32>
    %171 = vector.extract_strided_slice %12 {offsets = [0, 32], sizes = [8, 16], strides = [1, 1]} : vector<8x128xf32> to vector<8x16xf32>
    %172 = arith.subf %171, %93 : vector<8x16xf32>
    %173 = tpu.concatenate %171, %172 in 1 : vector<8x16xf32>, vector<8x16xf32> -> vector<8x32xf32>
    %c0_105 = arith.constant 0 : index
    %c0_106 = arith.constant 0 : index
    %174 = vector.load %arg4[%c0_105, %c0_106] : memref<32x64xf32, #tpu.memory_space<vmem>>, vector<32x64xf32>
    %cst_107 = arith.constant dense<0.000000e+00> : vector<8x64xf32>
    %175 = tpu.matmul %173, %174, %cst_107 {dimension_numbers = #tpu.dot_dimension_numbers<[1], [0], [0], [1], [0, 0, 1, 1], [], []>} : vector<8x32xf32>, vector<32x64xf32>, vector<8x64xf32> -> vector<8x64xf32>
    %176 = vector.broadcast %3 : vector<1x64xf32> to vector<8x64xf32>
    %177 = arith.addf %175, %176 : vector<8x64xf32>
    %cst_108 = arith.constant 0.000000e+00 : f32
    %178 = vector.broadcast %cst_108 : f32 to vector<8x64xf32>
    %179 = arith.maximumf %177, %178 : vector<8x64xf32>
    %c0_109 = arith.constant 0 : index
    %c0_110 = arith.constant 0 : index
    %180 = vector.load %arg6[%c0_109, %c0_110] : memref<64x64xf32, #tpu.memory_space<vmem>>, vector<64x64xf32>
    %cst_111 = arith.constant dense<0.000000e+00> : vector<8x64xf32>
    %181 = tpu.matmul %179, %180, %cst_111 {dimension_numbers = #tpu.dot_dimension_numbers<[1], [0], [0], [1], [0, 0, 1, 1], [], []>} : vector<8x64xf32>, vector<64x64xf32>, vector<8x64xf32> -> vector<8x64xf32>
    %182 = vector.broadcast %4 : vector<1x64xf32> to vector<8x64xf32>
    %183 = arith.addf %181, %182 : vector<8x64xf32>
    %cst_112 = arith.constant 0.000000e+00 : f32
    %184 = vector.broadcast %cst_112 : f32 to vector<8x64xf32>
    %185 = arith.maximumf %183, %184 : vector<8x64xf32>
    %c0_113 = arith.constant 0 : index
    %c0_114 = arith.constant 0 : index
    %186 = vector.load %arg7[%c0_113, %c0_114] : memref<64x64xf32, #tpu.memory_space<vmem>>, vector<64x64xf32>
    %cst_115 = arith.constant dense<0.000000e+00> : vector<8x64xf32>
    %187 = tpu.matmul %179, %186, %cst_115 {dimension_numbers = #tpu.dot_dimension_numbers<[1], [0], [0], [1], [0, 0, 1, 1], [], []>} : vector<8x64xf32>, vector<64x64xf32>, vector<8x64xf32> -> vector<8x64xf32>
    %188 = vector.broadcast %5 : vector<1x64xf32> to vector<8x64xf32>
    %189 = arith.addf %187, %188 : vector<8x64xf32>
    %cst_116 = arith.constant 0.000000e+00 : f32
    %190 = vector.broadcast %cst_116 : f32 to vector<8x64xf32>
    %191 = arith.maximumf %189, %190 : vector<8x64xf32>
    %c0_117 = arith.constant 0 : index
    %c0_118 = arith.constant 0 : index
    %192 = vector.load %arg8[%c0_117, %c0_118] : memref<64x64xf32, #tpu.memory_space<vmem>>, vector<64x64xf32>
    %cst_119 = arith.constant dense<0.000000e+00> : vector<8x64xf32>
    %193 = tpu.matmul %179, %192, %cst_119 {dimension_numbers = #tpu.dot_dimension_numbers<[1], [0], [0], [1], [0, 0, 1, 1], [], []>} : vector<8x64xf32>, vector<64x64xf32>, vector<8x64xf32> -> vector<8x64xf32>
    %194 = vector.broadcast %6 : vector<1x64xf32> to vector<8x64xf32>
    %195 = arith.addf %193, %194 : vector<8x64xf32>
    %cst_120 = arith.constant 0.000000e+00 : f32
    %196 = vector.broadcast %cst_120 : f32 to vector<8x64xf32>
    %197 = arith.maximumf %195, %196 : vector<8x64xf32>
    %c0_121 = arith.constant 0 : index
    %c0_122 = arith.constant 0 : index
    %198 = vector.load %arg12[%c0_121, %c0_122] : memref<64x64xf32, #tpu.memory_space<vmem>>, vector<64x64xf32>
    %cst_123 = arith.constant dense<0.000000e+00> : vector<8x64xf32>
    %199 = tpu.matmul %159, %198, %cst_123 {dimension_numbers = #tpu.dot_dimension_numbers<[1], [0], [0], [1], [0, 0, 1, 1], [], []>} : vector<8x64xf32>, vector<64x64xf32>, vector<8x64xf32> -> vector<8x64xf32>
    %200 = vector.broadcast %7 : vector<1x64xf32> to vector<8x64xf32>
    %201 = arith.addf %199, %200 : vector<8x64xf32>
    %cst_124 = arith.constant 0.000000e+00 : f32
    %202 = vector.broadcast %cst_124 : f32 to vector<8x64xf32>
    %203 = arith.maximumf %201, %202 : vector<8x64xf32>
    %c0_125 = arith.constant 0 : index
    %c0_126 = arith.constant 0 : index
    %204 = vector.load %arg13[%c0_125, %c0_126] : memref<64x64xf32, #tpu.memory_space<vmem>>, vector<64x64xf32>
    %cst_127 = arith.constant dense<0.000000e+00> : vector<8x64xf32>
    %205 = tpu.matmul %159, %204, %cst_127 {dimension_numbers = #tpu.dot_dimension_numbers<[1], [0], [0], [1], [0, 0, 1, 1], [], []>} : vector<8x64xf32>, vector<64x64xf32>, vector<8x64xf32> -> vector<8x64xf32>
    %206 = vector.broadcast %8 : vector<1x64xf32> to vector<8x64xf32>
    %207 = arith.addf %205, %206 : vector<8x64xf32>
    %cst_128 = arith.constant 0.000000e+00 : f32
    %208 = vector.broadcast %cst_128 : f32 to vector<8x64xf32>
    %209 = arith.maximumf %207, %208 : vector<8x64xf32>
    %c0_129 = arith.constant 0 : index
    %c0_130 = arith.constant 0 : index
    %210 = vector.load %arg14[%c0_129, %c0_130] : memref<64x64xf32, #tpu.memory_space<vmem>>, vector<64x64xf32>
    %cst_131 = arith.constant dense<0.000000e+00> : vector<8x64xf32>
    %211 = tpu.matmul %159, %210, %cst_131 {dimension_numbers = #tpu.dot_dimension_numbers<[1], [0], [0], [1], [0, 0, 1, 1], [], []>} : vector<8x64xf32>, vector<64x64xf32>, vector<8x64xf32> -> vector<8x64xf32>
    %212 = vector.broadcast %9 : vector<1x64xf32> to vector<8x64xf32>
    %213 = arith.addf %211, %212 : vector<8x64xf32>
    %cst_132 = arith.constant 0.000000e+00 : f32
    %214 = vector.broadcast %cst_132 : f32 to vector<8x64xf32>
    %215 = arith.maximumf %213, %214 : vector<8x64xf32>
    %216 = arith.addf %191, %209 : vector<8x64xf32>
    %cst_133 = arith.constant 0.000000e+00 : f32
    %217 = vector.broadcast %cst_133 : f32 to vector<8x64xf32>
    %218 = arith.subf %217, %216 : vector<8x64xf32>
    %219 = math.exp %218 : vector<8x64xf32>
    %cst_134 = arith.constant 1.000000e+00 : f32
    %220 = vector.broadcast %cst_134 : f32 to vector<8x64xf32>
    %221 = arith.addf %220, %219 : vector<8x64xf32>
    %cst_135 = arith.constant 1.000000e+00 : f32
    %222 = vector.broadcast %cst_135 : f32 to vector<8x64xf32>
    %223 = arith.divf %222, %221 : vector<8x64xf32>
    %224 = arith.addf %185, %203 : vector<8x64xf32>
    %cst_136 = arith.constant 0.000000e+00 : f32
    %225 = vector.broadcast %cst_136 : f32 to vector<8x64xf32>
    %226 = arith.subf %225, %224 : vector<8x64xf32>
    %227 = math.exp %226 : vector<8x64xf32>
    %cst_137 = arith.constant 1.000000e+00 : f32
    %228 = vector.broadcast %cst_137 : f32 to vector<8x64xf32>
    %229 = arith.addf %228, %227 : vector<8x64xf32>
    %cst_138 = arith.constant 1.000000e+00 : f32
    %230 = vector.broadcast %cst_138 : f32 to vector<8x64xf32>
    %231 = arith.divf %230, %229 : vector<8x64xf32>
    %232 = arith.mulf %231, %215 : vector<8x64xf32>
    %233 = arith.addf %197, %232 : vector<8x64xf32>
    %234 = math.tanh %233 : vector<8x64xf32>
    %235 = arith.subf %159, %234 : vector<8x64xf32>
    %236 = arith.mulf %223, %235 : vector<8x64xf32>
    %237 = arith.addf %234, %236 : vector<8x64xf32>
    %c0_139 = arith.constant 0 : index
    %c0_140 = arith.constant 0 : index
    %238 = vector.load %arg18[%c0_139, %c0_140] : memref<64x64xf32, #tpu.memory_space<vmem>>, vector<64x64xf32>
    %cst_141 = arith.constant dense<0.000000e+00> : vector<8x64xf32>
    %239 = tpu.matmul %237, %238, %cst_141 {dimension_numbers = #tpu.dot_dimension_numbers<[1], [0], [0], [1], [0, 0, 1, 1], [], []>} : vector<8x64xf32>, vector<64x64xf32>, vector<8x64xf32> -> vector<8x64xf32>
    %240 = vector.broadcast %10 : vector<1x64xf32> to vector<8x64xf32>
    %241 = arith.addf %239, %240 : vector<8x64xf32>
    %cst_142 = arith.constant 0.000000e+00 : f32
    %242 = vector.broadcast %cst_142 : f32 to vector<8x64xf32>
    %243 = arith.maximumf %241, %242 : vector<8x64xf32>
    %244 = tpu.concatenate %243, %179 in 1 : vector<8x64xf32>, vector<8x64xf32> -> vector<8x128xf32>
    %c0_143 = arith.constant 0 : index
    %c0_144 = arith.constant 0 : index
    %245 = vector.load %arg20[%c0_143, %c0_144] : memref<128x16xf32, #tpu.memory_space<vmem>>, vector<128x16xf32>
    %cst_145 = arith.constant dense<0.000000e+00> : vector<8x16xf32>
    %246 = tpu.matmul %244, %245, %cst_145 {dimension_numbers = #tpu.dot_dimension_numbers<[1], [0], [0], [1], [0, 0, 1, 1], [], []>} : vector<8x128xf32>, vector<128x16xf32>, vector<8x16xf32> -> vector<8x16xf32>
    %247 = vector.broadcast %11 : vector<1x16xf32> to vector<8x16xf32>
    %248 = arith.addf %246, %247 : vector<8x16xf32>
    %249 = vector.extract_strided_slice %12 {offsets = [0, 48], sizes = [8, 16], strides = [1, 1]} : vector<8x128xf32> to vector<8x16xf32>
    %250 = arith.subf %249, %171 : vector<8x16xf32>
    %251 = tpu.concatenate %249, %250 in 1 : vector<8x16xf32>, vector<8x16xf32> -> vector<8x32xf32>
    %c0_146 = arith.constant 0 : index
    %c0_147 = arith.constant 0 : index
    %252 = vector.load %arg4[%c0_146, %c0_147] : memref<32x64xf32, #tpu.memory_space<vmem>>, vector<32x64xf32>
    %cst_148 = arith.constant dense<0.000000e+00> : vector<8x64xf32>
    %253 = tpu.matmul %251, %252, %cst_148 {dimension_numbers = #tpu.dot_dimension_numbers<[1], [0], [0], [1], [0, 0, 1, 1], [], []>} : vector<8x32xf32>, vector<32x64xf32>, vector<8x64xf32> -> vector<8x64xf32>
    %254 = vector.broadcast %3 : vector<1x64xf32> to vector<8x64xf32>
    %255 = arith.addf %253, %254 : vector<8x64xf32>
    %cst_149 = arith.constant 0.000000e+00 : f32
    %256 = vector.broadcast %cst_149 : f32 to vector<8x64xf32>
    %257 = arith.maximumf %255, %256 : vector<8x64xf32>
    %c0_150 = arith.constant 0 : index
    %c0_151 = arith.constant 0 : index
    %258 = vector.load %arg6[%c0_150, %c0_151] : memref<64x64xf32, #tpu.memory_space<vmem>>, vector<64x64xf32>
    %cst_152 = arith.constant dense<0.000000e+00> : vector<8x64xf32>
    %259 = tpu.matmul %257, %258, %cst_152 {dimension_numbers = #tpu.dot_dimension_numbers<[1], [0], [0], [1], [0, 0, 1, 1], [], []>} : vector<8x64xf32>, vector<64x64xf32>, vector<8x64xf32> -> vector<8x64xf32>
    %260 = vector.broadcast %4 : vector<1x64xf32> to vector<8x64xf32>
    %261 = arith.addf %259, %260 : vector<8x64xf32>
    %cst_153 = arith.constant 0.000000e+00 : f32
    %262 = vector.broadcast %cst_153 : f32 to vector<8x64xf32>
    %263 = arith.maximumf %261, %262 : vector<8x64xf32>
    %c0_154 = arith.constant 0 : index
    %c0_155 = arith.constant 0 : index
    %264 = vector.load %arg7[%c0_154, %c0_155] : memref<64x64xf32, #tpu.memory_space<vmem>>, vector<64x64xf32>
    %cst_156 = arith.constant dense<0.000000e+00> : vector<8x64xf32>
    %265 = tpu.matmul %257, %264, %cst_156 {dimension_numbers = #tpu.dot_dimension_numbers<[1], [0], [0], [1], [0, 0, 1, 1], [], []>} : vector<8x64xf32>, vector<64x64xf32>, vector<8x64xf32> -> vector<8x64xf32>
    %266 = vector.broadcast %5 : vector<1x64xf32> to vector<8x64xf32>
    %267 = arith.addf %265, %266 : vector<8x64xf32>
    %cst_157 = arith.constant 0.000000e+00 : f32
    %268 = vector.broadcast %cst_157 : f32 to vector<8x64xf32>
    %269 = arith.maximumf %267, %268 : vector<8x64xf32>
    %c0_158 = arith.constant 0 : index
    %c0_159 = arith.constant 0 : index
    %270 = vector.load %arg8[%c0_158, %c0_159] : memref<64x64xf32, #tpu.memory_space<vmem>>, vector<64x64xf32>
    %cst_160 = arith.constant dense<0.000000e+00> : vector<8x64xf32>
    %271 = tpu.matmul %257, %270, %cst_160 {dimension_numbers = #tpu.dot_dimension_numbers<[1], [0], [0], [1], [0, 0, 1, 1], [], []>} : vector<8x64xf32>, vector<64x64xf32>, vector<8x64xf32> -> vector<8x64xf32>
    %272 = vector.broadcast %6 : vector<1x64xf32> to vector<8x64xf32>
    %273 = arith.addf %271, %272 : vector<8x64xf32>
    %cst_161 = arith.constant 0.000000e+00 : f32
    %274 = vector.broadcast %cst_161 : f32 to vector<8x64xf32>
    %275 = arith.maximumf %273, %274 : vector<8x64xf32>
    %c0_162 = arith.constant 0 : index
    %c0_163 = arith.constant 0 : index
    %276 = vector.load %arg12[%c0_162, %c0_163] : memref<64x64xf32, #tpu.memory_space<vmem>>, vector<64x64xf32>
    %cst_164 = arith.constant dense<0.000000e+00> : vector<8x64xf32>
    %277 = tpu.matmul %237, %276, %cst_164 {dimension_numbers = #tpu.dot_dimension_numbers<[1], [0], [0], [1], [0, 0, 1, 1], [], []>} : vector<8x64xf32>, vector<64x64xf32>, vector<8x64xf32> -> vector<8x64xf32>
    %278 = vector.broadcast %7 : vector<1x64xf32> to vector<8x64xf32>
    %279 = arith.addf %277, %278 : vector<8x64xf32>
    %cst_165 = arith.constant 0.000000e+00 : f32
    %280 = vector.broadcast %cst_165 : f32 to vector<8x64xf32>
    %281 = arith.maximumf %279, %280 : vector<8x64xf32>
    %c0_166 = arith.constant 0 : index
    %c0_167 = arith.constant 0 : index
    %282 = vector.load %arg13[%c0_166, %c0_167] : memref<64x64xf32, #tpu.memory_space<vmem>>, vector<64x64xf32>
    %cst_168 = arith.constant dense<0.000000e+00> : vector<8x64xf32>
    %283 = tpu.matmul %237, %282, %cst_168 {dimension_numbers = #tpu.dot_dimension_numbers<[1], [0], [0], [1], [0, 0, 1, 1], [], []>} : vector<8x64xf32>, vector<64x64xf32>, vector<8x64xf32> -> vector<8x64xf32>
    %284 = vector.broadcast %8 : vector<1x64xf32> to vector<8x64xf32>
    %285 = arith.addf %283, %284 : vector<8x64xf32>
    %cst_169 = arith.constant 0.000000e+00 : f32
    %286 = vector.broadcast %cst_169 : f32 to vector<8x64xf32>
    %287 = arith.maximumf %285, %286 : vector<8x64xf32>
    %c0_170 = arith.constant 0 : index
    %c0_171 = arith.constant 0 : index
    %288 = vector.load %arg14[%c0_170, %c0_171] : memref<64x64xf32, #tpu.memory_space<vmem>>, vector<64x64xf32>
    %cst_172 = arith.constant dense<0.000000e+00> : vector<8x64xf32>
    %289 = tpu.matmul %237, %288, %cst_172 {dimension_numbers = #tpu.dot_dimension_numbers<[1], [0], [0], [1], [0, 0, 1, 1], [], []>} : vector<8x64xf32>, vector<64x64xf32>, vector<8x64xf32> -> vector<8x64xf32>
    %290 = vector.broadcast %9 : vector<1x64xf32> to vector<8x64xf32>
    %291 = arith.addf %289, %290 : vector<8x64xf32>
    %cst_173 = arith.constant 0.000000e+00 : f32
    %292 = vector.broadcast %cst_173 : f32 to vector<8x64xf32>
    %293 = arith.maximumf %291, %292 : vector<8x64xf32>
    %294 = arith.addf %269, %287 : vector<8x64xf32>
    %cst_174 = arith.constant 0.000000e+00 : f32
    %295 = vector.broadcast %cst_174 : f32 to vector<8x64xf32>
    %296 = arith.subf %295, %294 : vector<8x64xf32>
    %297 = math.exp %296 : vector<8x64xf32>
    %cst_175 = arith.constant 1.000000e+00 : f32
    %298 = vector.broadcast %cst_175 : f32 to vector<8x64xf32>
    %299 = arith.addf %298, %297 : vector<8x64xf32>
    %cst_176 = arith.constant 1.000000e+00 : f32
    %300 = vector.broadcast %cst_176 : f32 to vector<8x64xf32>
    %301 = arith.divf %300, %299 : vector<8x64xf32>
    %302 = arith.addf %263, %281 : vector<8x64xf32>
    %cst_177 = arith.constant 0.000000e+00 : f32
    %303 = vector.broadcast %cst_177 : f32 to vector<8x64xf32>
    %304 = arith.subf %303, %302 : vector<8x64xf32>
    %305 = math.exp %304 : vector<8x64xf32>
    %cst_178 = arith.constant 1.000000e+00 : f32
    %306 = vector.broadcast %cst_178 : f32 to vector<8x64xf32>
    %307 = arith.addf %306, %305 : vector<8x64xf32>
    %cst_179 = arith.constant 1.000000e+00 : f32
    %308 = vector.broadcast %cst_179 : f32 to vector<8x64xf32>
    %309 = arith.divf %308, %307 : vector<8x64xf32>
    %310 = arith.mulf %309, %293 : vector<8x64xf32>
    %311 = arith.addf %275, %310 : vector<8x64xf32>
    %312 = math.tanh %311 : vector<8x64xf32>
    %313 = arith.subf %237, %312 : vector<8x64xf32>
    %314 = arith.mulf %301, %313 : vector<8x64xf32>
    %315 = arith.addf %312, %314 : vector<8x64xf32>
    %c0_180 = arith.constant 0 : index
    %c0_181 = arith.constant 0 : index
    %316 = vector.load %arg18[%c0_180, %c0_181] : memref<64x64xf32, #tpu.memory_space<vmem>>, vector<64x64xf32>
    %cst_182 = arith.constant dense<0.000000e+00> : vector<8x64xf32>
    %317 = tpu.matmul %315, %316, %cst_182 {dimension_numbers = #tpu.dot_dimension_numbers<[1], [0], [0], [1], [0, 0, 1, 1], [], []>} : vector<8x64xf32>, vector<64x64xf32>, vector<8x64xf32> -> vector<8x64xf32>
    %318 = vector.broadcast %10 : vector<1x64xf32> to vector<8x64xf32>
    %319 = arith.addf %317, %318 : vector<8x64xf32>
    %cst_183 = arith.constant 0.000000e+00 : f32
    %320 = vector.broadcast %cst_183 : f32 to vector<8x64xf32>
    %321 = arith.maximumf %319, %320 : vector<8x64xf32>
    %322 = tpu.concatenate %321, %257 in 1 : vector<8x64xf32>, vector<8x64xf32> -> vector<8x128xf32>
    %c0_184 = arith.constant 0 : index
    %c0_185 = arith.constant 0 : index
    %323 = vector.load %arg20[%c0_184, %c0_185] : memref<128x16xf32, #tpu.memory_space<vmem>>, vector<128x16xf32>
    %cst_186 = arith.constant dense<0.000000e+00> : vector<8x16xf32>
    %324 = tpu.matmul %322, %323, %cst_186 {dimension_numbers = #tpu.dot_dimension_numbers<[1], [0], [0], [1], [0, 0, 1, 1], [], []>} : vector<8x128xf32>, vector<128x16xf32>, vector<8x16xf32> -> vector<8x16xf32>
    %325 = vector.broadcast %11 : vector<1x16xf32> to vector<8x16xf32>
    %326 = arith.addf %324, %325 : vector<8x16xf32>
    %327 = vector.extract_strided_slice %12 {offsets = [0, 64], sizes = [8, 16], strides = [1, 1]} : vector<8x128xf32> to vector<8x16xf32>
    %328 = arith.subf %327, %249 : vector<8x16xf32>
    %329 = tpu.concatenate %327, %328 in 1 : vector<8x16xf32>, vector<8x16xf32> -> vector<8x32xf32>
    %c0_187 = arith.constant 0 : index
    %c0_188 = arith.constant 0 : index
    %330 = vector.load %arg4[%c0_187, %c0_188] : memref<32x64xf32, #tpu.memory_space<vmem>>, vector<32x64xf32>
    %cst_189 = arith.constant dense<0.000000e+00> : vector<8x64xf32>
    %331 = tpu.matmul %329, %330, %cst_189 {dimension_numbers = #tpu.dot_dimension_numbers<[1], [0], [0], [1], [0, 0, 1, 1], [], []>} : vector<8x32xf32>, vector<32x64xf32>, vector<8x64xf32> -> vector<8x64xf32>
    %332 = vector.broadcast %3 : vector<1x64xf32> to vector<8x64xf32>
    %333 = arith.addf %331, %332 : vector<8x64xf32>
    %cst_190 = arith.constant 0.000000e+00 : f32
    %334 = vector.broadcast %cst_190 : f32 to vector<8x64xf32>
    %335 = arith.maximumf %333, %334 : vector<8x64xf32>
    %c0_191 = arith.constant 0 : index
    %c0_192 = arith.constant 0 : index
    %336 = vector.load %arg6[%c0_191, %c0_192] : memref<64x64xf32, #tpu.memory_space<vmem>>, vector<64x64xf32>
    %cst_193 = arith.constant dense<0.000000e+00> : vector<8x64xf32>
    %337 = tpu.matmul %335, %336, %cst_193 {dimension_numbers = #tpu.dot_dimension_numbers<[1], [0], [0], [1], [0, 0, 1, 1], [], []>} : vector<8x64xf32>, vector<64x64xf32>, vector<8x64xf32> -> vector<8x64xf32>
    %338 = vector.broadcast %4 : vector<1x64xf32> to vector<8x64xf32>
    %339 = arith.addf %337, %338 : vector<8x64xf32>
    %cst_194 = arith.constant 0.000000e+00 : f32
    %340 = vector.broadcast %cst_194 : f32 to vector<8x64xf32>
    %341 = arith.maximumf %339, %340 : vector<8x64xf32>
    %c0_195 = arith.constant 0 : index
    %c0_196 = arith.constant 0 : index
    %342 = vector.load %arg7[%c0_195, %c0_196] : memref<64x64xf32, #tpu.memory_space<vmem>>, vector<64x64xf32>
    %cst_197 = arith.constant dense<0.000000e+00> : vector<8x64xf32>
    %343 = tpu.matmul %335, %342, %cst_197 {dimension_numbers = #tpu.dot_dimension_numbers<[1], [0], [0], [1], [0, 0, 1, 1], [], []>} : vector<8x64xf32>, vector<64x64xf32>, vector<8x64xf32> -> vector<8x64xf32>
    %344 = vector.broadcast %5 : vector<1x64xf32> to vector<8x64xf32>
    %345 = arith.addf %343, %344 : vector<8x64xf32>
    %cst_198 = arith.constant 0.000000e+00 : f32
    %346 = vector.broadcast %cst_198 : f32 to vector<8x64xf32>
    %347 = arith.maximumf %345, %346 : vector<8x64xf32>
    %c0_199 = arith.constant 0 : index
    %c0_200 = arith.constant 0 : index
    %348 = vector.load %arg8[%c0_199, %c0_200] : memref<64x64xf32, #tpu.memory_space<vmem>>, vector<64x64xf32>
    %cst_201 = arith.constant dense<0.000000e+00> : vector<8x64xf32>
    %349 = tpu.matmul %335, %348, %cst_201 {dimension_numbers = #tpu.dot_dimension_numbers<[1], [0], [0], [1], [0, 0, 1, 1], [], []>} : vector<8x64xf32>, vector<64x64xf32>, vector<8x64xf32> -> vector<8x64xf32>
    %350 = vector.broadcast %6 : vector<1x64xf32> to vector<8x64xf32>
    %351 = arith.addf %349, %350 : vector<8x64xf32>
    %cst_202 = arith.constant 0.000000e+00 : f32
    %352 = vector.broadcast %cst_202 : f32 to vector<8x64xf32>
    %353 = arith.maximumf %351, %352 : vector<8x64xf32>
    %c0_203 = arith.constant 0 : index
    %c0_204 = arith.constant 0 : index
    %354 = vector.load %arg12[%c0_203, %c0_204] : memref<64x64xf32, #tpu.memory_space<vmem>>, vector<64x64xf32>
    %cst_205 = arith.constant dense<0.000000e+00> : vector<8x64xf32>
    %355 = tpu.matmul %315, %354, %cst_205 {dimension_numbers = #tpu.dot_dimension_numbers<[1], [0], [0], [1], [0, 0, 1, 1], [], []>} : vector<8x64xf32>, vector<64x64xf32>, vector<8x64xf32> -> vector<8x64xf32>
    %356 = vector.broadcast %7 : vector<1x64xf32> to vector<8x64xf32>
    %357 = arith.addf %355, %356 : vector<8x64xf32>
    %cst_206 = arith.constant 0.000000e+00 : f32
    %358 = vector.broadcast %cst_206 : f32 to vector<8x64xf32>
    %359 = arith.maximumf %357, %358 : vector<8x64xf32>
    %c0_207 = arith.constant 0 : index
    %c0_208 = arith.constant 0 : index
    %360 = vector.load %arg13[%c0_207, %c0_208] : memref<64x64xf32, #tpu.memory_space<vmem>>, vector<64x64xf32>
    %cst_209 = arith.constant dense<0.000000e+00> : vector<8x64xf32>
    %361 = tpu.matmul %315, %360, %cst_209 {dimension_numbers = #tpu.dot_dimension_numbers<[1], [0], [0], [1], [0, 0, 1, 1], [], []>} : vector<8x64xf32>, vector<64x64xf32>, vector<8x64xf32> -> vector<8x64xf32>
    %362 = vector.broadcast %8 : vector<1x64xf32> to vector<8x64xf32>
    %363 = arith.addf %361, %362 : vector<8x64xf32>
    %cst_210 = arith.constant 0.000000e+00 : f32
    %364 = vector.broadcast %cst_210 : f32 to vector<8x64xf32>
    %365 = arith.maximumf %363, %364 : vector<8x64xf32>
    %c0_211 = arith.constant 0 : index
    %c0_212 = arith.constant 0 : index
    %366 = vector.load %arg14[%c0_211, %c0_212] : memref<64x64xf32, #tpu.memory_space<vmem>>, vector<64x64xf32>
    %cst_213 = arith.constant dense<0.000000e+00> : vector<8x64xf32>
    %367 = tpu.matmul %315, %366, %cst_213 {dimension_numbers = #tpu.dot_dimension_numbers<[1], [0], [0], [1], [0, 0, 1, 1], [], []>} : vector<8x64xf32>, vector<64x64xf32>, vector<8x64xf32> -> vector<8x64xf32>
    %368 = vector.broadcast %9 : vector<1x64xf32> to vector<8x64xf32>
    %369 = arith.addf %367, %368 : vector<8x64xf32>
    %cst_214 = arith.constant 0.000000e+00 : f32
    %370 = vector.broadcast %cst_214 : f32 to vector<8x64xf32>
    %371 = arith.maximumf %369, %370 : vector<8x64xf32>
    %372 = arith.addf %347, %365 : vector<8x64xf32>
    %cst_215 = arith.constant 0.000000e+00 : f32
    %373 = vector.broadcast %cst_215 : f32 to vector<8x64xf32>
    %374 = arith.subf %373, %372 : vector<8x64xf32>
    %375 = math.exp %374 : vector<8x64xf32>
    %cst_216 = arith.constant 1.000000e+00 : f32
    %376 = vector.broadcast %cst_216 : f32 to vector<8x64xf32>
    %377 = arith.addf %376, %375 : vector<8x64xf32>
    %cst_217 = arith.constant 1.000000e+00 : f32
    %378 = vector.broadcast %cst_217 : f32 to vector<8x64xf32>
    %379 = arith.divf %378, %377 : vector<8x64xf32>
    %380 = arith.addf %341, %359 : vector<8x64xf32>
    %cst_218 = arith.constant 0.000000e+00 : f32
    %381 = vector.broadcast %cst_218 : f32 to vector<8x64xf32>
    %382 = arith.subf %381, %380 : vector<8x64xf32>
    %383 = math.exp %382 : vector<8x64xf32>
    %cst_219 = arith.constant 1.000000e+00 : f32
    %384 = vector.broadcast %cst_219 : f32 to vector<8x64xf32>
    %385 = arith.addf %384, %383 : vector<8x64xf32>
    %cst_220 = arith.constant 1.000000e+00 : f32
    %386 = vector.broadcast %cst_220 : f32 to vector<8x64xf32>
    %387 = arith.divf %386, %385 : vector<8x64xf32>
    %388 = arith.mulf %387, %371 : vector<8x64xf32>
    %389 = arith.addf %353, %388 : vector<8x64xf32>
    %390 = math.tanh %389 : vector<8x64xf32>
    %391 = arith.subf %315, %390 : vector<8x64xf32>
    %392 = arith.mulf %379, %391 : vector<8x64xf32>
    %393 = arith.addf %390, %392 : vector<8x64xf32>
    %c0_221 = arith.constant 0 : index
    %c0_222 = arith.constant 0 : index
    %394 = vector.load %arg18[%c0_221, %c0_222] : memref<64x64xf32, #tpu.memory_space<vmem>>, vector<64x64xf32>
    %cst_223 = arith.constant dense<0.000000e+00> : vector<8x64xf32>
    %395 = tpu.matmul %393, %394, %cst_223 {dimension_numbers = #tpu.dot_dimension_numbers<[1], [0], [0], [1], [0, 0, 1, 1], [], []>} : vector<8x64xf32>, vector<64x64xf32>, vector<8x64xf32> -> vector<8x64xf32>
    %396 = vector.broadcast %10 : vector<1x64xf32> to vector<8x64xf32>
    %397 = arith.addf %395, %396 : vector<8x64xf32>
    %cst_224 = arith.constant 0.000000e+00 : f32
    %398 = vector.broadcast %cst_224 : f32 to vector<8x64xf32>
    %399 = arith.maximumf %397, %398 : vector<8x64xf32>
    %400 = tpu.concatenate %399, %335 in 1 : vector<8x64xf32>, vector<8x64xf32> -> vector<8x128xf32>
    %c0_225 = arith.constant 0 : index
    %c0_226 = arith.constant 0 : index
    %401 = vector.load %arg20[%c0_225, %c0_226] : memref<128x16xf32, #tpu.memory_space<vmem>>, vector<128x16xf32>
    %cst_227 = arith.constant dense<0.000000e+00> : vector<8x16xf32>
    %402 = tpu.matmul %400, %401, %cst_227 {dimension_numbers = #tpu.dot_dimension_numbers<[1], [0], [0], [1], [0, 0, 1, 1], [], []>} : vector<8x128xf32>, vector<128x16xf32>, vector<8x16xf32> -> vector<8x16xf32>
    %403 = vector.broadcast %11 : vector<1x16xf32> to vector<8x16xf32>
    %404 = arith.addf %402, %403 : vector<8x16xf32>
    %405 = vector.extract_strided_slice %12 {offsets = [0, 80], sizes = [8, 16], strides = [1, 1]} : vector<8x128xf32> to vector<8x16xf32>
    %406 = arith.subf %405, %327 : vector<8x16xf32>
    %407 = tpu.concatenate %405, %406 in 1 : vector<8x16xf32>, vector<8x16xf32> -> vector<8x32xf32>
    %c0_228 = arith.constant 0 : index
    %c0_229 = arith.constant 0 : index
    %408 = vector.load %arg4[%c0_228, %c0_229] : memref<32x64xf32, #tpu.memory_space<vmem>>, vector<32x64xf32>
    %cst_230 = arith.constant dense<0.000000e+00> : vector<8x64xf32>
    %409 = tpu.matmul %407, %408, %cst_230 {dimension_numbers = #tpu.dot_dimension_numbers<[1], [0], [0], [1], [0, 0, 1, 1], [], []>} : vector<8x32xf32>, vector<32x64xf32>, vector<8x64xf32> -> vector<8x64xf32>
    %410 = vector.broadcast %3 : vector<1x64xf32> to vector<8x64xf32>
    %411 = arith.addf %409, %410 : vector<8x64xf32>
    %cst_231 = arith.constant 0.000000e+00 : f32
    %412 = vector.broadcast %cst_231 : f32 to vector<8x64xf32>
    %413 = arith.maximumf %411, %412 : vector<8x64xf32>
    %c0_232 = arith.constant 0 : index
    %c0_233 = arith.constant 0 : index
    %414 = vector.load %arg6[%c0_232, %c0_233] : memref<64x64xf32, #tpu.memory_space<vmem>>, vector<64x64xf32>
    %cst_234 = arith.constant dense<0.000000e+00> : vector<8x64xf32>
    %415 = tpu.matmul %413, %414, %cst_234 {dimension_numbers = #tpu.dot_dimension_numbers<[1], [0], [0], [1], [0, 0, 1, 1], [], []>} : vector<8x64xf32>, vector<64x64xf32>, vector<8x64xf32> -> vector<8x64xf32>
    %416 = vector.broadcast %4 : vector<1x64xf32> to vector<8x64xf32>
    %417 = arith.addf %415, %416 : vector<8x64xf32>
    %cst_235 = arith.constant 0.000000e+00 : f32
    %418 = vector.broadcast %cst_235 : f32 to vector<8x64xf32>
    %419 = arith.maximumf %417, %418 : vector<8x64xf32>
    %c0_236 = arith.constant 0 : index
    %c0_237 = arith.constant 0 : index
    %420 = vector.load %arg7[%c0_236, %c0_237] : memref<64x64xf32, #tpu.memory_space<vmem>>, vector<64x64xf32>
    %cst_238 = arith.constant dense<0.000000e+00> : vector<8x64xf32>
    %421 = tpu.matmul %413, %420, %cst_238 {dimension_numbers = #tpu.dot_dimension_numbers<[1], [0], [0], [1], [0, 0, 1, 1], [], []>} : vector<8x64xf32>, vector<64x64xf32>, vector<8x64xf32> -> vector<8x64xf32>
    %422 = vector.broadcast %5 : vector<1x64xf32> to vector<8x64xf32>
    %423 = arith.addf %421, %422 : vector<8x64xf32>
    %cst_239 = arith.constant 0.000000e+00 : f32
    %424 = vector.broadcast %cst_239 : f32 to vector<8x64xf32>
    %425 = arith.maximumf %423, %424 : vector<8x64xf32>
    %c0_240 = arith.constant 0 : index
    %c0_241 = arith.constant 0 : index
    %426 = vector.load %arg8[%c0_240, %c0_241] : memref<64x64xf32, #tpu.memory_space<vmem>>, vector<64x64xf32>
    %cst_242 = arith.constant dense<0.000000e+00> : vector<8x64xf32>
    %427 = tpu.matmul %413, %426, %cst_242 {dimension_numbers = #tpu.dot_dimension_numbers<[1], [0], [0], [1], [0, 0, 1, 1], [], []>} : vector<8x64xf32>, vector<64x64xf32>, vector<8x64xf32> -> vector<8x64xf32>
    %428 = vector.broadcast %6 : vector<1x64xf32> to vector<8x64xf32>
    %429 = arith.addf %427, %428 : vector<8x64xf32>
    %cst_243 = arith.constant 0.000000e+00 : f32
    %430 = vector.broadcast %cst_243 : f32 to vector<8x64xf32>
    %431 = arith.maximumf %429, %430 : vector<8x64xf32>
    %c0_244 = arith.constant 0 : index
    %c0_245 = arith.constant 0 : index
    %432 = vector.load %arg12[%c0_244, %c0_245] : memref<64x64xf32, #tpu.memory_space<vmem>>, vector<64x64xf32>
    %cst_246 = arith.constant dense<0.000000e+00> : vector<8x64xf32>
    %433 = tpu.matmul %393, %432, %cst_246 {dimension_numbers = #tpu.dot_dimension_numbers<[1], [0], [0], [1], [0, 0, 1, 1], [], []>} : vector<8x64xf32>, vector<64x64xf32>, vector<8x64xf32> -> vector<8x64xf32>
    %434 = vector.broadcast %7 : vector<1x64xf32> to vector<8x64xf32>
    %435 = arith.addf %433, %434 : vector<8x64xf32>
    %cst_247 = arith.constant 0.000000e+00 : f32
    %436 = vector.broadcast %cst_247 : f32 to vector<8x64xf32>
    %437 = arith.maximumf %435, %436 : vector<8x64xf32>
    %c0_248 = arith.constant 0 : index
    %c0_249 = arith.constant 0 : index
    %438 = vector.load %arg13[%c0_248, %c0_249] : memref<64x64xf32, #tpu.memory_space<vmem>>, vector<64x64xf32>
    %cst_250 = arith.constant dense<0.000000e+00> : vector<8x64xf32>
    %439 = tpu.matmul %393, %438, %cst_250 {dimension_numbers = #tpu.dot_dimension_numbers<[1], [0], [0], [1], [0, 0, 1, 1], [], []>} : vector<8x64xf32>, vector<64x64xf32>, vector<8x64xf32> -> vector<8x64xf32>
    %440 = vector.broadcast %8 : vector<1x64xf32> to vector<8x64xf32>
    %441 = arith.addf %439, %440 : vector<8x64xf32>
    %cst_251 = arith.constant 0.000000e+00 : f32
    %442 = vector.broadcast %cst_251 : f32 to vector<8x64xf32>
    %443 = arith.maximumf %441, %442 : vector<8x64xf32>
    %c0_252 = arith.constant 0 : index
    %c0_253 = arith.constant 0 : index
    %444 = vector.load %arg14[%c0_252, %c0_253] : memref<64x64xf32, #tpu.memory_space<vmem>>, vector<64x64xf32>
    %cst_254 = arith.constant dense<0.000000e+00> : vector<8x64xf32>
    %445 = tpu.matmul %393, %444, %cst_254 {dimension_numbers = #tpu.dot_dimension_numbers<[1], [0], [0], [1], [0, 0, 1, 1], [], []>} : vector<8x64xf32>, vector<64x64xf32>, vector<8x64xf32> -> vector<8x64xf32>
    %446 = vector.broadcast %9 : vector<1x64xf32> to vector<8x64xf32>
    %447 = arith.addf %445, %446 : vector<8x64xf32>
    %cst_255 = arith.constant 0.000000e+00 : f32
    %448 = vector.broadcast %cst_255 : f32 to vector<8x64xf32>
    %449 = arith.maximumf %447, %448 : vector<8x64xf32>
    %450 = arith.addf %425, %443 : vector<8x64xf32>
    %cst_256 = arith.constant 0.000000e+00 : f32
    %451 = vector.broadcast %cst_256 : f32 to vector<8x64xf32>
    %452 = arith.subf %451, %450 : vector<8x64xf32>
    %453 = math.exp %452 : vector<8x64xf32>
    %cst_257 = arith.constant 1.000000e+00 : f32
    %454 = vector.broadcast %cst_257 : f32 to vector<8x64xf32>
    %455 = arith.addf %454, %453 : vector<8x64xf32>
    %cst_258 = arith.constant 1.000000e+00 : f32
    %456 = vector.broadcast %cst_258 : f32 to vector<8x64xf32>
    %457 = arith.divf %456, %455 : vector<8x64xf32>
    %458 = arith.addf %419, %437 : vector<8x64xf32>
    %cst_259 = arith.constant 0.000000e+00 : f32
    %459 = vector.broadcast %cst_259 : f32 to vector<8x64xf32>
    %460 = arith.subf %459, %458 : vector<8x64xf32>
    %461 = math.exp %460 : vector<8x64xf32>
    %cst_260 = arith.constant 1.000000e+00 : f32
    %462 = vector.broadcast %cst_260 : f32 to vector<8x64xf32>
    %463 = arith.addf %462, %461 : vector<8x64xf32>
    %cst_261 = arith.constant 1.000000e+00 : f32
    %464 = vector.broadcast %cst_261 : f32 to vector<8x64xf32>
    %465 = arith.divf %464, %463 : vector<8x64xf32>
    %466 = arith.mulf %465, %449 : vector<8x64xf32>
    %467 = arith.addf %431, %466 : vector<8x64xf32>
    %468 = math.tanh %467 : vector<8x64xf32>
    %469 = arith.subf %393, %468 : vector<8x64xf32>
    %470 = arith.mulf %457, %469 : vector<8x64xf32>
    %471 = arith.addf %468, %470 : vector<8x64xf32>
    %c0_262 = arith.constant 0 : index
    %c0_263 = arith.constant 0 : index
    %472 = vector.load %arg18[%c0_262, %c0_263] : memref<64x64xf32, #tpu.memory_space<vmem>>, vector<64x64xf32>
    %cst_264 = arith.constant dense<0.000000e+00> : vector<8x64xf32>
    %473 = tpu.matmul %471, %472, %cst_264 {dimension_numbers = #tpu.dot_dimension_numbers<[1], [0], [0], [1], [0, 0, 1, 1], [], []>} : vector<8x64xf32>, vector<64x64xf32>, vector<8x64xf32> -> vector<8x64xf32>
    %474 = vector.broadcast %10 : vector<1x64xf32> to vector<8x64xf32>
    %475 = arith.addf %473, %474 : vector<8x64xf32>
    %cst_265 = arith.constant 0.000000e+00 : f32
    %476 = vector.broadcast %cst_265 : f32 to vector<8x64xf32>
    %477 = arith.maximumf %475, %476 : vector<8x64xf32>
    %478 = tpu.concatenate %477, %413 in 1 : vector<8x64xf32>, vector<8x64xf32> -> vector<8x128xf32>
    %c0_266 = arith.constant 0 : index
    %c0_267 = arith.constant 0 : index
    %479 = vector.load %arg20[%c0_266, %c0_267] : memref<128x16xf32, #tpu.memory_space<vmem>>, vector<128x16xf32>
    %cst_268 = arith.constant dense<0.000000e+00> : vector<8x16xf32>
    %480 = tpu.matmul %478, %479, %cst_268 {dimension_numbers = #tpu.dot_dimension_numbers<[1], [0], [0], [1], [0, 0, 1, 1], [], []>} : vector<8x128xf32>, vector<128x16xf32>, vector<8x16xf32> -> vector<8x16xf32>
    %481 = vector.broadcast %11 : vector<1x16xf32> to vector<8x16xf32>
    %482 = arith.addf %480, %481 : vector<8x16xf32>
    %483 = vector.extract_strided_slice %12 {offsets = [0, 96], sizes = [8, 16], strides = [1, 1]} : vector<8x128xf32> to vector<8x16xf32>
    %484 = arith.subf %483, %405 : vector<8x16xf32>
    %485 = tpu.concatenate %483, %484 in 1 : vector<8x16xf32>, vector<8x16xf32> -> vector<8x32xf32>
    %c0_269 = arith.constant 0 : index
    %c0_270 = arith.constant 0 : index
    %486 = vector.load %arg4[%c0_269, %c0_270] : memref<32x64xf32, #tpu.memory_space<vmem>>, vector<32x64xf32>
    %cst_271 = arith.constant dense<0.000000e+00> : vector<8x64xf32>
    %487 = tpu.matmul %485, %486, %cst_271 {dimension_numbers = #tpu.dot_dimension_numbers<[1], [0], [0], [1], [0, 0, 1, 1], [], []>} : vector<8x32xf32>, vector<32x64xf32>, vector<8x64xf32> -> vector<8x64xf32>
    %488 = vector.broadcast %3 : vector<1x64xf32> to vector<8x64xf32>
    %489 = arith.addf %487, %488 : vector<8x64xf32>
    %cst_272 = arith.constant 0.000000e+00 : f32
    %490 = vector.broadcast %cst_272 : f32 to vector<8x64xf32>
    %491 = arith.maximumf %489, %490 : vector<8x64xf32>
    %c0_273 = arith.constant 0 : index
    %c0_274 = arith.constant 0 : index
    %492 = vector.load %arg6[%c0_273, %c0_274] : memref<64x64xf32, #tpu.memory_space<vmem>>, vector<64x64xf32>
    %cst_275 = arith.constant dense<0.000000e+00> : vector<8x64xf32>
    %493 = tpu.matmul %491, %492, %cst_275 {dimension_numbers = #tpu.dot_dimension_numbers<[1], [0], [0], [1], [0, 0, 1, 1], [], []>} : vector<8x64xf32>, vector<64x64xf32>, vector<8x64xf32> -> vector<8x64xf32>
    %494 = vector.broadcast %4 : vector<1x64xf32> to vector<8x64xf32>
    %495 = arith.addf %493, %494 : vector<8x64xf32>
    %cst_276 = arith.constant 0.000000e+00 : f32
    %496 = vector.broadcast %cst_276 : f32 to vector<8x64xf32>
    %497 = arith.maximumf %495, %496 : vector<8x64xf32>
    %c0_277 = arith.constant 0 : index
    %c0_278 = arith.constant 0 : index
    %498 = vector.load %arg7[%c0_277, %c0_278] : memref<64x64xf32, #tpu.memory_space<vmem>>, vector<64x64xf32>
    %cst_279 = arith.constant dense<0.000000e+00> : vector<8x64xf32>
    %499 = tpu.matmul %491, %498, %cst_279 {dimension_numbers = #tpu.dot_dimension_numbers<[1], [0], [0], [1], [0, 0, 1, 1], [], []>} : vector<8x64xf32>, vector<64x64xf32>, vector<8x64xf32> -> vector<8x64xf32>
    %500 = vector.broadcast %5 : vector<1x64xf32> to vector<8x64xf32>
    %501 = arith.addf %499, %500 : vector<8x64xf32>
    %cst_280 = arith.constant 0.000000e+00 : f32
    %502 = vector.broadcast %cst_280 : f32 to vector<8x64xf32>
    %503 = arith.maximumf %501, %502 : vector<8x64xf32>
    %c0_281 = arith.constant 0 : index
    %c0_282 = arith.constant 0 : index
    %504 = vector.load %arg8[%c0_281, %c0_282] : memref<64x64xf32, #tpu.memory_space<vmem>>, vector<64x64xf32>
    %cst_283 = arith.constant dense<0.000000e+00> : vector<8x64xf32>
    %505 = tpu.matmul %491, %504, %cst_283 {dimension_numbers = #tpu.dot_dimension_numbers<[1], [0], [0], [1], [0, 0, 1, 1], [], []>} : vector<8x64xf32>, vector<64x64xf32>, vector<8x64xf32> -> vector<8x64xf32>
    %506 = vector.broadcast %6 : vector<1x64xf32> to vector<8x64xf32>
    %507 = arith.addf %505, %506 : vector<8x64xf32>
    %cst_284 = arith.constant 0.000000e+00 : f32
    %508 = vector.broadcast %cst_284 : f32 to vector<8x64xf32>
    %509 = arith.maximumf %507, %508 : vector<8x64xf32>
    %c0_285 = arith.constant 0 : index
    %c0_286 = arith.constant 0 : index
    %510 = vector.load %arg12[%c0_285, %c0_286] : memref<64x64xf32, #tpu.memory_space<vmem>>, vector<64x64xf32>
    %cst_287 = arith.constant dense<0.000000e+00> : vector<8x64xf32>
    %511 = tpu.matmul %471, %510, %cst_287 {dimension_numbers = #tpu.dot_dimension_numbers<[1], [0], [0], [1], [0, 0, 1, 1], [], []>} : vector<8x64xf32>, vector<64x64xf32>, vector<8x64xf32> -> vector<8x64xf32>
    %512 = vector.broadcast %7 : vector<1x64xf32> to vector<8x64xf32>
    %513 = arith.addf %511, %512 : vector<8x64xf32>
    %cst_288 = arith.constant 0.000000e+00 : f32
    %514 = vector.broadcast %cst_288 : f32 to vector<8x64xf32>
    %515 = arith.maximumf %513, %514 : vector<8x64xf32>
    %c0_289 = arith.constant 0 : index
    %c0_290 = arith.constant 0 : index
    %516 = vector.load %arg13[%c0_289, %c0_290] : memref<64x64xf32, #tpu.memory_space<vmem>>, vector<64x64xf32>
    %cst_291 = arith.constant dense<0.000000e+00> : vector<8x64xf32>
    %517 = tpu.matmul %471, %516, %cst_291 {dimension_numbers = #tpu.dot_dimension_numbers<[1], [0], [0], [1], [0, 0, 1, 1], [], []>} : vector<8x64xf32>, vector<64x64xf32>, vector<8x64xf32> -> vector<8x64xf32>
    %518 = vector.broadcast %8 : vector<1x64xf32> to vector<8x64xf32>
    %519 = arith.addf %517, %518 : vector<8x64xf32>
    %cst_292 = arith.constant 0.000000e+00 : f32
    %520 = vector.broadcast %cst_292 : f32 to vector<8x64xf32>
    %521 = arith.maximumf %519, %520 : vector<8x64xf32>
    %c0_293 = arith.constant 0 : index
    %c0_294 = arith.constant 0 : index
    %522 = vector.load %arg14[%c0_293, %c0_294] : memref<64x64xf32, #tpu.memory_space<vmem>>, vector<64x64xf32>
    %cst_295 = arith.constant dense<0.000000e+00> : vector<8x64xf32>
    %523 = tpu.matmul %471, %522, %cst_295 {dimension_numbers = #tpu.dot_dimension_numbers<[1], [0], [0], [1], [0, 0, 1, 1], [], []>} : vector<8x64xf32>, vector<64x64xf32>, vector<8x64xf32> -> vector<8x64xf32>
    %524 = vector.broadcast %9 : vector<1x64xf32> to vector<8x64xf32>
    %525 = arith.addf %523, %524 : vector<8x64xf32>
    %cst_296 = arith.constant 0.000000e+00 : f32
    %526 = vector.broadcast %cst_296 : f32 to vector<8x64xf32>
    %527 = arith.maximumf %525, %526 : vector<8x64xf32>
    %528 = arith.addf %503, %521 : vector<8x64xf32>
    %cst_297 = arith.constant 0.000000e+00 : f32
    %529 = vector.broadcast %cst_297 : f32 to vector<8x64xf32>
    %530 = arith.subf %529, %528 : vector<8x64xf32>
    %531 = math.exp %530 : vector<8x64xf32>
    %cst_298 = arith.constant 1.000000e+00 : f32
    %532 = vector.broadcast %cst_298 : f32 to vector<8x64xf32>
    %533 = arith.addf %532, %531 : vector<8x64xf32>
    %cst_299 = arith.constant 1.000000e+00 : f32
    %534 = vector.broadcast %cst_299 : f32 to vector<8x64xf32>
    %535 = arith.divf %534, %533 : vector<8x64xf32>
    %536 = arith.addf %497, %515 : vector<8x64xf32>
    %cst_300 = arith.constant 0.000000e+00 : f32
    %537 = vector.broadcast %cst_300 : f32 to vector<8x64xf32>
    %538 = arith.subf %537, %536 : vector<8x64xf32>
    %539 = math.exp %538 : vector<8x64xf32>
    %cst_301 = arith.constant 1.000000e+00 : f32
    %540 = vector.broadcast %cst_301 : f32 to vector<8x64xf32>
    %541 = arith.addf %540, %539 : vector<8x64xf32>
    %cst_302 = arith.constant 1.000000e+00 : f32
    %542 = vector.broadcast %cst_302 : f32 to vector<8x64xf32>
    %543 = arith.divf %542, %541 : vector<8x64xf32>
    %544 = arith.mulf %543, %527 : vector<8x64xf32>
    %545 = arith.addf %509, %544 : vector<8x64xf32>
    %546 = math.tanh %545 : vector<8x64xf32>
    %547 = arith.subf %471, %546 : vector<8x64xf32>
    %548 = arith.mulf %535, %547 : vector<8x64xf32>
    %549 = arith.addf %546, %548 : vector<8x64xf32>
    %c0_303 = arith.constant 0 : index
    %c0_304 = arith.constant 0 : index
    %550 = vector.load %arg18[%c0_303, %c0_304] : memref<64x64xf32, #tpu.memory_space<vmem>>, vector<64x64xf32>
    %cst_305 = arith.constant dense<0.000000e+00> : vector<8x64xf32>
    %551 = tpu.matmul %549, %550, %cst_305 {dimension_numbers = #tpu.dot_dimension_numbers<[1], [0], [0], [1], [0, 0, 1, 1], [], []>} : vector<8x64xf32>, vector<64x64xf32>, vector<8x64xf32> -> vector<8x64xf32>
    %552 = vector.broadcast %10 : vector<1x64xf32> to vector<8x64xf32>
    %553 = arith.addf %551, %552 : vector<8x64xf32>
    %cst_306 = arith.constant 0.000000e+00 : f32
    %554 = vector.broadcast %cst_306 : f32 to vector<8x64xf32>
    %555 = arith.maximumf %553, %554 : vector<8x64xf32>
    %556 = tpu.concatenate %555, %491 in 1 : vector<8x64xf32>, vector<8x64xf32> -> vector<8x128xf32>
    %c0_307 = arith.constant 0 : index
    %c0_308 = arith.constant 0 : index
    %557 = vector.load %arg20[%c0_307, %c0_308] : memref<128x16xf32, #tpu.memory_space<vmem>>, vector<128x16xf32>
    %cst_309 = arith.constant dense<0.000000e+00> : vector<8x16xf32>
    %558 = tpu.matmul %556, %557, %cst_309 {dimension_numbers = #tpu.dot_dimension_numbers<[1], [0], [0], [1], [0, 0, 1, 1], [], []>} : vector<8x128xf32>, vector<128x16xf32>, vector<8x16xf32> -> vector<8x16xf32>
    %559 = vector.broadcast %11 : vector<1x16xf32> to vector<8x16xf32>
    %560 = arith.addf %558, %559 : vector<8x16xf32>
    %561 = vector.extract_strided_slice %12 {offsets = [0, 112], sizes = [8, 16], strides = [1, 1]} : vector<8x128xf32> to vector<8x16xf32>
    %562 = arith.subf %561, %483 : vector<8x16xf32>
    %563 = tpu.concatenate %561, %562 in 1 : vector<8x16xf32>, vector<8x16xf32> -> vector<8x32xf32>
    %c0_310 = arith.constant 0 : index
    %c0_311 = arith.constant 0 : index
    %564 = vector.load %arg4[%c0_310, %c0_311] : memref<32x64xf32, #tpu.memory_space<vmem>>, vector<32x64xf32>
    %cst_312 = arith.constant dense<0.000000e+00> : vector<8x64xf32>
    %565 = tpu.matmul %563, %564, %cst_312 {dimension_numbers = #tpu.dot_dimension_numbers<[1], [0], [0], [1], [0, 0, 1, 1], [], []>} : vector<8x32xf32>, vector<32x64xf32>, vector<8x64xf32> -> vector<8x64xf32>
    %566 = vector.broadcast %3 : vector<1x64xf32> to vector<8x64xf32>
    %567 = arith.addf %565, %566 : vector<8x64xf32>
    %cst_313 = arith.constant 0.000000e+00 : f32
    %568 = vector.broadcast %cst_313 : f32 to vector<8x64xf32>
    %569 = arith.maximumf %567, %568 : vector<8x64xf32>
    %c0_314 = arith.constant 0 : index
    %c0_315 = arith.constant 0 : index
    %570 = vector.load %arg6[%c0_314, %c0_315] : memref<64x64xf32, #tpu.memory_space<vmem>>, vector<64x64xf32>
    %cst_316 = arith.constant dense<0.000000e+00> : vector<8x64xf32>
    %571 = tpu.matmul %569, %570, %cst_316 {dimension_numbers = #tpu.dot_dimension_numbers<[1], [0], [0], [1], [0, 0, 1, 1], [], []>} : vector<8x64xf32>, vector<64x64xf32>, vector<8x64xf32> -> vector<8x64xf32>
    %572 = vector.broadcast %4 : vector<1x64xf32> to vector<8x64xf32>
    %573 = arith.addf %571, %572 : vector<8x64xf32>
    %cst_317 = arith.constant 0.000000e+00 : f32
    %574 = vector.broadcast %cst_317 : f32 to vector<8x64xf32>
    %575 = arith.maximumf %573, %574 : vector<8x64xf32>
    %c0_318 = arith.constant 0 : index
    %c0_319 = arith.constant 0 : index
    %576 = vector.load %arg7[%c0_318, %c0_319] : memref<64x64xf32, #tpu.memory_space<vmem>>, vector<64x64xf32>
    %cst_320 = arith.constant dense<0.000000e+00> : vector<8x64xf32>
    %577 = tpu.matmul %569, %576, %cst_320 {dimension_numbers = #tpu.dot_dimension_numbers<[1], [0], [0], [1], [0, 0, 1, 1], [], []>} : vector<8x64xf32>, vector<64x64xf32>, vector<8x64xf32> -> vector<8x64xf32>
    %578 = vector.broadcast %5 : vector<1x64xf32> to vector<8x64xf32>
    %579 = arith.addf %577, %578 : vector<8x64xf32>
    %cst_321 = arith.constant 0.000000e+00 : f32
    %580 = vector.broadcast %cst_321 : f32 to vector<8x64xf32>
    %581 = arith.maximumf %579, %580 : vector<8x64xf32>
    %c0_322 = arith.constant 0 : index
    %c0_323 = arith.constant 0 : index
    %582 = vector.load %arg8[%c0_322, %c0_323] : memref<64x64xf32, #tpu.memory_space<vmem>>, vector<64x64xf32>
    %cst_324 = arith.constant dense<0.000000e+00> : vector<8x64xf32>
    %583 = tpu.matmul %569, %582, %cst_324 {dimension_numbers = #tpu.dot_dimension_numbers<[1], [0], [0], [1], [0, 0, 1, 1], [], []>} : vector<8x64xf32>, vector<64x64xf32>, vector<8x64xf32> -> vector<8x64xf32>
    %584 = vector.broadcast %6 : vector<1x64xf32> to vector<8x64xf32>
    %585 = arith.addf %583, %584 : vector<8x64xf32>
    %cst_325 = arith.constant 0.000000e+00 : f32
    %586 = vector.broadcast %cst_325 : f32 to vector<8x64xf32>
    %587 = arith.maximumf %585, %586 : vector<8x64xf32>
    %c0_326 = arith.constant 0 : index
    %c0_327 = arith.constant 0 : index
    %588 = vector.load %arg12[%c0_326, %c0_327] : memref<64x64xf32, #tpu.memory_space<vmem>>, vector<64x64xf32>
    %cst_328 = arith.constant dense<0.000000e+00> : vector<8x64xf32>
    %589 = tpu.matmul %549, %588, %cst_328 {dimension_numbers = #tpu.dot_dimension_numbers<[1], [0], [0], [1], [0, 0, 1, 1], [], []>} : vector<8x64xf32>, vector<64x64xf32>, vector<8x64xf32> -> vector<8x64xf32>
    %590 = vector.broadcast %7 : vector<1x64xf32> to vector<8x64xf32>
    %591 = arith.addf %589, %590 : vector<8x64xf32>
    %cst_329 = arith.constant 0.000000e+00 : f32
    %592 = vector.broadcast %cst_329 : f32 to vector<8x64xf32>
    %593 = arith.maximumf %591, %592 : vector<8x64xf32>
    %c0_330 = arith.constant 0 : index
    %c0_331 = arith.constant 0 : index
    %594 = vector.load %arg13[%c0_330, %c0_331] : memref<64x64xf32, #tpu.memory_space<vmem>>, vector<64x64xf32>
    %cst_332 = arith.constant dense<0.000000e+00> : vector<8x64xf32>
    %595 = tpu.matmul %549, %594, %cst_332 {dimension_numbers = #tpu.dot_dimension_numbers<[1], [0], [0], [1], [0, 0, 1, 1], [], []>} : vector<8x64xf32>, vector<64x64xf32>, vector<8x64xf32> -> vector<8x64xf32>
    %596 = vector.broadcast %8 : vector<1x64xf32> to vector<8x64xf32>
    %597 = arith.addf %595, %596 : vector<8x64xf32>
    %cst_333 = arith.constant 0.000000e+00 : f32
    %598 = vector.broadcast %cst_333 : f32 to vector<8x64xf32>
    %599 = arith.maximumf %597, %598 : vector<8x64xf32>
    %c0_334 = arith.constant 0 : index
    %c0_335 = arith.constant 0 : index
    %600 = vector.load %arg14[%c0_334, %c0_335] : memref<64x64xf32, #tpu.memory_space<vmem>>, vector<64x64xf32>
    %cst_336 = arith.constant dense<0.000000e+00> : vector<8x64xf32>
    %601 = tpu.matmul %549, %600, %cst_336 {dimension_numbers = #tpu.dot_dimension_numbers<[1], [0], [0], [1], [0, 0, 1, 1], [], []>} : vector<8x64xf32>, vector<64x64xf32>, vector<8x64xf32> -> vector<8x64xf32>
    %602 = vector.broadcast %9 : vector<1x64xf32> to vector<8x64xf32>
    %603 = arith.addf %601, %602 : vector<8x64xf32>
    %cst_337 = arith.constant 0.000000e+00 : f32
    %604 = vector.broadcast %cst_337 : f32 to vector<8x64xf32>
    %605 = arith.maximumf %603, %604 : vector<8x64xf32>
    %606 = arith.addf %581, %599 : vector<8x64xf32>
    %cst_338 = arith.constant 0.000000e+00 : f32
    %607 = vector.broadcast %cst_338 : f32 to vector<8x64xf32>
    %608 = arith.subf %607, %606 : vector<8x64xf32>
    %609 = math.exp %608 : vector<8x64xf32>
    %cst_339 = arith.constant 1.000000e+00 : f32
    %610 = vector.broadcast %cst_339 : f32 to vector<8x64xf32>
    %611 = arith.addf %610, %609 : vector<8x64xf32>
    %cst_340 = arith.constant 1.000000e+00 : f32
    %612 = vector.broadcast %cst_340 : f32 to vector<8x64xf32>
    %613 = arith.divf %612, %611 : vector<8x64xf32>
    %614 = arith.addf %575, %593 : vector<8x64xf32>
    %cst_341 = arith.constant 0.000000e+00 : f32
    %615 = vector.broadcast %cst_341 : f32 to vector<8x64xf32>
    %616 = arith.subf %615, %614 : vector<8x64xf32>
    %617 = math.exp %616 : vector<8x64xf32>
    %cst_342 = arith.constant 1.000000e+00 : f32
    %618 = vector.broadcast %cst_342 : f32 to vector<8x64xf32>
    %619 = arith.addf %618, %617 : vector<8x64xf32>
    %cst_343 = arith.constant 1.000000e+00 : f32
    %620 = vector.broadcast %cst_343 : f32 to vector<8x64xf32>
    %621 = arith.divf %620, %619 : vector<8x64xf32>
    %622 = arith.mulf %621, %605 : vector<8x64xf32>
    %623 = arith.addf %587, %622 : vector<8x64xf32>
    %624 = math.tanh %623 : vector<8x64xf32>
    %625 = arith.subf %549, %624 : vector<8x64xf32>
    %626 = arith.mulf %613, %625 : vector<8x64xf32>
    %627 = arith.addf %624, %626 : vector<8x64xf32>
    %c0_344 = arith.constant 0 : index
    %c0_345 = arith.constant 0 : index
    %628 = vector.load %arg18[%c0_344, %c0_345] : memref<64x64xf32, #tpu.memory_space<vmem>>, vector<64x64xf32>
    %cst_346 = arith.constant dense<0.000000e+00> : vector<8x64xf32>
    %629 = tpu.matmul %627, %628, %cst_346 {dimension_numbers = #tpu.dot_dimension_numbers<[1], [0], [0], [1], [0, 0, 1, 1], [], []>} : vector<8x64xf32>, vector<64x64xf32>, vector<8x64xf32> -> vector<8x64xf32>
    %630 = vector.broadcast %10 : vector<1x64xf32> to vector<8x64xf32>
    %631 = arith.addf %629, %630 : vector<8x64xf32>
    %cst_347 = arith.constant 0.000000e+00 : f32
    %632 = vector.broadcast %cst_347 : f32 to vector<8x64xf32>
    %633 = arith.maximumf %631, %632 : vector<8x64xf32>
    %634 = tpu.concatenate %633, %569 in 1 : vector<8x64xf32>, vector<8x64xf32> -> vector<8x128xf32>
    %c0_348 = arith.constant 0 : index
    %c0_349 = arith.constant 0 : index
    %635 = vector.load %arg20[%c0_348, %c0_349] : memref<128x16xf32, #tpu.memory_space<vmem>>, vector<128x16xf32>
    %cst_350 = arith.constant dense<0.000000e+00> : vector<8x16xf32>
    %636 = tpu.matmul %634, %635, %cst_350 {dimension_numbers = #tpu.dot_dimension_numbers<[1], [0], [0], [1], [0, 0, 1, 1], [], []>} : vector<8x128xf32>, vector<128x16xf32>, vector<8x16xf32> -> vector<8x16xf32>
    %637 = vector.broadcast %11 : vector<1x16xf32> to vector<8x16xf32>
    %638 = arith.addf %636, %637 : vector<8x16xf32>
    %639 = tpu.concatenate %92, %170, %248, %326, %404, %482, %560, %638 in 1 : vector<8x16xf32>, vector<8x16xf32>, vector<8x16xf32>, vector<8x16xf32>, vector<8x16xf32>, vector<8x16xf32>, vector<8x16xf32>, vector<8x16xf32> -> vector<8x128xf32>
    %c0_351 = arith.constant 0 : index
    %c0_352 = arith.constant 0 : index
    %640 = vector.load %arg22[%c0_351, %c0_352] : memref<8x128xf32, #tpu.memory_space<vmem>>, vector<8x128xf32>
    tpu.vector_store %arg22[%c0_351, %c0_352], %639 {strides = array<i32>} : memref<8x128xf32, #tpu.memory_space<vmem>>, vector<8x128xf32>,
    %c0_353 = arith.constant 0 : index
    %c0_354 = arith.constant 0 : index
    %641 = vector.load %arg24[%c0_353, %c0_354] : memref<8x64xf32, #tpu.memory_space<vmem>>, vector<8x64xf32>
    tpu.vector_store %arg24[%c0_353, %c0_354], %627 {strides = array<i32>} : memref<8x64xf32, #tpu.memory_space<vmem>>, vector<8x64xf32>,
    %c0_355 = arith.constant 0 : index
    %c0_356 = arith.constant 0 : index
    %642 = vector.load %arg25[%c0_355, %c0_356] : memref<8x16xf32, #tpu.memory_space<vmem>>, vector<8x16xf32>
    tpu.vector_store %arg25[%c0_355, %c0_356], %561 {strides = array<i32>} : memref<8x16xf32, #tpu.memory_space<vmem>>, vector<8x16xf32>,
    %c0_357 = arith.constant 0 : index
    %c0_358 = arith.constant 0 : index
    %643 = vector.load %arg23[%c0_357, %c0_358] : memref<8x64xf32, #tpu.memory_space<vmem>>, vector<8x64xf32>
    tpu.vector_store %arg23[%c0_357, %c0_358], %627 {strides = array<i32>} : memref<8x64xf32, #tpu.memory_space<vmem>>, vector<8x64xf32>,
    return
  }
  func.func @transform_0(%arg0: i32) -> (i32, i32) {
    %c0_i32 = arith.constant 0 : i32
    %c0_i32_0 = arith.constant 0 : i32
    %c0_i32_1 = arith.constant 0 : i32
    return %c0_i32, %c0_i32_0 : i32, i32
  }
  func.func @transform_1(%arg0: i32) -> (i32, i32) {
    %c0_i32 = arith.constant 0 : i32
    %c0_i32_0 = arith.constant 0 : i32
    %c0_i32_1 = arith.constant 0 : i32
    return %c0_i32, %c0_i32_0 : i32, i32
  }
  func.func @transform_2(%arg0: i32) -> (i32, i32) {
    %c0_i32 = arith.constant 0 : i32
    %c0_i32_0 = arith.constant 0 : i32
    return %c0_i32, %arg0 : i32, i32
  }
  func.func @transform_3(%arg0: i32) -> (i32, i32) {
    %c0_i32 = arith.constant 0 : i32
    %c0_i32_0 = arith.constant 0 : i32
    %c0_i32_1 = arith.constant 0 : i32
    return %c0_i32, %c0_i32_0 : i32, i32
  }
  func.func @transform_4(%arg0: i32) -> (i32, i32) {
    %c0_i32 = arith.constant 0 : i32
    %c0_i32_0 = arith.constant 0 : i32
    %c0_i32_1 = arith.constant 0 : i32
    return %c0_i32, %c0_i32_0 : i32, i32
  }
  func.func @transform_5(%arg0: i32) -> (i32, i32) {
    %c0_i32 = arith.constant 0 : i32
    %c0_i32_0 = arith.constant 0 : i32
    %c0_i32_1 = arith.constant 0 : i32
    return %c0_i32, %c0_i32_0 : i32, i32
  }
  func.func @transform_6(%arg0: i32) -> (i32, i32) {
    %c0_i32 = arith.constant 0 : i32
    %c0_i32_0 = arith.constant 0 : i32
    %c0_i32_1 = arith.constant 0 : i32
    return %c0_i32, %c0_i32_0 : i32, i32
  }
  func.func @transform_7(%arg0: i32) -> (i32, i32) {
    %c0_i32 = arith.constant 0 : i32
    %c0_i32_0 = arith.constant 0 : i32
    %c0_i32_1 = arith.constant 0 : i32
    return %c0_i32, %c0_i32_0 : i32, i32
  }
  func.func @transform_8(%arg0: i32) -> (i32, i32) {
    %c0_i32 = arith.constant 0 : i32
    %c0_i32_0 = arith.constant 0 : i32
    %c0_i32_1 = arith.constant 0 : i32
    return %c0_i32, %c0_i32_0 : i32, i32
  }
  func.func @transform_9(%arg0: i32) -> (i32, i32) {
    %c0_i32 = arith.constant 0 : i32
    %c0_i32_0 = arith.constant 0 : i32
    %c0_i32_1 = arith.constant 0 : i32
    return %c0_i32, %c0_i32_0 : i32, i32
  }
  func.func @transform_10(%arg0: i32) -> (i32, i32) {
    %c0_i32 = arith.constant 0 : i32
    %c0_i32_0 = arith.constant 0 : i32
    %c0_i32_1 = arith.constant 0 : i32
    return %c0_i32, %c0_i32_0 : i32, i32
  }
  func.func @transform_11(%arg0: i32) -> (i32, i32) {
    %c0_i32 = arith.constant 0 : i32
    %c0_i32_0 = arith.constant 0 : i32
    %c0_i32_1 = arith.constant 0 : i32
    return %c0_i32, %c0_i32_0 : i32, i32
  }
  func.func @transform_12(%arg0: i32) -> (i32, i32) {
    %c0_i32 = arith.constant 0 : i32
    %c0_i32_0 = arith.constant 0 : i32
    %c0_i32_1 = arith.constant 0 : i32
    return %c0_i32, %c0_i32_0 : i32, i32
  }
  func.func @transform_13(%arg0: i32) -> (i32, i32) {
    %c0_i32 = arith.constant 0 : i32
    %c0_i32_0 = arith.constant 0 : i32
    %c0_i32_1 = arith.constant 0 : i32
    return %c0_i32, %c0_i32_0 : i32, i32
  }
  func.func @transform_14(%arg0: i32) -> (i32, i32) {
    %c0_i32 = arith.constant 0 : i32
    %c0_i32_0 = arith.constant 0 : i32
    %c0_i32_1 = arith.constant 0 : i32
    return %c0_i32, %c0_i32_0 : i32, i32
  }
  func.func @transform_15(%arg0: i32) -> (i32, i32) {
    %c0_i32 = arith.constant 0 : i32
    %c0_i32_0 = arith.constant 0 : i32
    %c0_i32_1 = arith.constant 0 : i32
    return %c0_i32, %c0_i32_0 : i32, i32
  }
  func.func @transform_16(%arg0: i32) -> (i32, i32) {
    %c0_i32 = arith.constant 0 : i32
    %c0_i32_0 = arith.constant 0 : i32
    %c0_i32_1 = arith.constant 0 : i32
    return %c0_i32, %c0_i32_0 : i32, i32
  }
  func.func @transform_17(%arg0: i32) -> (i32, i32) {
    %c0_i32 = arith.constant 0 : i32
    %c0_i32_0 = arith.constant 0 : i32
    %c0_i32_1 = arith.constant 0 : i32
    return %c0_i32, %c0_i32_0 : i32, i32
  }
  func.func @transform_18(%arg0: i32) -> (i32, i32) {
    %c0_i32 = arith.constant 0 : i32
    %c0_i32_0 = arith.constant 0 : i32
    %c0_i32_1 = arith.constant 0 : i32
    return %c0_i32, %c0_i32_0 : i32, i32
  }
  func.func @transform_19(%arg0: i32) -> (i32, i32) {
    %c0_i32 = arith.constant 0 : i32
    %c0_i32_0 = arith.constant 0 : i32
    %c0_i32_1 = arith.constant 0 : i32
    return %c0_i32, %c0_i32_0 : i32, i32
  }
  func.func @transform_20(%arg0: i32) -> (i32, i32) {
    %c0_i32 = arith.constant 0 : i32
    %c0_i32_0 = arith.constant 0 : i32
    %c0_i32_1 = arith.constant 0 : i32
    return %c0_i32, %c0_i32_0 : i32, i32
  }
  func.func @transform_21(%arg0: i32) -> (i32, i32) {
    %c0_i32 = arith.constant 0 : i32
    %c0_i32_0 = arith.constant 0 : i32
    return %c0_i32, %arg0 : i32, i32
  }
  func.func @transform_22(%arg0: i32) -> (i32, i32) {
    %c0_i32 = arith.constant 0 : i32
    %c0_i32_0 = arith.constant 0 : i32
    %c0_i32_1 = arith.constant 0 : i32
    return %c0_i32, %c0_i32_0 : i32, i32
  }
}

</mosaic_0001>

<bundles_post_ra>
// kernel: forward.1
= control target key start
LH: loop header
LB: loop body
LE: loop exit
PB: predicated region body
PF: predicated region fallthrough
CT: control target
= control target key end

     0   :  { %s4479_s0 = inlined_call_operand.vmem [shape: f32[8,64], index: 0, kind: input, shape index: {}]   ;;  %s4480_s1 = inlined_call_operand.vmem [shape: f32[8,16], index: 1, kind: input, shape index: {}]   ;;  %s4481_s2 = inlined_call_operand.vmem [shape: f32[8,128], index: 2, kind: input, shape index: {}]   ;;  %s4482_s3 = inlined_call_operand.hbm [shape: f32[32,64], index: 3, kind: input, shape index: {}]   ;;  %s4483_s4 = inlined_call_operand.vmem [shape: f32[1,64], index: 4, kind: input, shape index: {}]   ;;  %s4484_s5 = inlined_call_operand.vmem [shape: f32[64,64], index: 5, kind: input, shape index: {}]   ;;  %s4485_s6 = inlined_call_operand.hbm [shape: f32[64,64], index: 6, kind: input, shape index: {}]   ;;  %s4486_s7 = inlined_call_operand.hbm [shape: f32[64,64], index: 7, kind: input, shape index: {}]   ;;  %s4487_s8 = inlined_call_operand.vmem [shape: f32[1,64], index: 8, kind: input, shape index: {}]   ;;  %s4488_s9 = inlined_call_operand.vmem [shape: f32[1,64], index: 9, kind: input, shape index: {}]   ;;  %s4489_s10 = inlined_call_operand.vmem [shape: f32[1,64], index: 10, kind: input, shape index: {}]   ;;  %s4490_s11 = inlined_call_operand.hbm [shape: f32[64,64], index: 11, kind: input, shape index: {}]   ;;  %s4491_s12 = inlined_call_operand.hbm [shape: f32[64,64], index: 12, kind: input, shape index: {}]   ;;  %s4492_s13 = inlined_call_operand.hbm [shape: f32[64,64], index: 13, kind: input, shape index: {}]   ;;  %s4493_s14 = inlined_call_operand.vmem [shape: f32[1,64], index: 14, kind: input, shape index: {}]   ;;  %s4494_s15 = inlined_call_operand.vmem [shape: f32[1,64], index: 15, kind: input, shape index: {}]   ;;  %s4495_s16 = inlined_call_operand.vmem [shape: f32[1,64], index: 16, kind: input, shape index: {}]   ;;  %s4496_s17 = inlined_call_operand.hbm [shape: f32[64,64], index: 17, kind: input, shape index: {}]   ;;  %s4497_s18 = inlined_call_operand.vmem [shape: f32[1,64], index: 18, kind: input, shape index: {}]   ;;  %s4498_s19 = inlined_call_operand.hbm [shape: f32[128,16], index: 19, kind: input, shape index: {}]   ;;  %s4499_s20 = inlined_call_operand.vmem [shape: f32[1,16], index: 20, kind: input, shape index: {}]   ;;  %s4500_s21 = inlined_call_operand.vmem [shape: f32[8,128], index: 21, kind: output, shape index: {0}]   ;;  %s4501_s22 = inlined_call_operand.vmem [shape: f32[8,64], index: 22, kind: output, shape index: {1}]  }
   0x1   :  { %4631 = sst [smem:[#allocation56_spill]] %s4479_s0 }
   0x2   :  { %4632 = sst [smem:[#allocation57_spill]] %s4480_s1 }
   0x3   :  { %4633 = sst [smem:[#allocation58_spill]] %s4481_s2 }
   0x4   :  { %4634 = sst [smem:[#allocation59_spill]] %s4482_s3 }
   0x5   :  { %4635 = sst [smem:[#allocation60_spill]] %s4483_s4 }
   0x6   :  { %4636 = sst [smem:[#allocation61_spill]] %s4484_s5 }
   0x7   :  { %4637 = sst [smem:[#allocation62_spill]] %s4485_s6 }
   0x8   :  { %28 = vsyncpa [#allocation5], 0 }
   0x9   :  { %29 = vsyncpa [#allocation7], 0 }
   0xa   :  { %30 = vsyncpa [#allocation10], 0 }
   0xb   :  { %31 = vsyncpa [#allocation13], 0 }
   0xc   :  { %32 = vsyncpa [#allocation16], 0  ;;  %s4638_s29 = sld [smem:[#allocation62_spill]]  ;;  %s2902_s4 = smov [#allocation6]  }
   0xd   :  { %s62_s0 = sshll.u32 %s2902_s4, 4  ;;  %s92_s5 = sshll.u32 %s4490_s11, 4  ;;  %s63_s0 = int_to_ptr.vmem [resolvable:$true] %s62_s0  ;;  %s93_s5 = int_to_ptr.hbm [resolvable:$true] %s92_s5 }
   0xe   :  { %s2903_s24 = smov 128   ;;  %s2904_s6 = smov 8  }
   0xf   :  { %s2905_s25 = smov [#allocation9]   ;;  %s118_s3 = sshll.u32 %s4492_s13, 4  ;;  %s119_s3 = int_to_ptr.hbm [resolvable:$true] %s118_s3 }
  0x10   :  { %s94_s26 = sshll.u32 %s2905_s25, 4  ;;  %s2906_s23 = smov [#allocation12]   ;;  %s95_s26 = int_to_ptr.vmem [resolvable:$true] %s94_s26 }
  0x11   :  { %100 = dma.hbm_to_vmem [thread:$0]  %s93_s5, 1024, %s95_s26, [#allocation10], %s2903_s24, %s2903_s24, %s2904_s6  }
  0x12   :  { %s60_s30 = sshll.u32 %s4638_s29, 4  ;;  %s4639_s29 = sld [smem:[#allocation59_spill]]  ;;  %s61_s30 = int_to_ptr.hbm [resolvable:$true] %s60_s30 }
  0x13   :  { %68 = dma.hbm_to_vmem [thread:$0]  %s61_s30, 1024, %s63_s0, [#allocation7], %s2903_s24, %s2903_s24, %s2904_s6  }
  0x14   :  { %s120_s1 = sshll.u32 %s2906_s23, 4  ;;  %s2907_s30 = smov [#allocation4]   ;;  %s121_s1 = int_to_ptr.vmem [resolvable:$true] %s120_s1 }
  0x15   :  { %126 = dma.hbm_to_vmem [thread:$0]  %s119_s3, 1024, %s121_s1, [#allocation13], %s2903_s24, %s2903_s24, %s2904_s6  }
  0x16   :  { %s45_s13 = sshll.u32 %s2907_s30, 4  ;;  %s73_s2 = sshll.u32 %s4486_s7, 4  ;;  %s46_s13 = int_to_ptr.vmem [resolvable:$true] %s45_s13  ;;  %s74_s2 = int_to_ptr.hbm [resolvable:$true] %s73_s2 }
  0x17   :  { %s105_s27 = sshll.u32 %s4491_s12, 4  ;;  %s2908_s11 = smov [#allocation8]   ;;  %s106_s27 = int_to_ptr.hbm [resolvable:$true] %s105_s27 }
  0x18   :  { %s43_s4 = sshll.u32 %s4639_s29, 4  ;;  %s75_s28 = sshll.u32 %s2908_s11, 4  ;;  %s44_s4 = int_to_ptr.hbm [resolvable:$true] %s43_s4  ;;  %s76_s28 = int_to_ptr.vmem [resolvable:$true] %s75_s28 }
  0x19   :  { %51 = dma.hbm_to_vmem [thread:$0]  %s44_s4, 512, %s46_s13, [#allocation5], %s2903_s24, %s2903_s24, %s2904_s6  }
  0x1a   :  { %81 = dma.hbm_to_vmem [thread:$0]  %s74_s2, 1024, %s76_s28, [#allocation7], %s2903_s24, %s2903_s24, %s2904_s6  }
  0x1b   :  { %s2909_s3 = smov [#allocation11]   ;;  %s137_s1 = sshll.u32 %s4496_s17, 4  ;;  %s138_s1 = int_to_ptr.hbm [resolvable:$true] %s137_s1 }
  0x1c   :  { %s107_s7 = sshll.u32 %s2909_s3, 4  ;;  %s152_s30 = sshll.u32 %s4498_s19, 4  ;;  %s108_s7 = int_to_ptr.vmem [resolvable:$true] %s107_s7  ;;  %s153_s30 = int_to_ptr.hbm [resolvable:$true] %s152_s30 }
  0x1d   :  { %113 = dma.hbm_to_vmem [thread:$0]  %s106_s27, 1024, %s108_s7, [#allocation10], %s2903_s24, %s2903_s24, %s2904_s6  }
  0x1e   :  { %s2910_s13 = smov [#allocation14]   ;;  %s2911_s25 = smov [#allocation15]  }
  0x1f   :  { %s139_s0 = sshll.u32 %s2910_s13, 4  ;;  %s154_s17 = sshll.u32 %s2911_s25, 4  ;;  %s140_s0 = int_to_ptr.vmem [resolvable:$true] %s139_s0  ;;  %s155_s17 = int_to_ptr.vmem [resolvable:$true] %s154_s17 }
  0x20   :  { %145 = dma.hbm_to_vmem [thread:$0]  %s138_s1, 1024, %s140_s0, [#allocation13], %s2903_s24, %s2903_s24, %s2904_s6  }
  0x21   :  { %160 = dma.hbm_to_vmem [thread:$0]  %s153_s30, 2048, %s155_s17, [#allocation16], %s2903_s24, %s2903_s24, %s2904_s6  }
  0x22   :  { %2892 = dma.done.wait [#allocation5], 512  }
  0x23   :  { %2893 = vsyncadd [#allocation5], 4294966784 }
  0x24   :  { %2894 = dma.done.wait [#allocation7], 2048  }
  0x25   :  { %2895 = vsyncadd [#allocation7], 4294965248 }
  0x26   :  { %2896 = dma.done.wait [#allocation10], 2048  }
  0x27   :  { %2897 = vsyncadd [#allocation10], 4294965248 }
  0x28   :  { %2898 = dma.done.wait [#allocation13], 2048  }
  0x29   :  { %2899 = vsyncadd [#allocation13], 4294965248 }
  0x2a   :  { %2900 = dma.done.wait [#allocation16], 2048  }
  0x2b   :  { %2901 = vsyncadd [#allocation16], 4294965248  ;;  %vm203_vm0 = vcmask 130048   ;;  %s4640_s5 = sld [smem:[#allocation57_spill]]  ;;  %v3090_v2 = vld [vmem:[#allocation4 + $0x18] sm:$0xff]  ;;  %v3094_v3 = vld [vmem:[#allocation4 + $0x10] sm:$0xff] }
  0x2c   :  { %s4641_s11 = sld [smem:[#allocation58_spill]]  ;;  %247 = vmatpush.msra.mxu0 %v3090_v2  ;;  %v3096_v4 = vld [vmem:[#allocation4 + $0x8] sm:$0xff]  ;;  %s2912_s24 = smov 112   ;;  %v3108_v7 = vld [vmem:[#allocation4] sm:$0xff]  ;;  %v3127_v11 = vld [vmem:[#allocation6 + $0x38] sm:$0xff]  ;;  %vm231_vm1 = vcmask 261120  }
  0x2d   :  { %s2913_s6 = smov 16   ;;  %s2914_s28 = smov 80   ;;  %311 = vmatpush.msra.mxu2 %v3127_v11  ;;  %v3131_v12 = vld [vmem:[#allocation9 + $0x38] sm:$0xff]  ;;  %v3133_v13 = vld [vmem:[#allocation6 + $0x30] sm:$0xff]  ;;  %v3143_v16 = vld [vmem:[#allocation6 + $0x28] sm:$0xff]  ;;  %vm200_vm2 = vcmask 523264  }
  0x2e   :  { %248 = vmatpush.msra.mxu0 %v3094_v3  ;;  %s4642_s29 = sld [smem:[#allocation61_spill]]  ;;  %4645 = vst [vmem:[#allocation24_spill] sm:$0xff] %v3131_v12  ;;  %v3141_v15 = vld [vmem:[#allocation9 + $0x30] sm:$0xff]  ;;  %v3147_v17 = vld [vmem:[#allocation9 + $0x28] sm:$0xff]  ;;  %v3155_v19 = vld [vmem:[#allocation6 + $0x20] sm:$0xff]  ;;  %s2916_s3 = smov 48  }
  0x2f   :  { %4647 = vst [vmem:[#allocation26_spill] sm:$0xff] %v3141_v15  ;;  %312 = vmatpush.msra.mxu2 %v3133_v13  ;;  %v3159_v20 = vld [vmem:[#allocation9 + $0x20] sm:$0xff]  ;;  %v3167_v22 = vld [vmem:[#allocation6 + $0x18] sm:$0xff]  ;;  %v3179_v25 = vld [vmem:[#allocation6 + $0x10] sm:$0xff]  ;;  %s2917_s7 = smov 32   ;;  %s4656_s12 = sld [smem:[#allocation56_spill]] }
  0x30   :  { %249 = vmatpush.msra.mxu0 %v3096_v4  ;;  %4648 = vst [vmem:[#allocation27_spill] sm:$0xff] %v3147_v17  ;;  %v3171_v23 = vld [vmem:[#allocation9 + $0x18] sm:$0xff]  ;;  %v3183_v26 = vld [vmem:[#allocation9 + $0x10] sm:$0xff]  ;;  %v3200_v30 = vld [vmem:[#allocation8 + $0x28] sm:$0xff]  ;;  %s2918_s4 = smov 96   ;;  %s4660_s0 = sld [smem:[#allocation60_spill]] }
  0x31   :  { %v202_v0 = vld [vmem:[%s4640_s5] sm:$0xff]  ;;  %313 = vmatpush.msra.mxu2 %v3143_v16  ;;  %4650 = vst [vmem:[#allocation29_spill] sm:$0xff] %v3159_v20  ;;  %v3192_v28 = vld [vmem:[#allocation8 + $0x38] sm:$0xff]  ;;  %v3203_v31 = vld [vmem:[#allocation8 + $0x20] sm:$0xff] }
  0x32   :  { %v3088_v1 = vld [vmem:[%s4641_s11] sm:$0xff]  ;;  %204 = vst.msk [vmem:[#allocation3] sm:$0xff] %vm203_vm0, %v202_v0  ;;  %250 = vmatpush.msra.mxu0 %v3108_v7  ;;  %v3206_v32 = vld [vmem:[#allocation8 + $0x18] sm:$0xff]  ;;  %s2915_s11 = smov 64   ;;  %v3226_v37 = vld [vmem:[#allocation6 + $0x8] sm:$0xff] }
  0x33   :  { %584 = vrot.lane.b32.xlu1 %v3088_v1, %s2912_s24  ;;  %314 = vmatpush.msra.mxu2 %v3155_v19  ;;  %4652 = vst [vmem:[#allocation31_spill] sm:$0xff] %v3171_v23  ;;  %v3197_v29 = vld [vmem:[#allocation8 + $0x30] sm:$0xff]  ;;  %v3228_v38 = vld [vmem:[#allocation9 + $0x8] sm:$0xff]  ;;  %v3235_v40 = vld [vmem:[#allocation6] sm:$0xff] }
  0x34   :  { %v3114_v8 = vld [vmem:[%s4642_s29 + $0x38] sm:$0xff]  ;;  %v3119_v9 = vld [vmem:[%s4642_s29 + $0x30] sm:$0xff]  ;;  %v3125_v10 = vld [vmem:[%s4642_s29 + $0x28] sm:$0xff]  ;;  %378 = vmatpush.msrb.mxu0 %v3131_v12  ;;  %4654 = vst [vmem:[#allocation33_spill] sm:$0xff] %v3183_v26  ;;  %835 = vrot.lane.b32.xlu2 %v3088_v1, %s2918_s4 }
  0x35   :  { %4643 = vst [vmem:[#allocation22_spill] sm:$0xff] %v3119_v9  ;;  %279 = vmatpush.msra.mxu1 %v3114_v8  ;;  %v3138_v14 = vld [vmem:[%s4642_s29 + $0x20] sm:$0xff]  ;;  %v3152_v18 = vld [vmem:[%s4642_s29 + $0x18] sm:$0xff]  ;;  %v3164_v21 = vld [vmem:[%s4642_s29 + $0x10] sm:$0xff]  ;;  %315 = vmatpush.msra.mxu2 %v3167_v22 }
  0x36   :  { %4644 = vst [vmem:[#allocation23_spill] sm:$0xff] %v3125_v10  ;;  %379 = vmatpush.msrb.mxu0 %v3141_v15  ;;  %v3176_v24 = vld [vmem:[%s4642_s29 + $0x8] sm:$0xff]  ;;  %v3188_v27 = vld [vmem:[%s4642_s29] sm:$0xff]  ;;  %v3232_v39 = vld [vmem:[#allocation8 + $0x8] sm:$0xff] }
  0x37   :  { %280 = vmatpush.msra.mxu1 %v3119_v9  ;;  %4646 = vst [vmem:[#allocation25_spill] sm:$0xff] %v3138_v14  ;;  %316 = vmatpush.msra.mxu2 %v3179_v25  ;;  %v199_v35 = vld [vmem:[%s4656_s12] sm:$0xff]  ;;  %v3237_v41 = vld [vmem:[#allocation9] sm:$0xff]  ;;  %v3248_v44 = vld [vmem:[#allocation12 + $0x38] sm:$0xff] }
  0x38   :  { %4649 = vst [vmem:[#allocation28_spill] sm:$0xff] %v3152_v18  ;;  %380 = vmatpush.msrb.mxu0 %v3147_v17  ;;  %v3223_v36 = vld [vmem:[#allocation8 + $0x10] sm:$0xff]  ;;  %v3239_v42 = vld [vmem:[#allocation8] sm:$0xff]  ;;  %v3254_v46 = vld [vmem:[#allocation12 + $0x28] sm:$0xff] }
  0x39   :  { %v216_v5 = vld [vmem:[#allocation3] sm:$0xff]  ;;  %281 = vmatpush.msra.mxu1 %v3125_v10  ;;  %4651 = vst [vmem:[#allocation30_spill] sm:$0xff] %v3164_v21  ;;  %317 = vmatpush.msra.mxu2 %v3226_v37  ;;  %v3251_v45 = vld [vmem:[#allocation12 + $0x30] sm:$0xff]  ;;  %v3257_v47 = vld [vmem:[#allocation12 + $0x20] sm:$0xff] }
  0x3a   :  { %v217_v6 = vsub.f32 %v3088_v1, %v216_v5  ;;  %4653 = vst [vmem:[#allocation32_spill] sm:$0xff] %v3176_v24  ;;  %381 = vmatpush.msrb.mxu0 %v3159_v20  ;;  %v3261_v49 = vld [vmem:[#allocation12 + $0x18] sm:$0xff]  ;;  %v3270_v51 = vld [vmem:[#allocation12 + $0x10] sm:$0xff]  ;;  %v3277_v52 = vld [vmem:[#allocation12 + $0x8] sm:$0xff] }
  0x3b   :  { %282 = vmatpush.msra.mxu1 %v3138_v14  ;;  %4655 = vst [vmem:[#allocation34_spill] sm:$0xff] %v3188_v27  ;;  %318 = vmatpush.msra.mxu2 %v3235_v40  ;;  %v3280_v53 = vld [vmem:[#allocation12] sm:$0xff]  ;;  %v3285_v54 = vld [vmem:[%s4660_s0] ss:$0 sm:$0xff]  ;;  %v3292_v58 = vld [vmem:[#allocation11 + $0x38] sm:$0xff] }
  0x3c   :  { %219 = vrot.lane.b32.xlu0 %v217_v6, %s2913_s6  ;;  %382 = vmatpush.msrb.mxu0 %v3171_v23  ;;  %201 = vst.msk [vmem:[#allocation2] sm:$0xff] %vm200_vm2, %v199_v35  ;;  %v3296_v59 = vld [vmem:[#allocation11 + $0x30] sm:$0xff]  ;;  %v3300_v60 = vld [vmem:[#allocation11 + $0x28] sm:$0xff]  ;;  %v3304_v61 = vld [vmem:[#allocation11 + $0x20] sm:$0xff] }
  0x3d   :  { %283 = vmatpush.msra.mxu1 %v3152_v18  ;;  %4657 = vst [vmem:[#allocation35_spill] sm:$0xff] %v3228_v38  ;;  %442 = vmatpush.msrb.mxu2 %v3248_v44  ;;  %v3308_v62 = vld [vmem:[#allocation11 + $0x18] sm:$0xff]  ;;  %v3313_v63 = vld [vmem:[#allocation11 + $0x10] sm:$0xff]  ;;  %v3319_v0 = vld [vmem:[#allocation11 + $0x8] sm:$0xff] }
  0x3e   :  { %383 = vmatpush.msrb.mxu0 %v3183_v26  ;;  %4658 = vst [vmem:[#allocation36_spill] sm:$0xff] %v3237_v41  ;;  %v3325_v5 = vld [vmem:[#allocation11] sm:$0xff]  ;;  %v3368_v35 = vld [vmem:[#allocation14 + $0x38] sm:$0xff] }
  0x3f   :  { %284 = vmatpush.msra.mxu1 %v3164_v21  ;;  %443 = vmatpush.msrb.mxu2 %v3251_v45  ;;  %4661 = vst [vmem:[#allocation38_spill] sm:$0xff] %v3285_v54 }
  0x40   :  { %384 = vmatpush.msrb.mxu0 %v3228_v38  ;;  %523 = vmatpush.msra.mxu3 %v3368_v35 }
  0x41   :  { %285 = vmatpush.msra.mxu1 %v3176_v24  ;;  %444 = vmatpush.msrb.mxu2 %v3254_v46 }
  0x42   :  { %385 = vmatpush.msrb.mxu0 %v3237_v41 }
  0x43   :  { %286 = vmatpush.msra.mxu1 %v3188_v27  ;;  %v3244_v43 = vld [vmem:[#allocation2] sm:$0xff]  ;;  %445 = vmatpush.msrb.mxu2 %v3257_v47 }
  0x44   :  { %580 = vrot.lane.b32.xlu0 %v3088_v1, %s2913_s6 }
  0x45   :  { %343 = vmatpush.msrb.mxu1 %v3192_v28  ;;  %446 = vmatpush.msrb.mxu2 %v3261_v49 }
  0x47   :  { %344 = vmatpush.msrb.mxu1 %v3197_v29  ;;  %447 = vmatpush.msrb.mxu2 %v3270_v51 }
  0x49   :  { %345 = vmatpush.msrb.mxu1 %v3200_v30  ;;  %448 = vmatpush.msrb.mxu2 %v3277_v52 }
  0x4b   :  { %346 = vmatpush.msrb.mxu1 %v3203_v31  ;;  %449 = vmatpush.msrb.mxu2 %v3280_v53 }
  0x4c   :  { %1090 = vrot.lane.b32.xlu0 %v3088_v1, %s2914_s28 }
  0x4d   :  { %347 = vmatpush.msrb.mxu1 %v3206_v32 }
  0x4f   :  { %348 = vmatpush.msrb.mxu1 %v3223_v36 }
  0x51   :  { %349 = vmatpush.msrb.mxu1 %v3232_v39 }
  0x53   :  { %350 = vmatpush.msrb.mxu1 %v3239_v42 }
  0x54   :  { %1344 = vrot.lane.b32.xlu0 %v3088_v1, %s2915_s11 }
  0x5c   :  { %1598 = vrot.lane.b32.xlu0 %v3088_v1, %s2916_s3 }
  0x64   :  { %1852 = vrot.lane.b32.xlu0 %v3088_v1, %s2917_s7 }
  0xae   :  { %v220_v33 = vpop.permute.xlu0 %219 }
  0xaf   :  { %v223_v34 = vsel %vm203_vm0, %v3088_v1, %v220_v33  ;;  %v3366_v33 = vld [vmem:[%s4493_s14] ss:$0 sm:$0xff] }
  0xb0   :  { %2413 = vmatmul.msk.f32.vlgmr.msra.gmra.mxu0 %vm231_vm1, %v223_v34  ;;  %4662 = vst [vmem:[#allocation39_spill] sm:$0xff] %v3366_v33 }
  0xb6   :  { %v3259_v48 = vpop.permute.xlu0 %580 }
  0xb7   :  { %4659 = vst [vmem:[#allocation37_spill] sm:$0xff] %v3259_v48  ;;  %v3265_v50 = vsub.f32 %v3088_v1, %v3259_v48  ;;  %v585_v1 = vpop.permute.xlu1 %584 }
  0xb8   :  { %2417 = vmatmul.msk.f32.vlgmr.msrb.gmra.mxu0 %vm200_vm2, %v3244_v43  ;;  %2398 = vst.msk [vmem:[#allocation3] sm:$0xff] %vm203_vm0, %v3259_v48 }
  0xb9   :  { %2106 = vrot.lane.b32.xlu0 %v3265_v50, %s2917_s7  ;;  %839 = vrot.lane.b32.xlu2 %v3265_v50, %s2912_s24  ;;  %v587_v6 = vsel %vm203_vm0, %v585_v1, %v3265_v50  ;;  %v3382_v1 = vld [vmem:[#allocation14 + $0x28] sm:$0xff] }
 0x12d   :  { %v252_v55 = vpop.f32.mrf.mxu0 }
 0x12e   :  { %v253_v56 = vadd.f32 %v3285_v54, %v252_v55  ;;  %v3373_v55 = vld [vmem:[%s4487_s8] ss:$0 sm:$0xff] }
 0x12f   :  { %4663 = vst [vmem:[#allocation40_spill] sm:$0xff] %v3373_v55 }
 0x130   :  { %v255_v57 = vmax.f32 %v253_v56, 0.0  ;;  %v3378_v56 = vld [vmem:[#allocation14 + $0x30] sm:$0xff] }
 0x131   :  { %524 = vmatpush.msra.mxu3 %v3378_v56 }
 0x132   :  { %536 = vrot.lane.b32.xlu1 %v255_v57, %s2915_s11  ;;  %2414 = vmatmul.msk.f32.vlgmr.msra.gmra.mxu1 %vm200_vm2, %v255_v57 }
 0x133   :  { %2415 = vmatmul.msk.f32.vlgmr.msra.gmra.mxu2 %vm200_vm2, %v255_v57  ;;  %410 = vmatpush.msra.mxu1 %v3292_v58 }
 0x134   :  { %603 = vmatpush.msra.mxu2 %v3090_v2  ;;  %525 = vmatpush.msra.mxu3 %v3382_v1 }
 0x135   :  { %411 = vmatpush.msra.mxu1 %v3296_v59  ;;  %v387_v34 = vpop.f32.mrf.mxu0 }
 0x136   :  { %604 = vmatpush.msra.mxu2 %v3094_v3 }
 0x137   :  { %412 = vmatpush.msra.mxu1 %v3300_v60 }
 0x138   :  { %605 = vmatpush.msra.mxu2 %v3096_v4 }
 0x139   :  { %413 = vmatpush.msra.mxu1 %v3304_v61 }
 0x13a   :  { %2416 = vmatmul.msk.f32.vlgmr.msrb.gmra.mxu1 %vm200_vm2, %v255_v57  ;;  %606 = vmatpush.msra.mxu2 %v3108_v7 }
 0x13b   :  { %414 = vmatpush.msra.mxu1 %v3308_v62  ;;  %2419 = vmatmul.msk.f32.vlgmr.msrb.gmra.mxu2 %vm200_vm2, %v3244_v43 }
 0x13c   :  { %1093 = vrot.lane.b32.xlu1 %v3265_v50, %s2918_s4  ;;  %623 = vmatpush.msrb.mxu2 %v3114_v8 }
 0x13d   :  { %415 = vmatpush.msra.mxu1 %v3313_v63 }
 0x13e   :  { %624 = vmatpush.msrb.mxu2 %v3119_v9 }
 0x13f   :  { %416 = vmatpush.msra.mxu1 %v3319_v0 }
 0x140   :  { %625 = vmatpush.msrb.mxu2 %v3125_v10 }
 0x141   :  { %417 = vmatpush.msra.mxu1 %v3325_v5 }
 0x142   :  { %2418 = vmatmul.msk.f32.vlgmr.msra.gmra.mxu1 %vm200_vm2, %v3244_v43  ;;  %626 = vmatpush.msrb.mxu2 %v3138_v14 }
 0x143   :  { %2421 = vmatmul.msk.f32.vlgmr.msra.gmra.mxu2 %vm231_vm1, %v587_v6  ;;  %665 = vmatpush.msrb.mxu1 %v3192_v28 }
 0x144   :  { %1347 = vrot.lane.b32.xlu1 %v3265_v50, %s2914_s28  ;;  %627 = vmatpush.msrb.mxu2 %v3152_v18 }
 0x145   :  { %666 = vmatpush.msrb.mxu1 %v3197_v29 }
 0x146   :  { %628 = vmatpush.msrb.mxu2 %v3164_v21 }
 0x147   :  { %667 = vmatpush.msrb.mxu1 %v3200_v30 }
 0x148   :  { %629 = vmatpush.msrb.mxu2 %v3176_v24 }
 0x149   :  { %668 = vmatpush.msrb.mxu1 %v3203_v31 }
 0x14a   :  { %630 = vmatpush.msrb.mxu2 %v3188_v27 }
 0x14b   :  { %669 = vmatpush.msrb.mxu1 %v3206_v32 }
 0x14c   :  { %686 = vmatpush.msra.mxu2 %v3131_v12  ;;  %1601 = vrot.lane.b32.xlu1 %v3265_v50, %s2915_s11 }
 0x14d   :  { %670 = vmatpush.msrb.mxu1 %v3223_v36 }
 0x14e   :  { %687 = vmatpush.msra.mxu2 %v3141_v15 }
 0x14f   :  { %671 = vmatpush.msrb.mxu1 %v3232_v39 }
 0x150   :  { %688 = vmatpush.msra.mxu2 %v3147_v17 }
 0x151   :  { %672 = vmatpush.msrb.mxu1 %v3239_v42 }
 0x152   :  { %689 = vmatpush.msra.mxu2 %v3159_v20 }
 0x153   :  { %798 = vmatpush.msra.mxu1 %v3368_v35 }
 0x154   :  { %690 = vmatpush.msra.mxu2 %v3171_v23  ;;  %1855 = vrot.lane.b32.xlu1 %v3265_v50, %s2916_s3  ;;  %v388_v50 = vadd.f32 %v3366_v33, %v387_v34  ;;  %v3387_v34 = vld [vmem:[#allocation14 + $0x20] sm:$0xff] }
 0x155   :  { %799 = vmatpush.msra.mxu1 %v3378_v56  ;;  %526 = vmatpush.msra.mxu3 %v3387_v34 }
 0x156   :  { %691 = vmatpush.msra.mxu2 %v3183_v26  ;;  %v390_v48 = vmax.f32 %v388_v50, 0.0  ;;  %v3399_v26 = vld [vmem:[#allocation14 + $0x8] sm:$0xff] }
 0x157   :  { %800 = vmatpush.msra.mxu1 %v3382_v1 }
 0x158   :  { %692 = vmatpush.msra.mxu2 %v3228_v38 }
 0x159   :  { %801 = vmatpush.msra.mxu1 %v3387_v34 }
 0x15a   :  { %693 = vmatpush.msra.mxu2 %v3237_v41  ;;  %v3391_v41 = vld [vmem:[#allocation14 + $0x18] sm:$0xff] }
 0x15b   :  { %527 = vmatpush.msra.mxu3 %v3391_v41  ;;  %802 = vmatpush.msra.mxu1 %v3391_v41 }
 0x1af   :  { %v288_v57 = vpop.f32.mrf.mxu1 }
 0x1b0   :  { %v289_v6 = vadd.f32 %v3373_v55, %v288_v57  ;;  %v3395_v57 = vld [vmem:[#allocation14 + $0x10] sm:$0xff] }
 0x1b1   :  { %528 = vmatpush.msra.mxu3 %v3395_v57  ;;  %803 = vmatpush.msra.mxu1 %v3395_v57 }
 0x1b2   :  { %v291_v33 = vmax.f32 %v289_v6, 0.0 }
 0x1b3   :  { %529 = vmatpush.msra.mxu3 %v3399_v26  ;;  %804 = vmatpush.msra.mxu1 %v3399_v26 }
 0x1b4   :  { %v475_v38 = vadd.f32 %v390_v48, %v291_v33  ;;  %v3403_v48 = vld [vmem:[#allocation14] sm:$0xff]  ;;  %v3416_v33 = vld [vmem:[%s4494_s15] ss:$0 sm:$0xff] }
 0x1b5   :  { %530 = vmatpush.msra.mxu3 %v3403_v48  ;;  %805 = vmatpush.msra.mxu1 %v3403_v48  ;;  %4665 = vst [vmem:[#allocation42_spill] sm:$0xff] %v3416_v33 }
 0x1b6   :  { %v476_v50 = vsub.f32 0.0, %v475_v38  ;;  %v320_v55 = vpop.f32.mrf.mxu2  ;;  %v3408_v38 = vld [vmem:[%s4488_s9] ss:$0 sm:$0xff] }
 0x1b7   :  { %v352_v6 = vpop.f32.mrf.mxu1  ;;  %4664 = vst [vmem:[#allocation41_spill] sm:$0xff] %v3408_v38  ;;  %644 = vmatpush.msrb.mxu3 %v3127_v11 }
 0x1b8   :  { %v477_v23 = vmul.f32 1.442695, %v476_v50 }
 0x1b9   :  { %645 = vmatpush.msrb.mxu3 %v3133_v13 }
 0x1ba   :  { %2503 = vpow2.f32 %v477_v23  ;;  %v321_v23 = vadd.f32 %v3408_v38, %v320_v55 }
 0x1bb   :  { %646 = vmatpush.msrb.mxu3 %v3143_v16 }
 0x1bc   :  { %v323_v27 = vmax.f32 %v321_v23, 0.0 }
 0x1bd   :  { %647 = vmatpush.msrb.mxu3 %v3155_v19 }
 0x1be   :  { %v451_v50 = vpop.f32.mrf.mxu2 }
 0x1bf   :  { %v419_v20 = vpop.f32.mrf.mxu1  ;;  %648 = vmatpush.msrb.mxu3 %v3167_v22 }
 0x1c0   :  { %v2504_v17 = vpop.eup %2503  ;;  %v420_v15 = vadd.f32 %v3416_v33, %v419_v20 }
 0x1c1   :  { %v479_v12 = vadd.f32 1.0, %v2504_v17  ;;  %649 = vmatpush.msrb.mxu3 %v3179_v25  ;;  %v3430_v17 = vld [vmem:[%s4495_s16] ss:$0 sm:$0xff] }
 0x1c2   :  { %v422_v24 = vmax.f32 %v420_v15, 0.0  ;;  %4666 = vst [vmem:[#allocation43_spill] sm:$0xff] %v3430_v17 }
 0x1c3   :  { %2505 = vrcp.f32 %v479_v12  ;;  %650 = vmatpush.msrb.mxu3 %v3226_v37  ;;  %v489_v23 = vand.u32 2147483647, %v479_v12  ;;  %vm485_vm4 = vweird.f32 %v479_v12 }
 0x1c4   :  { %v455_v21 = vadd.f32 %v422_v24, %v323_v27 }
 0x1c5   :  { %651 = vmatpush.msrb.mxu3 %v3235_v40  ;;  %vm490_vm6 = vcmp.eq.f32.partialorder %v489_v23, 8.507059e+37 }
 0x1c6   :  { %v456_v18 = vsub.f32 0.0, %v455_v21  ;;  %v608_v55 = vpop.f32.mrf.mxu2  ;;  %v452_v21 = vadd.f32 %v3430_v17, %v451_v50 }
 0x1c7   :  { %v609_v14 = vadd.f32 %v3285_v54, %v608_v55 }
 0x1c8   :  { %v457_v38 = vmul.f32 1.442695, %v456_v18  ;;  %v3442_v18 = vld [vmem:[%s4489_s10] ss:$0 sm:$0xff]  ;;  %v454_v33 = vmax.f32 %v452_v21, 0.0 }
 0x1c9   :  { %v2506_v20 = vpop.eup %2505  ;;  %v3432_v15 = vmax.f32 %v609_v14, 0.0  ;;  %v491_v14 = vand.u32 2147483648, %v479_v12  ;;  %v353_v54 = vadd.f32 %v3442_v18, %v352_v6 }
 0x1ca   :  { %2507 = vpow2.f32 %v457_v38  ;;  %v481_v24 = vmul.f32 %v2506_v20, %v479_v12  ;;  %vm486_vm3 = vweird.f32 %v2506_v20 }
 0x1cb   :  { %2422 = vmatmul.msk.f32.vlgmr.msrb.gmra.mxu2 %vm200_vm2, %v3432_v15  ;;  %811 = vrot.lane.b32.xlu2 %v3432_v15, %s2915_s11  ;;  %vm487_vm5 = vmor %vm485_vm4, %vm486_vm3  ;;  %v492_v50 = vor.u32 1.1754944e-38, %v491_v14 }
 0x1cc   :  { %v482_v27 = vsub.f32 1.0, %v481_v24  ;;  %2424 = vmatmul.msk.f32.vlgmr.msrb.gmra.mxu1 %vm200_vm2, %v3432_v15 }
 0x1cd   :  { %899 = vmatpush.msrb.mxu1 %v3127_v11 }
 0x1ce   :  { %v483_v38 = vmul.f32 %v2506_v20, %v482_v27  ;;  %v355_v27 = vmax.f32 %v353_v54, 0.0 }
 0x1cf   :  { %900 = vmatpush.msrb.mxu1 %v3133_v13 }
 0x1d0   :  { %v2508_v55 = vpop.eup %2507  ;;  %v484_v10 = vadd.f32 %v2506_v20, %v483_v38  ;;  %v3463_v38 = vld [vmem:[#allocation15 + $0x68] sm:$0xff] }
 0x1d1   :  { %v459_v9 = vadd.f32 1.0, %v2508_v55  ;;  %901 = vmatpush.msrb.mxu1 %v3143_v16  ;;  %v3467_v55 = vld [vmem:[#allocation15 + $0x60] sm:$0xff] }
 0x1d2   :  { %v488_v24 = vsel %vm487_vm5, %v2506_v20, %v484_v10 }
 0x1d3   :  { %2509 = vrcp.f32 %v459_v9  ;;  %v493_v11 = vsel %vm490_vm6, %v492_v50, %v488_v24  ;;  %902 = vmatpush.msrb.mxu1 %v3155_v19  ;;  %v471_v16 = vand.u32 2147483648, %v459_v9  ;;  %v469_v21 = vand.u32 2147483647, %v459_v9  ;;  %v3473_v24 = vld [vmem:[#allocation15 + $0x58] sm:$0xff] }
 0x1d4   :  { %v495_v17 = vmul.f32 %v493_v11, %v454_v33  ;;  %vm465_vm8 = vweird.f32 %v459_v9  ;;  %v3456_v33 = vld [vmem:[#allocation15 + $0x78] sm:$0xff]  ;;  %4667 = vst [vmem:[#allocation44_spill] sm:$0xff] %v3473_v24  ;;  %v3485_v11 = vld [vmem:[#allocation15 + $0x48] sm:$0xff] }
 0x1d5   :  { %903 = vmatpush.msrb.mxu1 %v3167_v22  ;;  %v3458_v22 = vld [vmem:[#allocation15 + $0x70] sm:$0xff]  ;;  %559 = vmatpush.msra.mxu0 %v3456_v33  ;;  %vm470_vm10 = vcmp.eq.f32.partialorder %v469_v21, 8.507059e+37  ;;  %4669 = vst [vmem:[#allocation46_spill] sm:$0xff] %v3485_v11 }
 0x1d6   :  { %v496_v13 = vadd.f32 %v495_v17, %v355_v27  ;;  %815 = vmatpush.msrb.mxu2 %v3456_v33  ;;  %v3490_v27 = vld [vmem:[#allocation15 + $0x40] sm:$0xff] }
 0x1d7   :  { %904 = vmatpush.msrb.mxu1 %v3179_v25  ;;  %v472_v25 = vor.u32 1.1754944e-38, %v471_v16  ;;  %560 = vmatpush.msra.mxu0 %v3458_v22  ;;  %4670 = vst [vmem:[#allocation47_spill] sm:$0xff] %v3490_v27  ;;  %v3512_v16 = vld [vmem:[#allocation15 + $0x20] sm:$0xff] }
 0x1d8   :  { %2511 = vtanh.f32 %v496_v13  ;;  %816 = vmatpush.msrb.mxu2 %v3458_v22  ;;  %v3495_v13 = vld [vmem:[#allocation15 + $0x38] sm:$0xff]  ;;  %4674 = vst [vmem:[#allocation51_spill] sm:$0xff] %v3512_v16 }
 0x1d9   :  { %v2510_v6 = vpop.eup %2509  ;;  %905 = vmatpush.msrb.mxu1 %v3226_v37  ;;  %561 = vmatpush.msra.mxu0 %v3463_v38  ;;  %4671 = vst [vmem:[#allocation48_spill] sm:$0xff] %v3495_v13 }
 0x1da   :  { %v461_v12 = vmul.f32 %v2510_v6, %v459_v9  ;;  %vm466_vm7 = vweird.f32 %v2510_v6  ;;  %817 = vmatpush.msrb.mxu2 %v3463_v38 }
 0x1db   :  { %906 = vmatpush.msrb.mxu1 %v3235_v40  ;;  %vm467_vm9 = vmor %vm465_vm8, %vm466_vm7  ;;  %562 = vmatpush.msra.mxu0 %v3467_v55 }
 0x1dc   :  { %v462_v10 = vsub.f32 1.0, %v461_v12  ;;  %818 = vmatpush.msrb.mxu2 %v3467_v55  ;;  %v3502_v12 = vld [vmem:[#allocation15 + $0x30] sm:$0xff] }
 0x1dd   :  { %563 = vmatpush.msra.mxu0 %v3473_v24  ;;  %4672 = vst [vmem:[#allocation49_spill] sm:$0xff] %v3502_v12 }
 0x1de   :  { %v463_v20 = vmul.f32 %v2510_v6, %v462_v10  ;;  %v2512_v19 = vpop.eup %2511  ;;  %819 = vmatpush.msrb.mxu2 %v3473_v24  ;;  %v3507_v10 = vld [vmem:[#allocation15 + $0x28] sm:$0xff] }
 0x1df   :  { %v498_v17 = vsub.f32 %v3244_v43, %v2512_v19  ;;  %v3481_v43 = vld [vmem:[#allocation15 + $0x50] sm:$0xff]  ;;  %4673 = vst [vmem:[#allocation50_spill] sm:$0xff] %v3507_v10 }
 0x1e0   :  { %v464_v54 = vadd.f32 %v2510_v6, %v463_v20  ;;  %4668 = vst [vmem:[#allocation45_spill] sm:$0xff] %v3481_v43  ;;  %564 = vmatpush.msra.mxu0 %v3481_v43  ;;  %820 = vmatpush.msrb.mxu2 %v3481_v43 }
 0x1e2   :  { %v468_v14 = vsel %vm467_vm9, %v2510_v6, %v464_v54  ;;  %565 = vmatpush.msra.mxu0 %v3485_v11  ;;  %821 = vmatpush.msrb.mxu2 %v3485_v11  ;;  %v836_v6 = vpop.permute.xlu2 %835 }
 0x1e3   :  { %v473_v23 = vsel %vm470_vm10, %v472_v25, %v468_v14  ;;  %v4686_v25 = vld [vmem:[#allocation32_spill] sm:$0xff]  ;;  %v4687_v14 = vld [vmem:[#allocation34_spill] sm:$0xff] }
 0x1e4   :  { %v499_v9 = vmul.f32 %v498_v17, %v473_v23  ;;  %566 = vmatpush.msra.mxu0 %v3490_v27  ;;  %822 = vmatpush.msrb.mxu2 %v3490_v27  ;;  %v4688_v23 = vld [vmem:[#allocation24_spill] sm:$0xff] }
 0x1e6   :  { %v3471_v50 = vadd.f32 %v2512_v19, %v499_v9  ;;  %567 = vmatpush.msra.mxu0 %v3495_v13  ;;  %823 = vmatpush.msrb.mxu2 %v3495_v13  ;;  %v4685_v19 = vld [vmem:[#allocation30_spill] sm:$0xff] }
 0x1e8   :  { %2420 = vmatmul.msk.f32.vlgmr.msra.gmra.mxu3 %vm200_vm2, %v3471_v50  ;;  %2425 = vmatmul.msk.f32.vlgmr.msra.gmra.mxu2 %vm200_vm2, %v3471_v50 }
 0x1e9   :  { %707 = vmatpush.msra.mxu3 %v3292_v58  ;;  %568 = vmatpush.msra.mxu0 %v3502_v12 }
 0x1ea   :  { %824 = vmatpush.msrb.mxu2 %v3502_v12  ;;  %v840_v20 = vpop.permute.xlu2 %839 }
 0x1eb   :  { %708 = vmatpush.msra.mxu3 %v3296_v59  ;;  %569 = vmatpush.msra.mxu0 %v3507_v10  ;;  %v842_v21 = vsel %vm203_vm0, %v836_v6, %v840_v20  ;;  %v4689_v6 = vld [vmem:[#allocation26_spill] sm:$0xff] }
 0x1ec   :  { %825 = vmatpush.msrb.mxu2 %v3507_v10  ;;  %v4690_v20 = vld [vmem:[#allocation38_spill] sm:$0xff] }
 0x1ed   :  { %709 = vmatpush.msra.mxu3 %v3300_v60  ;;  %570 = vmatpush.msra.mxu0 %v3512_v16 }
 0x1ee   :  { %826 = vmatpush.msrb.mxu2 %v3512_v16 }
 0x1ef   :  { %710 = vmatpush.msra.mxu3 %v3304_v61 }
 0x1f0   :  { %2423 = vmatmul.msk.f32.vlgmr.msrb.gmra.mxu3 %vm200_vm2, %v3432_v15  ;;  %v3517_v15 = vld [vmem:[#allocation15 + $0x18] sm:$0xff] }
 0x1f1   :  { %711 = vmatpush.msra.mxu3 %v3308_v62  ;;  %4675 = vst [vmem:[#allocation52_spill] sm:$0xff] %v3517_v15  ;;  %571 = vmatpush.msra.mxu0 %v3517_v15 }
 0x1f2   :  { %827 = vmatpush.msrb.mxu2 %v3517_v15 }
 0x1f3   :  { %712 = vmatpush.msra.mxu3 %v3313_v63 }
 0x1f5   :  { %713 = vmatpush.msra.mxu3 %v3319_v0 }
 0x1f7   :  { %714 = vmatpush.msra.mxu3 %v3325_v5 }
 0x1f8   :  { %2426 = vmatmul.msk.f32.vlgmr.msra.gmra.mxu3 %vm200_vm2, %v3471_v50 }
 0x1f9   :  { %858 = vmatpush.msrb.mxu3 %v3090_v2  ;;  %v3549_v2 = vld [vmem:[#allocation15 + $0x10] sm:$0xff] }
 0x1fa   :  { %4676 = vst [vmem:[#allocation53_spill] sm:$0xff] %v3549_v2  ;;  %572 = vmatpush.msra.mxu0 %v3549_v2  ;;  %828 = vmatpush.msrb.mxu2 %v3549_v2 }
 0x1fb   :  { %859 = vmatpush.msrb.mxu3 %v3094_v3  ;;  %v3551_v3 = vld [vmem:[#allocation15 + $0x8] sm:$0xff] }
 0x1fc   :  { %4677 = vst [vmem:[#allocation54_spill] sm:$0xff] %v3551_v3  ;;  %573 = vmatpush.msra.mxu0 %v3551_v3  ;;  %829 = vmatpush.msrb.mxu2 %v3551_v3 }
 0x1fd   :  { %860 = vmatpush.msrb.mxu3 %v3096_v4  ;;  %v3555_v4 = vld [vmem:[#allocation15] sm:$0xff] }
 0x1fe   :  { %4678 = vst [vmem:[#allocation55_spill] sm:$0xff] %v3555_v4  ;;  %574 = vmatpush.msra.mxu0 %v3555_v4  ;;  %830 = vmatpush.msrb.mxu2 %v3555_v4 }
 0x1ff   :  { %861 = vmatpush.msrb.mxu3 %v3108_v7  ;;  %v3580_v7 = vld [vmem:[%s4497_s18] ss:$0 sm:$0xff] }
 0x200   :  { %2429 = vmatmul.msk.f32.vlgmr.msrb.gmra.mxu3 %vm231_vm1, %v842_v21  ;;  %728 = vmatpush.msrb.mxu0 %v3248_v44 }
 0x201   :  { %920 = vmatpush.msra.mxu3 %v3192_v28  ;;  %1053 = vmatpush.msra.mxu2 %v3368_v35 }
 0x202   :  { %729 = vmatpush.msrb.mxu0 %v3251_v45 }
 0x203   :  { %921 = vmatpush.msra.mxu3 %v3197_v29  ;;  %1054 = vmatpush.msra.mxu2 %v3378_v56 }
 0x204   :  { %730 = vmatpush.msrb.mxu0 %v3254_v46 }
 0x205   :  { %922 = vmatpush.msra.mxu3 %v3200_v30  ;;  %1055 = vmatpush.msra.mxu2 %v3382_v1 }
 0x206   :  { %731 = vmatpush.msrb.mxu0 %v3257_v47 }
 0x207   :  { %923 = vmatpush.msra.mxu3 %v3203_v31  ;;  %1056 = vmatpush.msra.mxu2 %v3387_v34  ;;  %v537_v31 = vpop.permute.xlu1 %536 }
 0x208   :  { %732 = vmatpush.msrb.mxu0 %v3261_v49 }
 0x209   :  { %924 = vmatpush.msra.mxu3 %v3206_v32  ;;  %1057 = vmatpush.msra.mxu2 %v3391_v41 }
 0x20a   :  { %733 = vmatpush.msrb.mxu0 %v3270_v51 }
 0x20b   :  { %925 = vmatpush.msra.mxu3 %v3223_v36  ;;  %1058 = vmatpush.msra.mxu2 %v3395_v57 }
 0x20c   :  { %734 = vmatpush.msrb.mxu0 %v3277_v52 }
 0x20d   :  { %926 = vmatpush.msra.mxu3 %v3232_v39  ;;  %1059 = vmatpush.msra.mxu2 %v3399_v26  ;;  %v4679_v39 = vld [vmem:[#allocation22_spill] sm:$0xff] }
 0x20e   :  { %735 = vmatpush.msrb.mxu0 %v3280_v53 }
 0x20f   :  { %927 = vmatpush.msra.mxu3 %v3239_v42  ;;  %1060 = vmatpush.msra.mxu2 %v3403_v48  ;;  %v4680_v42 = vld [vmem:[#allocation23_spill] sm:$0xff] }
 0x211   :  { %983 = vmatpush.msrb.mxu3 %v3248_v44  ;;  %v4681_v44 = vld [vmem:[#allocation41_spill] sm:$0xff] }
 0x213   :  { %984 = vmatpush.msrb.mxu3 %v3251_v45 }
 0x215   :  { %985 = vmatpush.msrb.mxu3 %v3254_v46  ;;  %v4682_v46 = vld [vmem:[#allocation25_spill] sm:$0xff] }
 0x217   :  { %986 = vmatpush.msrb.mxu3 %v3257_v47  ;;  %v4683_v47 = vld [vmem:[#allocation28_spill] sm:$0xff] }
 0x219   :  { %987 = vmatpush.msrb.mxu3 %v3261_v49 }
 0x21b   :  { %988 = vmatpush.msrb.mxu3 %v3270_v51 }
 0x21d   :  { %989 = vmatpush.msrb.mxu3 %v3277_v52  ;;  %v4684_v52 = vld [vmem:[#allocation42_spill] sm:$0xff] }
 0x21f   :  { %990 = vmatpush.msrb.mxu3 %v3280_v53 }
 0x26b   :  { %v532_v28 = vpop.f32.mrf.mxu3 }
 0x26c   :  { %v533_v29 = vadd.f32 %v3580_v7, %v532_v28  ;;  %v4691_v28 = vld [vmem:[#allocation27_spill] sm:$0xff] }
 0x26e   :  { %v535_v30 = vmax.f32 %v533_v29, 0.0 }
 0x270   :  { %v539_v32 = vsel %vm200_vm2, %v535_v30, %v537_v31  ;;  %v4692_v30 = vld [vmem:[#allocation29_spill] sm:$0xff]  ;;  %v4693_v31 = vld [vmem:[#allocation31_spill] sm:$0xff] }
 0x271   :  { %575 = vmatmul.f32.vlgmr.msra.gmra.mxu0 %v539_v32  ;;  %v4694_v32 = vld [vmem:[#allocation33_spill] sm:$0xff] }
 0x272   :  { %878 = vmatpush.msra.mxu0 %v3114_v8 }
 0x273   :  { %v653_v36 = vpop.f32.mrf.mxu3 }
 0x274   :  { %879 = vmatpush.msra.mxu0 %v4679_v39  ;;  %v654_v45 = vadd.f32 %v4681_v44, %v653_v36  ;;  %v4695_v36 = vld [vmem:[#allocation35_spill] sm:$0xff] }
 0x276   :  { %880 = vmatpush.msra.mxu0 %v4680_v42  ;;  %v656_v51 = vmax.f32 %v654_v45, 0.0  ;;  %v4696_v45 = vld [vmem:[#allocation36_spill] sm:$0xff] }
 0x278   :  { %881 = vmatpush.msra.mxu0 %v4682_v46 }
 0x279   :  { %2427 = vmatmul.msk.f32.vlgmr.msrb.gmra.mxu0 %vm200_vm2, %v3471_v50 }
 0x27a   :  { %882 = vmatpush.msra.mxu0 %v4683_v47 }
 0x27b   :  { %v716_v49 = vpop.f32.mrf.mxu3 }
 0x27c   :  { %v717_v53 = vadd.f32 %v4684_v52, %v716_v49  ;;  %883 = vmatpush.msra.mxu0 %v4685_v19 }
 0x27e   :  { %v719_v54 = vmax.f32 %v717_v53, 0.0  ;;  %884 = vmatpush.msra.mxu0 %v4686_v25 }
 0x280   :  { %v741_v17 = vadd.f32 %v719_v54, %v656_v51  ;;  %885 = vmatpush.msra.mxu0 %v4687_v14 }
 0x282   :  { %941 = vmatpush.msrb.mxu0 %v4688_v23 }
 0x283   :  { %v863_v9 = vpop.f32.mrf.mxu3 }
 0x284   :  { %942 = vmatpush.msrb.mxu0 %v4689_v6  ;;  %v864_v21 = vadd.f32 %v4690_v20, %v863_v9  ;;  %v742_v9 = vsub.f32 0.0, %v741_v17 }
 0x286   :  { %943 = vmatpush.msrb.mxu0 %v4691_v28  ;;  %v3600_v29 = vmax.f32 %v864_v21, 0.0 }
 0x288   :  { %944 = vmatpush.msrb.mxu0 %v4692_v30  ;;  %1066 = vrot.lane.b32.xlu2 %v3600_v29, %s2915_s11 }
 0x289   :  { %2430 = vmatmul.msk.f32.vlgmr.msra.gmra.mxu0 %vm200_vm2, %v3600_v29  ;;  %2432 = vmatmul.msk.f32.vlgmr.msra.gmra.mxu3 %vm200_vm2, %v3600_v29 }
 0x28a   :  { %945 = vmatpush.msrb.mxu0 %v4693_v31  ;;  %1132 = vmatpush.msra.mxu3 %v3114_v8  ;;  %v632_v8 = vpop.f32.mrf.mxu2 }
 0x28c   :  { %946 = vmatpush.msrb.mxu0 %v4694_v32  ;;  %1133 = vmatpush.msra.mxu3 %v4679_v39 }
 0x28e   :  { %947 = vmatpush.msrb.mxu0 %v4695_v36  ;;  %1134 = vmatpush.msra.mxu3 %v4680_v42  ;;  %v4697_v42 = vld [vmem:[#allocation40_spill] sm:$0xff] }
 0x290   :  { %948 = vmatpush.msrb.mxu0 %v4696_v45  ;;  %1135 = vmatpush.msra.mxu3 %v4682_v46  ;;  %v633_v46 = vadd.f32 %v4697_v42, %v632_v8 }
 0x292   :  { %1070 = vmatpush.msra.mxu0 %v3456_v33  ;;  %1136 = vmatpush.msra.mxu3 %v4683_v47  ;;  %v695_v39 = vpop.f32.mrf.mxu2  ;;  %v4698_v47 = vld [vmem:[#allocation39_spill] sm:$0xff]  ;;  %v635_v51 = vmax.f32 %v633_v46, 0.0 }
 0x293   :  { %v696_v49 = vadd.f32 %v4698_v47, %v695_v39 }
 0x294   :  { %1071 = vmatpush.msra.mxu0 %v3458_v22  ;;  %1137 = vmatpush.msra.mxu3 %v4685_v19 }
 0x295   :  { %v698_v53 = vmax.f32 %v696_v49, 0.0 }
 0x296   :  { %1072 = vmatpush.msra.mxu0 %v3463_v38  ;;  %1138 = vmatpush.msra.mxu3 %v4686_v25 }
 0x297   :  { %v761_v19 = vadd.f32 %v698_v53, %v635_v51  ;;  %v674_v53 = vpop.f32.mrf.mxu1 }
 0x298   :  { %1073 = vmatpush.msra.mxu0 %v3467_v55  ;;  %1139 = vmatpush.msra.mxu3 %v4687_v14 }
 0x299   :  { %v762_v54 = vsub.f32 0.0, %v761_v19 }
 0x29a   :  { %1074 = vmatpush.msra.mxu0 %v3473_v24 }
 0x29b   :  { %v763_v25 = vmul.f32 1.442695, %v762_v54 }
 0x29c   :  { %1075 = vmatpush.msra.mxu0 %v3481_v43 }
 0x29d   :  { %2513 = vpow2.f32 %v763_v25  ;;  %v4700_v25 = vld [vmem:[#allocation43_spill] sm:$0xff] }
 0x29e   :  { %1076 = vmatpush.msra.mxu0 %v3485_v11 }
 0x2a0   :  { %1077 = vmatpush.msra.mxu0 %v3490_v27 }
 0x2a2   :  { %1078 = vmatpush.msra.mxu0 %v3495_v13 }
 0x2a3   :  { %v2514_v14 = vpop.eup %2513 }
 0x2a4   :  { %1079 = vmatpush.msra.mxu0 %v3502_v12  ;;  %v765_v21 = vadd.f32 1.0, %v2514_v14 }
 0x2a6   :  { %1080 = vmatpush.msra.mxu0 %v3507_v10  ;;  %2515 = vrcp.f32 %v765_v21  ;;  %v777_v19 = vand.u32 2147483648, %v765_v21  ;;  %vm771_vm12 = vweird.f32 %v765_v21  ;;  %v775_v17 = vand.u32 2147483647, %v765_v21 }
 0x2a8   :  { %1081 = vmatpush.msra.mxu0 %v3512_v16  ;;  %vm776_vm14 = vcmp.eq.f32.partialorder %v775_v17, 8.507059e+37  ;;  %v3735_v17 = vld [vmem:[#allocation8 + $0x20] sm:$0xff] }
 0x2a9   :  { %4704 = vst [vmem:[#allocation28_spill] sm:$0xff] %v3735_v17 }
 0x2aa   :  { %1082 = vmatpush.msra.mxu0 %v3517_v15 }
 0x2ac   :  { %1083 = vmatpush.msra.mxu0 %v3549_v2  ;;  %v743_v2 = vmul.f32 1.442695, %v742_v9 }
 0x2ae   :  { %1084 = vmatpush.msra.mxu0 %v3551_v3  ;;  %2517 = vpow2.f32 %v743_v2  ;;  %v2516_v3 = vpop.eup %2515  ;;  %v675_v2 = vadd.f32 %v3442_v18, %v674_v53 }
 0x2af   :  { %v767_v16 = vmul.f32 %v2516_v3, %v765_v21  ;;  %vm772_vm11 = vweird.f32 %v2516_v3 }
 0x2b0   :  { %1085 = vmatpush.msra.mxu0 %v3555_v4  ;;  %vm773_vm13 = vmor %vm771_vm12, %vm772_vm11 }
 0x2b1   :  { %v768_v8 = vsub.f32 1.0, %v767_v16  ;;  %v778_v16 = vor.u32 1.1754944e-38, %v777_v19 }
 0x2b3   :  { %v769_v39 = vmul.f32 %v2516_v3, %v768_v8 }
 0x2b4   :  { %v2518_v4 = vpop.eup %2517 }
 0x2b5   :  { %v745_v15 = vadd.f32 1.0, %v2518_v4  ;;  %v770_v49 = vadd.f32 %v2516_v3, %v769_v39 }
 0x2b7   :  { %2519 = vrcp.f32 %v745_v15  ;;  %v774_v14 = vsel %vm773_vm13, %v2516_v3, %v770_v49  ;;  %v757_v21 = vand.u32 2147483648, %v745_v15  ;;  %vm751_vm3 = vweird.f32 %v745_v15 }
 0x2b8   :  { %v779_v8 = vsel %vm776_vm14, %v778_v16, %v774_v14  ;;  %v755_v43 = vand.u32 2147483647, %v745_v15 }
 0x2ba   :  { %vm756_vm5 = vcmp.eq.f32.partialorder %v755_v43, 8.507059e+37  ;;  %v3686_v43 = vld [vmem:[#allocation4 + $0x8] sm:$0xff] }
 0x2bd   :  { %v2520_v46 = vpop.eup %2519 }
 0x2be   :  { %v747_v51 = vmul.f32 %v2520_v46, %v745_v15  ;;  %vm752_vm15 = vweird.f32 %v2520_v46  ;;  %v3697_v15 = vld [vmem:[#allocation6 + $0x30] sm:$0xff] }
 0x2bf   :  { %vm753_vm4 = vmor %vm751_vm3, %vm752_vm15 }
 0x2c0   :  { %v748_v9 = vsub.f32 1.0, %v747_v51 }
 0x2c2   :  { %v749_v13 = vmul.f32 %v2520_v46, %v748_v9 }
 0x2c4   :  { %v750_v11 = vadd.f32 %v2520_v46, %v749_v13 }
 0x2c6   :  { %v754_v53 = vsel %vm753_vm4, %v2520_v46, %v750_v11  ;;  %v1091_v11 = vpop.permute.xlu0 %1090  ;;  %v3729_v46 = vld [vmem:[#allocation8 + $0x30] sm:$0xff] }
 0x2c7   :  { %4702 = vst [vmem:[#allocation41_spill] sm:$0xff] %v3729_v46 }
 0x2ee   :  { %v3639_v10 = vpop.f32.mrf.mxu0 }
 0x2ef   :  { %4699 = vst [vmem:[#allocation22_spill] sm:$0xff] %v3639_v10  ;;  %v677_v10 = vmax.f32 %v675_v2, 0.0 }
 0x2f6   :  { %v737_v54 = vpop.f32.mrf.mxu0 }
 0x2f7   :  { %v738_v4 = vadd.f32 %v4700_v25, %v737_v54  ;;  %v758_v54 = vor.u32 1.1754944e-38, %v757_v21 }
 0x2f9   :  { %v740_v12 = vmax.f32 %v738_v4, 0.0  ;;  %v759_v49 = vsel %vm756_vm5, %v758_v54, %v754_v53  ;;  %v3739_v4 = vld [vmem:[#allocation8 + $0x18] sm:$0xff]  ;;  %v3746_v54 = vld [vmem:[#allocation8 + $0x8] sm:$0xff] }
 0x2fa   :  { %4705 = vst [vmem:[#allocation42_spill] sm:$0xff] %v3739_v4 }
 0x2fb   :  { %v781_v39 = vmul.f32 %v779_v8, %v740_v12  ;;  %v3690_v12 = vld [vmem:[#allocation4] sm:$0xff]  ;;  %v3743_v8 = vld [vmem:[#allocation8 + $0x10] sm:$0xff]  ;;  %4707 = vst [vmem:[#allocation32_spill] sm:$0xff] %v3746_v54 }
 0x2fc   :  { %4706 = vst [vmem:[#allocation30_spill] sm:$0xff] %v3743_v8 }
 0x2fd   :  { %v782_v27 = vadd.f32 %v781_v39, %v677_v10  ;;  %v3694_v10 = vld [vmem:[#allocation6 + $0x38] sm:$0xff] }
 0x2ff   :  { %2521 = vtanh.f32 %v782_v27  ;;  %v1094_v27 = vpop.permute.xlu1 %1093 }
 0x300   :  { %v1096_v13 = vsel %vm203_vm0, %v1091_v11, %v1094_v27 }
 0x305   :  { %v2522_v24 = vpop.eup %2521 }
 0x306   :  { %v784_v3 = vsub.f32 %v3471_v50, %v2522_v24  ;;  %v3679_v50 = vld [vmem:[#allocation4 + $0x18] sm:$0xff] }
 0x308   :  { %v785_v51 = vmul.f32 %v784_v3, %v759_v49  ;;  %v3749_v49 = vld [vmem:[#allocation8] sm:$0xff] }
 0x309   :  { %4708 = vst [vmem:[#allocation34_spill] sm:$0xff] %v3749_v49 }
 0x30a   :  { %v3644_v19 = vadd.f32 %v2522_v24, %v785_v51  ;;  %v3683_v24 = vld [vmem:[#allocation4 + $0x10] sm:$0xff] }
 0x30c   :  { %2428 = vmatmul.msk.f32.vlgmr.msra.gmra.mxu1 %vm200_vm2, %v3644_v19  ;;  %2433 = vmatmul.msk.f32.vlgmr.msrb.gmra.mxu0 %vm200_vm2, %v3644_v19 }
 0x30d   :  { %2435 = vmatmul.msk.f32.vlgmr.msrb.gmra.mxu3 %vm200_vm2, %v3644_v19  ;;  %962 = vmatpush.msra.mxu1 %v3292_v58 }
 0x30e   :  { %1195 = vmatpush.msrb.mxu3 %v4688_v23  ;;  %1307 = vmatpush.msrb.mxu0 %v3368_v35  ;;  %v3700_v23 = vld [vmem:[#allocation6 + $0x28] sm:$0xff] }
 0x30f   :  { %963 = vmatpush.msra.mxu1 %v3296_v59 }
 0x310   :  { %1196 = vmatpush.msrb.mxu3 %v4689_v6  ;;  %1308 = vmatpush.msrb.mxu0 %v3378_v56  ;;  %v3703_v6 = vld [vmem:[#allocation6 + $0x20] sm:$0xff] }
 0x311   :  { %964 = vmatpush.msra.mxu1 %v3300_v60 }
 0x312   :  { %1197 = vmatpush.msrb.mxu3 %v4691_v28  ;;  %1309 = vmatpush.msrb.mxu0 %v3382_v1  ;;  %v3706_v28 = vld [vmem:[#allocation6 + $0x18] sm:$0xff] }
 0x313   :  { %965 = vmatpush.msra.mxu1 %v3304_v61 }
 0x314   :  { %2431 = vmatmul.msk.f32.vlgmr.msrb.gmra.mxu1 %vm200_vm2, %v3600_v29  ;;  %1198 = vmatpush.msrb.mxu3 %v4692_v30  ;;  %v3709_v29 = vld [vmem:[#allocation6 + $0x10] sm:$0xff]  ;;  %v887_v30 = vpop.f32.mrf.mxu0 }
 0x315   :  { %966 = vmatpush.msra.mxu1 %v3308_v62  ;;  %1310 = vmatpush.msrb.mxu0 %v3387_v34 }
 0x316   :  { %1199 = vmatpush.msrb.mxu3 %v4693_v31 }
 0x317   :  { %967 = vmatpush.msra.mxu1 %v3313_v63  ;;  %1311 = vmatpush.msrb.mxu0 %v3391_v41 }
 0x318   :  { %1200 = vmatpush.msrb.mxu3 %v4694_v32 }
 0x319   :  { %968 = vmatpush.msra.mxu1 %v3319_v0  ;;  %1312 = vmatpush.msrb.mxu0 %v3395_v57 }
 0x31a   :  { %1201 = vmatpush.msrb.mxu3 %v4695_v36  ;;  %v812_v36 = vpop.permute.xlu2 %811 }
 0x31b   :  { %969 = vmatpush.msra.mxu1 %v3325_v5  ;;  %1313 = vmatpush.msrb.mxu0 %v3399_v26 }
 0x31c   :  { %2434 = vmatmul.msk.f32.vlgmr.msra.gmra.mxu1 %vm200_vm2, %v3644_v19  ;;  %1202 = vmatpush.msrb.mxu3 %v4696_v45  ;;  %v3726_v45 = vld [vmem:[#allocation8 + $0x38] sm:$0xff] }
 0x31d   :  { %1112 = vmatpush.msrb.mxu1 %v3679_v50  ;;  %1314 = vmatpush.msrb.mxu0 %v3403_v48  ;;  %4701 = vst [vmem:[#allocation23_spill] sm:$0xff] %v3726_v45 }
 0x31f   :  { %1113 = vmatpush.msrb.mxu1 %v3683_v24 }
 0x321   :  { %1114 = vmatpush.msrb.mxu1 %v3686_v43 }
 0x323   :  { %1115 = vmatpush.msrb.mxu1 %v3690_v12 }
 0x324   :  { %2437 = vmatmul.msk.f32.vlgmr.msrb.gmra.mxu1 %vm231_vm1, %v1096_v13 }
 0x325   :  { %1153 = vmatpush.msra.mxu1 %v3694_v10 }
 0x327   :  { %1154 = vmatpush.msra.mxu1 %v3697_v15 }
 0x329   :  { %1155 = vmatpush.msra.mxu1 %v3700_v23 }
 0x32b   :  { %1156 = vmatpush.msra.mxu1 %v3703_v6 }
 0x32d   :  { %1157 = vmatpush.msra.mxu1 %v3706_v28 }
 0x32f   :  { %1158 = vmatpush.msra.mxu1 %v3709_v29 }
 0x331   :  { %1159 = vmatpush.msra.mxu1 %v3226_v37  ;;  %v888_v37 = vadd.f32 %v4697_v42, %v887_v30 }
 0x333   :  { %1160 = vmatpush.msra.mxu1 %v3235_v40 }
 0x335   :  { %1216 = vmatpush.msrb.mxu1 %v3292_v58 }
 0x337   :  { %1217 = vmatpush.msrb.mxu1 %v3296_v59 }
 0x339   :  { %1218 = vmatpush.msrb.mxu1 %v3300_v60  ;;  %v890_v60 = vmax.f32 %v888_v37, 0.0 }
 0x33b   :  { %1219 = vmatpush.msrb.mxu1 %v3304_v61 }
 0x33d   :  { %1220 = vmatpush.msrb.mxu1 %v3308_v62 }
 0x33f   :  { %1221 = vmatpush.msrb.mxu1 %v3313_v63 }
 0x341   :  { %1222 = vmatpush.msrb.mxu1 %v3319_v0 }
 0x343   :  { %1223 = vmatpush.msrb.mxu1 %v3325_v5 }
 0x389   :  { %v807_v40 = vpop.f32.mrf.mxu1  ;;  %v950_v31 = vpop.f32.mrf.mxu0 }
 0x38a   :  { %v808_v58 = vadd.f32 %v3580_v7, %v807_v40  ;;  %v951_v59 = vadd.f32 %v4698_v47, %v950_v31  ;;  %v3732_v47 = vld [vmem:[#allocation8 + $0x28] sm:$0xff] }
 0x38b   :  { %4703 = vst [vmem:[#allocation25_spill] sm:$0xff] %v3732_v47 }
 0x38c   :  { %v810_v32 = vmax.f32 %v808_v58, 0.0  ;;  %v953_v61 = vmax.f32 %v951_v59, 0.0 }
 0x38e   :  { %v1016_v62 = vadd.f32 %v953_v61, %v890_v60  ;;  %v814_v63 = vsel %vm200_vm2, %v810_v32, %v812_v36 }
 0x38f   :  { %831 = vmatmul.f32.vlgmr.msrb.gmra.mxu2 %v814_v63 }
 0x390   :  { %v1017_v0 = vsub.f32 0.0, %v1016_v62  ;;  %1174 = vmatpush.msrb.mxu2 %v3726_v45 }
 0x391   :  { %v908_v5 = vpop.f32.mrf.mxu1 }
 0x392   :  { %v1018_v42 = vmul.f32 1.442695, %v1017_v0  ;;  %1175 = vmatpush.msrb.mxu2 %v3729_v46  ;;  %v909_v2 = vadd.f32 %v4681_v44, %v908_v5  ;;  %v929_v44 = vpop.f32.mrf.mxu3 }
 0x393   :  { %v930_v61 = vadd.f32 %v3442_v18, %v929_v44 }
 0x394   :  { %2523 = vpow2.f32 %v1018_v42  ;;  %1176 = vmatpush.msrb.mxu2 %v3732_v47  ;;  %v911_v21 = vmax.f32 %v909_v2, 0.0  ;;  %v4709_v2 = vld [vmem:[#allocation44_spill] sm:$0xff] }
 0x395   :  { %v932_v42 = vmax.f32 %v930_v61, 0.0  ;;  %v4717_v61 = vld [vmem:[#allocation52_spill] sm:$0xff] }
 0x396   :  { %1177 = vmatpush.msrb.mxu2 %v3735_v17 }
 0x398   :  { %1178 = vmatpush.msrb.mxu2 %v3739_v4 }
 0x399   :  { %v971_v14 = vpop.f32.mrf.mxu1 }
 0x39a   :  { %v2524_v9 = vpop.eup %2523  ;;  %v972_v16 = vadd.f32 %v4684_v52, %v971_v14  ;;  %1179 = vmatpush.msrb.mxu2 %v3743_v8  ;;  %v992_v40 = vpop.f32.mrf.mxu3 }
 0x39b   :  { %v1020_v39 = vadd.f32 1.0, %v2524_v9  ;;  %v4710_v9 = vld [vmem:[#allocation45_spill] sm:$0xff] }
 0x39c   :  { %v974_v53 = vmax.f32 %v972_v16, 0.0  ;;  %1180 = vmatpush.msrb.mxu2 %v3746_v54 }
 0x39d   :  { %2525 = vrcp.f32 %v1020_v39  ;;  %v1032_v58 = vand.u32 2147483648, %v1020_v39  ;;  %v1030_v60 = vand.u32 2147483647, %v1020_v39  ;;  %vm1026_vm7 = vweird.f32 %v1020_v39 }
 0x39e   :  { %v996_v3 = vadd.f32 %v974_v53, %v911_v21  ;;  %1181 = vmatpush.msrb.mxu2 %v3749_v49  ;;  %v4712_v53 = vld [vmem:[#allocation47_spill] sm:$0xff] }
 0x39f   :  { %v1033_v62 = vor.u32 1.1754944e-38, %v1032_v58  ;;  %vm1031_vm9 = vcmp.eq.f32.partialorder %v1030_v60, 8.507059e+37  ;;  %v4716_v60 = vld [vmem:[#allocation51_spill] sm:$0xff] }
 0x3a0   :  { %v997_v51 = vsub.f32 0.0, %v996_v3 }
 0x3a1   :  { %v1117_v52 = vpop.f32.mrf.mxu1 }
 0x3a2   :  { %v998_v11 = vmul.f32 1.442695, %v997_v51  ;;  %v1118_v27 = vadd.f32 %v4690_v20, %v1117_v52  ;;  %v993_v20 = vadd.f32 %v4700_v25, %v992_v40  ;;  %v4713_v51 = vld [vmem:[#allocation48_spill] sm:$0xff] }
 0x3a3   :  { %v2526_v13 = vpop.eup %2525 }
 0x3a4   :  { %v1022_v30 = vmul.f32 %v2526_v13, %v1020_v39  ;;  %2527 = vpow2.f32 %v998_v11  ;;  %v3753_v37 = vmax.f32 %v1118_v27, 0.0  ;;  %vm1027_vm6 = vweird.f32 %v2526_v13  ;;  %v4711_v39 = vld [vmem:[#allocation46_spill] sm:$0xff] }
 0x3a5   :  { %vm1028_vm8 = vmor %vm1026_vm7, %vm1027_vm6  ;;  %v995_v25 = vmax.f32 %v993_v20, 0.0 }
 0x3a6   :  { %v1023_v31 = vsub.f32 1.0, %v1022_v30  ;;  %1320 = vrot.lane.b32.xlu2 %v3753_v37, %s2915_s11  ;;  %2438 = vmatmul.msk.f32.vlgmr.msra.gmra.mxu3 %vm200_vm2, %v3753_v37 }
 0x3a7   :  { %2439 = vmatmul.msk.f32.vlgmr.msra.gmra.mxu1 %vm200_vm2, %v3753_v37  ;;  %1324 = vmatpush.msra.mxu3 %v3456_v33 }
 0x3a8   :  { %v1024_v59 = vmul.f32 %v2526_v13, %v1023_v31  ;;  %1366 = vmatpush.msra.mxu1 %v3679_v50  ;;  %v4715_v31 = vld [vmem:[#allocation50_spill] sm:$0xff] }
 0x3a9   :  { %1325 = vmatpush.msra.mxu3 %v3458_v22 }
 0x3aa   :  { %v2528_v32 = vpop.eup %2527  ;;  %v1025_v36 = vadd.f32 %v2526_v13, %v1024_v59  ;;  %1367 = vmatpush.msra.mxu1 %v3683_v24 }
 0x3ab   :  { %v1000_v63 = vadd.f32 1.0, %v2528_v32  ;;  %1326 = vmatpush.msra.mxu3 %v3463_v38 }
 0x3ac   :  { %v1029_v0 = vsel %vm1028_vm8, %v2526_v13, %v1025_v36  ;;  %1368 = vmatpush.msra.mxu1 %v3686_v43  ;;  %v4714_v13 = vld [vmem:[#allocation49_spill] sm:$0xff] }
 0x3ad   :  { %v1034_v5 = vsel %vm1031_vm9, %v1033_v62, %v1029_v0  ;;  %2529 = vrcp.f32 %v1000_v63  ;;  %1327 = vmatpush.msra.mxu3 %v3467_v55  ;;  %v1012_v3 = vand.u32 2147483648, %v1000_v63  ;;  %v1010_v11 = vand.u32 2147483647, %v1000_v63  ;;  %v4718_v62 = vld [vmem:[#allocation53_spill] sm:$0xff]  ;;  %v4722_v0 = vld [vmem:[#allocation55_spill] sm:$0xff] }
 0x3ae   :  { %v1036_v18 = vmul.f32 %v1034_v5, %v995_v25  ;;  %1369 = vmatpush.msra.mxu1 %v3690_v12  ;;  %vm1006_vm11 = vweird.f32 %v1000_v63  ;;  %v3795_v25 = vld [vmem:[#allocation12 + $0x30] sm:$0xff]  ;;  %v3800_v5 = vld [vmem:[#allocation12 + $0x28] sm:$0xff] }
 0x3af   :  { %1328 = vmatpush.msra.mxu3 %v4709_v2  ;;  %v1013_v40 = vor.u32 1.1754944e-38, %v1012_v3  ;;  %vm1011_vm13 = vcmp.eq.f32.partialorder %v1010_v11, 8.507059e+37  ;;  %4721 = vst [vmem:[#allocation26_spill] sm:$0xff] %v3795_v25  ;;  %v3890_v3 = vld [vmem:[%s4642_s29] sm:$0xff] }
 0x3b0   :  { %v1037_v14 = vadd.f32 %v1036_v18, %v932_v42  ;;  %4723 = vst [vmem:[#allocation38_spill] sm:$0xff] %v3800_v5  ;;  %v1345_v42 = vpop.permute.xlu0 %1344  ;;  %v1348_v18 = vpop.permute.xlu1 %1347  ;;  %v3897_v11 = vld [vmem:[#allocation9 + $0x30] sm:$0xff] }
 0x3b1   :  { %1329 = vmatpush.msra.mxu3 %v4710_v9 }
 0x3b2   :  { %2531 = vtanh.f32 %v1037_v14  ;;  %v3805_v14 = vld [vmem:[#allocation12 + $0x20] sm:$0xff] }
 0x3b3   :  { %v2530_v16 = vpop.eup %2529  ;;  %1330 = vmatpush.msra.mxu3 %v4711_v39  ;;  %4724 = vst [vmem:[#allocation27_spill] sm:$0xff] %v3805_v14 }
 0x3b4   :  { %v1002_v21 = vmul.f32 %v2530_v16, %v1000_v63  ;;  %vm1007_vm10 = vweird.f32 %v2530_v16  ;;  %v4720_v63 = vld [vmem:[#allocation54_spill] sm:$0xff] }
 0x3b5   :  { %1331 = vmatpush.msra.mxu3 %v4712_v53  ;;  %vm1008_vm12 = vmor %vm1006_vm11, %vm1007_vm10 }
 0x3b6   :  { %v1003_v44 = vsub.f32 1.0, %v1002_v21  ;;  %v3819_v21 = vld [vmem:[#allocation12 + $0x10] sm:$0xff] }
 0x3b7   :  { %1332 = vmatpush.msra.mxu3 %v4713_v51  ;;  %4726 = vst [vmem:[#allocation31_spill] sm:$0xff] %v3819_v21 }
 0x3b8   :  { %v1004_v52 = vmul.f32 %v2530_v16, %v1003_v44  ;;  %v2532_v27 = vpop.eup %2531  ;;  %v3883_v44 = vld [vmem:[%s4642_s29 + $0x8] sm:$0xff] }
 0x3b9   :  { %1333 = vmatpush.msra.mxu3 %v4714_v13  ;;  %v1039_v58 = vsub.f32 %v3644_v19, %v2532_v27  ;;  %v3790_v19 = vld [vmem:[#allocation12 + $0x38] sm:$0xff] }
 0x3ba   :  { %v1005_v30 = vadd.f32 %v2530_v16, %v1004_v52  ;;  %4719 = vst [vmem:[#allocation24_spill] sm:$0xff] %v3790_v19  ;;  %v3894_v52 = vld [vmem:[#allocation9 + $0x38] sm:$0xff] }
 0x3bb   :  { %1334 = vmatpush.msra.mxu3 %v4715_v31 }
 0x3bc   :  { %v1009_v20 = vsel %vm1008_vm12, %v2530_v16, %v1005_v30  ;;  %v1350_v16 = vsel %vm203_vm0, %v1345_v42, %v1348_v18  ;;  %v3903_v30 = vld [vmem:[#allocation9 + $0x20] sm:$0xff] }
 0x3bd   :  { %v1014_v59 = vsel %vm1011_vm13, %v1013_v40, %v1009_v20  ;;  %1335 = vmatpush.msra.mxu3 %v4716_v60  ;;  %v3906_v40 = vld [vmem:[#allocation9 + $0x18] sm:$0xff]  ;;  %v3912_v20 = vld [vmem:[#allocation9 + $0x8] sm:$0xff] }
 0x3be   :  { %v1040_v32 = vmul.f32 %v1039_v58, %v1014_v59  ;;  %v3909_v58 = vld [vmem:[#allocation9 + $0x10] sm:$0xff]  ;;  %v3915_v59 = vld [vmem:[#allocation9] sm:$0xff] }
 0x3bf   :  { %1336 = vmatpush.msra.mxu3 %v4717_v61 }
 0x3c0   :  { %v3781_v36 = vadd.f32 %v2532_v27, %v1040_v32  ;;  %v3900_v27 = vld [vmem:[#allocation9 + $0x28] sm:$0xff] }
 0x3c1   :  { %1337 = vmatpush.msra.mxu3 %v4718_v62 }
 0x3c2   :  { %2436 = vmatmul.msk.f32.vlgmr.msra.gmra.mxu2 %vm200_vm2, %v3781_v36  ;;  %2441 = vmatmul.msk.f32.vlgmr.msrb.gmra.mxu3 %vm200_vm2, %v3781_v36 }
 0x3c3   :  { %2442 = vmatmul.msk.f32.vlgmr.msrb.gmra.mxu1 %vm200_vm2, %v3781_v36  ;;  %1237 = vmatpush.msra.mxu2 %v3790_v19 }
 0x3c4   :  { %1428 = vmatpush.msrb.mxu1 %v3726_v45  ;;  %1338 = vmatpush.msra.mxu3 %v4720_v63 }
 0x3c5   :  { %1238 = vmatpush.msra.mxu2 %v3795_v25 }
 0x3c6   :  { %1429 = vmatpush.msrb.mxu1 %v3729_v46  ;;  %1339 = vmatpush.msra.mxu3 %v4722_v0 }
 0x3c7   :  { %1239 = vmatpush.msra.mxu2 %v3800_v5 }
 0x3c8   :  { %1561 = vmatpush.msrb.mxu3 %v3368_v35  ;;  %1430 = vmatpush.msrb.mxu1 %v3732_v47  ;;  %v3814_v35 = vld [vmem:[#allocation12 + $0x18] sm:$0xff] }
 0x3c9   :  { %1240 = vmatpush.msra.mxu2 %v3805_v14  ;;  %4725 = vst [vmem:[#allocation29_spill] sm:$0xff] %v3814_v35 }
 0x3ca   :  { %1562 = vmatpush.msrb.mxu3 %v3378_v56  ;;  %2440 = vmatmul.msk.f32.vlgmr.msrb.gmra.mxu2 %vm200_vm2, %v3753_v37  ;;  %v3824_v56 = vld [vmem:[#allocation12 + $0x8] sm:$0xff]  ;;  %v3829_v37 = vld [vmem:[#allocation12] sm:$0xff] }
 0x3cb   :  { %1431 = vmatpush.msrb.mxu1 %v3735_v17  ;;  %1241 = vmatpush.msra.mxu2 %v3814_v35  ;;  %4727 = vst [vmem:[#allocation33_spill] sm:$0xff] %v3824_v56  ;;  %v1067_v17 = vpop.permute.xlu2 %1066 }
 0x3cc   :  { %2445 = vmatmul.msk.f32.vlgmr.msra.gmra.mxu1 %vm231_vm1, %v1350_v16  ;;  %1563 = vmatpush.msrb.mxu3 %v3382_v1  ;;  %4728 = vst [vmem:[#allocation35_spill] sm:$0xff] %v3829_v37  ;;  %v3838_v1 = vld [vmem:[%s4642_s29 + $0x38] sm:$0xff]  ;;  %v3923_v16 = vld [vmem:[%s4488_s9] ss:$0 sm:$0xff] }
 0x3cd   :  { %1432 = vmatpush.msrb.mxu1 %v3739_v4  ;;  %1242 = vmatpush.msra.mxu2 %v3819_v21  ;;  %4733 = vst [vmem:[#allocation44_spill] sm:$0xff] %v3923_v16 }
 0x3ce   :  { %1564 = vmatpush.msrb.mxu3 %v3387_v34  ;;  %v3854_v34 = vld [vmem:[%s4642_s29 + $0x28] sm:$0xff] }
 0x3cf   :  { %1433 = vmatpush.msrb.mxu1 %v3743_v8  ;;  %1243 = vmatpush.msra.mxu2 %v3824_v56  ;;  %4730 = vst [vmem:[#allocation40_spill] sm:$0xff] %v3854_v34 }
 0x3d0   :  { %1565 = vmatpush.msrb.mxu3 %v3391_v41  ;;  %v3846_v41 = vld [vmem:[%s4642_s29 + $0x30] sm:$0xff] }
 0x3d1   :  { %1434 = vmatpush.msrb.mxu1 %v3746_v54  ;;  %1244 = vmatpush.msra.mxu2 %v3829_v37  ;;  %4729 = vst [vmem:[#allocation36_spill] sm:$0xff] %v3846_v41  ;;  %v3942_v54 = vld [vmem:[%s4493_s14] ss:$0 sm:$0xff] }
 0x3d2   :  { %2443 = vmatmul.msk.f32.vlgmr.msra.gmra.mxu2 %vm200_vm2, %v3781_v36  ;;  %1566 = vmatpush.msrb.mxu3 %v3395_v57  ;;  %v3862_v57 = vld [vmem:[%s4642_s29 + $0x20] sm:$0xff]  ;;  %4736 = vst [vmem:[#allocation47_spill] sm:$0xff] %v3942_v54 }
 0x3d3   :  { %1435 = vmatpush.msrb.mxu1 %v3749_v49  ;;  %1386 = vmatpush.msrb.mxu2 %v3838_v1  ;;  %4731 = vst [vmem:[#allocation39_spill] sm:$0xff] %v3862_v57 }
 0x3d4   :  { %1567 = vmatpush.msrb.mxu3 %v3399_v26  ;;  %v3869_v26 = vld [vmem:[%s4642_s29 + $0x18] sm:$0xff] }
 0x3d5   :  { %1491 = vmatpush.msra.mxu1 %v3790_v19  ;;  %1387 = vmatpush.msrb.mxu2 %v3846_v41 }
 0x3d6   :  { %1568 = vmatpush.msrb.mxu3 %v3403_v48  ;;  %v3876_v48 = vld [vmem:[%s4642_s29 + $0x10] sm:$0xff] }
 0x3d7   :  { %1492 = vmatpush.msra.mxu1 %v3795_v25  ;;  %1388 = vmatpush.msrb.mxu2 %v3854_v34 }
 0x3d9   :  { %1493 = vmatpush.msra.mxu1 %v3800_v5  ;;  %1389 = vmatpush.msrb.mxu2 %v3862_v57 }
 0x3db   :  { %1494 = vmatpush.msra.mxu1 %v3805_v14  ;;  %1390 = vmatpush.msrb.mxu2 %v3869_v26 }
 0x3dd   :  { %1495 = vmatpush.msra.mxu1 %v3814_v35  ;;  %1391 = vmatpush.msrb.mxu2 %v3876_v48 }
 0x3df   :  { %1496 = vmatpush.msra.mxu1 %v3819_v21  ;;  %1392 = vmatpush.msrb.mxu2 %v3883_v44  ;;  %v3929_v21 = vld [vmem:[%s4494_s15] ss:$0 sm:$0xff] }
 0x3e0   :  { %4734 = vst [vmem:[#allocation45_spill] sm:$0xff] %v3929_v21 }
 0x3e1   :  { %1497 = vmatpush.msra.mxu1 %v3824_v56  ;;  %1393 = vmatpush.msrb.mxu2 %v3890_v3 }
 0x3e3   :  { %1498 = vmatpush.msra.mxu1 %v3829_v37  ;;  %1449 = vmatpush.msra.mxu2 %v3894_v52 }
 0x3e5   :  { %1450 = vmatpush.msra.mxu2 %v3897_v11 }
 0x3e7   :  { %1451 = vmatpush.msra.mxu2 %v3900_v27 }
 0x3e9   :  { %1452 = vmatpush.msra.mxu2 %v3903_v30 }
 0x3eb   :  { %1453 = vmatpush.msra.mxu2 %v3906_v40 }
 0x3ed   :  { %1454 = vmatpush.msra.mxu2 %v3909_v58 }
 0x3ef   :  { %1455 = vmatpush.msra.mxu2 %v3912_v20 }
 0x3f1   :  { %1456 = vmatpush.msra.mxu2 %v3915_v59 }
 0x412   :  { %v3918_v42 = vpop.f32.mrf.mxu2 }
 0x413   :  { %4732 = vst [vmem:[#allocation43_spill] sm:$0xff] %v3918_v42  ;;  %v3935_v42 = vld [vmem:[%s4487_s8] ss:$0 sm:$0xff] }
 0x414   :  { %4735 = vst [vmem:[#allocation46_spill] sm:$0xff] %v3935_v42 }
 0x424   :  { %v1162_v32 = vpop.f32.mrf.mxu1 }
 0x425   :  { %v1163_v37 = vadd.f32 %v3923_v16, %v1162_v32 }
 0x427   :  { %v1165_v14 = vmax.f32 %v1163_v37, 0.0 }
 0x429   :  { %v1141_v18 = vpop.f32.mrf.mxu3 }
 0x42a   :  { %v1142_v25 = vadd.f32 %v3935_v42, %v1141_v18 }
 0x42c   :  { %v1144_v37 = vmax.f32 %v1142_v25, 0.0 }
 0x440   :  { %v1225_v56 = vpop.f32.mrf.mxu1 }
 0x441   :  { %v1226_v35 = vadd.f32 %v3929_v21, %v1225_v56 }
 0x443   :  { %v1228_v5 = vmax.f32 %v1226_v35, 0.0 }
 0x445   :  { %v1250_v19 = vadd.f32 %v1228_v5, %v1165_v14  ;;  %v1062_v49 = vpop.f32.mrf.mxu2  ;;  %v1204_v32 = vpop.f32.mrf.mxu3  ;;  %v3948_v5 = vld [vmem:[%s4660_s0] ss:$0 sm:$0xff] }
 0x446   :  { %v1063_v16 = vadd.f32 %v3580_v7, %v1062_v49  ;;  %v1205_v56 = vadd.f32 %v3942_v54, %v1204_v32 }
 0x447   :  { %v1251_v35 = vsub.f32 0.0, %v1250_v19 }
 0x448   :  { %v1065_v21 = vmax.f32 %v1063_v16, 0.0  ;;  %v1207_v8 = vmax.f32 %v1205_v56, 0.0 }
 0x449   :  { %v1371_v4 = vpop.f32.mrf.mxu1  ;;  %v1252_v47 = vmul.f32 1.442695, %v1251_v35 }
 0x44a   :  { %v1372_v49 = vadd.f32 %v3948_v5, %v1371_v4  ;;  %v1270_v14 = vadd.f32 %v1207_v8, %v1144_v37  ;;  %v1069_v18 = vsel %vm200_vm2, %v1065_v21, %v1067_v17  ;;  %v3978_v8 = vld [vmem:[#allocation6 + $0x8] sm:$0xff] }
 0x44b   :  { %1086 = vmatmul.f32.vlgmr.msra.gmra.mxu0 %v1069_v18  ;;  %2533 = vpow2.f32 %v1252_v47 }
 0x44c   :  { %v3952_v42 = vmax.f32 %v1372_v49, 0.0  ;;  %v1271_v19 = vsub.f32 0.0, %v1270_v14  ;;  %1407 = vmatpush.msra.mxu0 %v3694_v10 }
 0x44e   :  { %1574 = vrot.lane.b32.xlu2 %v3952_v42, %s2915_s11  ;;  %2446 = vmatmul.msk.f32.vlgmr.msrb.gmra.mxu2 %vm200_vm2, %v3952_v42  ;;  %v1272_v25 = vmul.f32 1.442695, %v1271_v19 }
 0x44f   :  { %2448 = vmatmul.msk.f32.vlgmr.msrb.gmra.mxu1 %vm200_vm2, %v3952_v42  ;;  %1408 = vmatpush.msra.mxu0 %v3697_v15 }
 0x450   :  { %1640 = vmatpush.msrb.mxu1 %v3838_v1  ;;  %1578 = vmatpush.msrb.mxu2 %v3456_v33  ;;  %2535 = vpow2.f32 %v1272_v25 }
 0x451   :  { %1409 = vmatpush.msra.mxu0 %v3700_v23  ;;  %v2534_v47 = vpop.eup %2533 }
 0x452   :  { %1641 = vmatpush.msrb.mxu1 %v3846_v41  ;;  %1579 = vmatpush.msrb.mxu2 %v3458_v22  ;;  %v3973_v17 = vadd.f32 1.0, %v2534_v47  ;;  %v1183_v22 = vpop.f32.mrf.mxu2 }
 0x453   :  { %1410 = vmatpush.msra.mxu0 %v3703_v6 }
 0x454   :  { %1642 = vmatpush.msrb.mxu1 %v3854_v34  ;;  %1580 = vmatpush.msrb.mxu2 %v3463_v38  ;;  %v3984_v38 = vld [vmem:[#allocation6] sm:$0xff]  ;;  %vm1260_vm6 = vweird.f32 %v3973_v17 }
 0x455   :  { %1411 = vmatpush.msra.mxu0 %v3706_v28 }
 0x456   :  { %1643 = vmatpush.msrb.mxu1 %v3862_v57  ;;  %1581 = vmatpush.msrb.mxu2 %v3467_v55  ;;  %v2536_v33 = vpop.eup %2535 }
 0x457   :  { %1412 = vmatpush.msra.mxu0 %v3709_v29  ;;  %v1274_v4 = vadd.f32 1.0, %v2536_v33 }
 0x458   :  { %1644 = vmatpush.msrb.mxu1 %v3869_v26  ;;  %1582 = vmatpush.msrb.mxu2 %v4709_v2 }
 0x459   :  { %1413 = vmatpush.msra.mxu0 %v3978_v8  ;;  %2537 = vrcp.f32 %v1274_v4  ;;  %v1286_v56 = vand.u32 2147483648, %v1274_v4  ;;  %vm1280_vm15 = vweird.f32 %v1274_v4 }
 0x45a   :  { %1645 = vmatpush.msrb.mxu1 %v3876_v48  ;;  %1583 = vmatpush.msrb.mxu2 %v4710_v9  ;;  %2539 = vrcp.f32 %v3973_v17  ;;  %v1246_v9 = vpop.f32.mrf.mxu2 }
 0x45b   :  { %1414 = vmatpush.msra.mxu0 %v3984_v38  ;;  %v1287_v14 = vor.u32 1.1754944e-38, %v1286_v56 }
 0x45c   :  { %1646 = vmatpush.msrb.mxu1 %v3883_v44  ;;  %1584 = vmatpush.msrb.mxu2 %v4711_v39  ;;  %v3998_v39 = vld [vmem:[%s4495_s16] ss:$0 sm:$0xff] }
 0x45e   :  { %1647 = vmatpush.msrb.mxu1 %v3890_v3  ;;  %1585 = vmatpush.msrb.mxu2 %v4712_v53  ;;  %v1247_v53 = vadd.f32 %v3998_v39, %v1246_v9 }
 0x45f   :  { %v2538_v55 = vpop.eup %2537 }
 0x460   :  { %1586 = vmatpush.msrb.mxu2 %v4713_v51  ;;  %v2540_v2 = vpop.eup %2539  ;;  %v1276_v21 = vmul.f32 %v2538_v55, %v1274_v4  ;;  %vm1281_vm14 = vweird.f32 %v2538_v55  ;;  %v1284_v51 = vand.u32 2147483647, %v1274_v4  ;;  %v1249_v18 = vmax.f32 %v1247_v53, 0.0  ;;  %v4038_v53 = vld [vmem:[#allocation11 + $0x28] sm:$0xff] }
 0x461   :  { %v1256_v32 = vmul.f32 %v2540_v2, %v3973_v17  ;;  %vm1282_vm3 = vmor %vm1280_vm15, %vm1281_vm14  ;;  %vm1261_vm5 = vweird.f32 %v2540_v2 }
 0x462   :  { %1587 = vmatpush.msrb.mxu2 %v4714_v13  ;;  %v1277_v16 = vsub.f32 1.0, %v1276_v21  ;;  %v4005_v13 = vld [vmem:[%s4489_s10] ss:$0 sm:$0xff]  ;;  %vm1285_vm4 = vcmp.eq.f32.partialorder %v1284_v51, 8.507059e+37  ;;  %vm1262_vm7 = vmor %vm1260_vm6, %vm1261_vm5  ;;  %v4045_v51 = vld [vmem:[#allocation11 + $0x20] sm:$0xff] }
 0x463   :  { %v1184_v37 = vadd.f32 %v4005_v13, %v1183_v22  ;;  %v1257_v49 = vsub.f32 1.0, %v1256_v32  ;;  %v1266_v22 = vand.u32 2147483648, %v3973_v17 }
 0x464   :  { %1588 = vmatpush.msrb.mxu2 %v4715_v31  ;;  %v1278_v35 = vmul.f32 %v2538_v55, %v1277_v16 }
 0x465   :  { %v1258_v33 = vmul.f32 %v2540_v2, %v1257_v49  ;;  %v1267_v9 = vor.u32 1.1754944e-38, %v1266_v22  ;;  %v4058_v49 = vld [vmem:[#allocation11 + $0x10] sm:$0xff] }
 0x466   :  { %1589 = vmatpush.msrb.mxu2 %v4716_v60  ;;  %v1279_v31 = vadd.f32 %v2538_v55, %v1278_v35  ;;  %v1186_v60 = vmax.f32 %v1184_v37, 0.0  ;;  %v4042_v35 = vld [vmem:[#allocation14 + $0x28] sm:$0xff]  ;;  %v4051_v37 = vld [vmem:[#allocation11 + $0x18] sm:$0xff]  ;;  %v4739_v22 = vld [vmem:[#allocation28_spill] sm:$0xff] }
 0x467   :  { %v1259_v4 = vadd.f32 %v2540_v2, %v1258_v33  ;;  %v1602_v33 = vpop.permute.xlu1 %1601 }
 0x468   :  { %1590 = vmatpush.msrb.mxu2 %v4717_v61  ;;  %v1283_v19 = vsel %vm1282_vm3, %v2538_v55, %v1279_v31  ;;  %v1264_v61 = vand.u32 2147483647, %v3973_v17  ;;  %v4031_v17 = vld [vmem:[#allocation11 + $0x30] sm:$0xff]  ;;  %v4054_v31 = vld [vmem:[#allocation14 + $0x20] sm:$0xff] }
 0x469   :  { %v1288_v25 = vsel %vm1285_vm4, %v1287_v14, %v1283_v19  ;;  %v1263_v55 = vsel %vm1262_vm7, %v2540_v2, %v1259_v4  ;;  %v4035_v2 = vld [vmem:[#allocation14 + $0x30] sm:$0xff]  ;;  %v4061_v14 = vld [vmem:[#allocation14 + $0x18] sm:$0xff]  ;;  %v4072_v19 = vld [vmem:[#allocation11] sm:$0xff] }
 0x46a   :  { %1591 = vmatpush.msrb.mxu2 %v4718_v62  ;;  %v1290_v47 = vmul.f32 %v1288_v25, %v1249_v18  ;;  %vm1265_vm8 = vcmp.eq.f32.partialorder %v1264_v61, 8.507059e+37  ;;  %v4068_v18 = vld [vmem:[#allocation14 + $0x10] sm:$0xff]  ;;  %v4075_v25 = vld [vmem:[#allocation14 + $0x8] sm:$0xff]  ;;  %v4738_v4 = vld [vmem:[#allocation25_spill] sm:$0xff] }
 0x46b   :  { %v4740_v61 = vld [vmem:[#allocation42_spill] sm:$0xff] }
 0x46c   :  { %1592 = vmatpush.msrb.mxu2 %v4720_v63  ;;  %v1291_v21 = vadd.f32 %v1290_v47, %v1186_v60  ;;  %v1268_v63 = vsel %vm1265_vm8, %v1267_v9, %v1263_v55  ;;  %v4082_v60 = vld [vmem:[#allocation14] sm:$0xff]  ;;  %v1599_v47 = vpop.permute.xlu0 %1598 }
 0x46d   :  { %4737 = vst [vmem:[#allocation48_spill] sm:$0xff] %v4082_v60  ;;  %v4741_v55 = vld [vmem:[#allocation30_spill] sm:$0xff] }
 0x46e   :  { %1593 = vmatpush.msrb.mxu2 %v4722_v0  ;;  %2541 = vtanh.f32 %v1291_v21  ;;  %v4024_v0 = vld [vmem:[#allocation11 + $0x38] sm:$0xff]  ;;  %v1604_v21 = vsel %vm203_vm0, %v1599_v47, %v1602_v33  ;;  %v4743_v9 = vld [vmem:[#allocation34_spill] sm:$0xff]  ;;  %v4747_v47 = vld [vmem:[#allocation27_spill] sm:$0xff] }
 0x46f   :  { %v4748_v33 = vld [vmem:[#allocation29_spill] sm:$0xff] }
 0x474   :  { %v2542_v62 = vpop.eup %2541 }
 0x475   :  { %v1293_v16 = vsub.f32 %v3781_v36, %v2542_v62  ;;  %v4028_v36 = vld [vmem:[#allocation14 + $0x38] sm:$0xff] }
 0x477   :  { %v1294_v32 = vmul.f32 %v1293_v16, %v1268_v63  ;;  %v4744_v16 = vld [vmem:[#allocation24_spill] sm:$0xff]  ;;  %v4745_v63 = vld [vmem:[#allocation26_spill] sm:$0xff] }
 0x479   :  { %v4016_v56 = vadd.f32 %v2542_v62, %v1294_v32  ;;  %v4742_v62 = vld [vmem:[#allocation32_spill] sm:$0xff]  ;;  %v4746_v32 = vld [vmem:[#allocation38_spill] sm:$0xff] }
 0x47b   :  { %2444 = vmatmul.msk.f32.vlgmr.msrb.gmra.mxu0 %vm200_vm2, %v4016_v56  ;;  %2449 = vmatmul.msk.f32.vlgmr.msra.gmra.mxu2 %vm200_vm2, %v4016_v56 }
 0x47c   :  { %2451 = vmatmul.msk.f32.vlgmr.msra.gmra.mxu1 %vm200_vm2, %v4016_v56  ;;  %1470 = vmatpush.msrb.mxu0 %v4024_v0 }
 0x47d   :  { %1703 = vmatpush.msra.mxu1 %v3894_v52  ;;  %1815 = vmatpush.msra.mxu2 %v4028_v36 }
 0x47e   :  { %1471 = vmatpush.msrb.mxu0 %v4031_v17 }
 0x47f   :  { %1704 = vmatpush.msra.mxu1 %v3897_v11  ;;  %1816 = vmatpush.msra.mxu2 %v4035_v2 }
 0x480   :  { %1472 = vmatpush.msrb.mxu0 %v4038_v53 }
 0x481   :  { %1705 = vmatpush.msra.mxu1 %v3900_v27  ;;  %1817 = vmatpush.msra.mxu2 %v4042_v35 }
 0x482   :  { %1473 = vmatpush.msrb.mxu0 %v4045_v51 }
 0x483   :  { %2447 = vmatmul.msk.f32.vlgmr.msra.gmra.mxu0 %vm200_vm2, %v3952_v42  ;;  %1706 = vmatpush.msra.mxu1 %v3903_v30  ;;  %v4065_v42 = vld [vmem:[#allocation11 + $0x8] sm:$0xff] }
 0x484   :  { %1474 = vmatpush.msrb.mxu0 %v4051_v37  ;;  %1818 = vmatpush.msra.mxu2 %v4054_v31 }
 0x485   :  { %1707 = vmatpush.msra.mxu1 %v3906_v40 }
 0x486   :  { %1475 = vmatpush.msrb.mxu0 %v4058_v49  ;;  %1819 = vmatpush.msra.mxu2 %v4061_v14 }
 0x487   :  { %1708 = vmatpush.msra.mxu1 %v3909_v58 }
 0x488   :  { %1476 = vmatpush.msrb.mxu0 %v4065_v42  ;;  %1820 = vmatpush.msra.mxu2 %v4068_v18 }
 0x489   :  { %1709 = vmatpush.msra.mxu1 %v3912_v20 }
 0x48a   :  { %1477 = vmatpush.msrb.mxu0 %v4072_v19  ;;  %1821 = vmatpush.msra.mxu2 %v4075_v25 }
 0x48b   :  { %2450 = vmatmul.msk.f32.vlgmr.msrb.gmra.mxu0 %vm200_vm2, %v4016_v56  ;;  %1710 = vmatpush.msra.mxu1 %v3915_v59 }
 0x48c   :  { %1620 = vmatpush.msra.mxu0 %v3679_v50  ;;  %1822 = vmatpush.msra.mxu2 %v4082_v60 }
 0x48e   :  { %1621 = vmatpush.msra.mxu0 %v3683_v24 }
 0x490   :  { %1622 = vmatpush.msra.mxu0 %v3686_v43 }
 0x492   :  { %1623 = vmatpush.msra.mxu0 %v3690_v12 }
 0x493   :  { %2453 = vmatmul.msk.f32.vlgmr.msra.gmra.mxu0 %vm231_vm1, %v1604_v21  ;;  %v4749_v21 = vld [vmem:[#allocation31_spill] sm:$0xff] }
 0x494   :  { %1682 = vmatpush.msrb.mxu0 %v3726_v45 }
 0x496   :  { %1683 = vmatpush.msrb.mxu0 %v3729_v46  ;;  %v4753_v46 = vld [vmem:[#allocation46_spill] sm:$0xff] }
 0x498   :  { %1684 = vmatpush.msrb.mxu0 %v4738_v4 }
 0x49a   :  { %1685 = vmatpush.msrb.mxu0 %v4739_v22  ;;  %v4750_v22 = vld [vmem:[#allocation33_spill] sm:$0xff] }
 0x49c   :  { %1686 = vmatpush.msrb.mxu0 %v4740_v61  ;;  %v4751_v61 = vld [vmem:[#allocation35_spill] sm:$0xff] }
 0x49e   :  { %1687 = vmatpush.msrb.mxu0 %v4741_v55 }
 0x4a0   :  { %1688 = vmatpush.msrb.mxu0 %v4742_v62 }
 0x4a2   :  { %1689 = vmatpush.msrb.mxu0 %v4743_v9 }
 0x4a4   :  { %1745 = vmatpush.msra.mxu0 %v4744_v16 }
 0x4a6   :  { %1746 = vmatpush.msra.mxu0 %v4745_v63  ;;  %v1321_v63 = vpop.permute.xlu2 %1320 }
 0x4a8   :  { %1747 = vmatpush.msra.mxu0 %v4746_v32 }
 0x4aa   :  { %1748 = vmatpush.msra.mxu0 %v4747_v47 }
 0x4ac   :  { %1749 = vmatpush.msra.mxu0 %v4748_v33 }
 0x4ae   :  { %1750 = vmatpush.msra.mxu0 %v4749_v21 }
 0x4b0   :  { %1751 = vmatpush.msra.mxu0 %v4750_v22 }
 0x4b2   :  { %1752 = vmatpush.msra.mxu0 %v4751_v61 }
 0x4c8   :  { %v4106_v55 = vpop.f32.mrf.mxu0 }
 0x4c9   :  { %4752 = vst [vmem:[#allocation49_spill] sm:$0xff] %v4106_v55 }
 0x4d1   :  { %v1395_v62 = vpop.f32.mrf.mxu2 }
 0x4d2   :  { %v1396_v32 = vadd.f32 %v4753_v46, %v1395_v62 }
 0x4d4   :  { %v1398_v61 = vmax.f32 %v1396_v32, 0.0 }
 0x4f8   :  { %v1316_v9 = vpop.f32.mrf.mxu0 }
 0x4f9   :  { %v1317_v16 = vadd.f32 %v3580_v7, %v1316_v9  ;;  %v4754_v9 = vld [vmem:[#allocation44_spill] sm:$0xff] }
 0x4fb   :  { %v1319_v4 = vmax.f32 %v1317_v16, 0.0 }
 0x4fd   :  { %v1323_v47 = vsel %vm200_vm2, %v1319_v4, %v1321_v63  ;;  %v4755_v63 = vld [vmem:[#allocation45_spill] sm:$0xff] }
 0x4fe   :  { %1340 = vmatmul.f32.vlgmr.msra.gmra.mxu3 %v1323_v47  ;;  %v1458_v33 = vpop.f32.mrf.mxu2 }
 0x4ff   :  { %v1459_v21 = vadd.f32 %v3942_v54, %v1458_v33  ;;  %1661 = vmatpush.msra.mxu3 %v3694_v10 }
 0x500   :  { %v1416_v22 = vpop.f32.mrf.mxu0 }
 0x501   :  { %v1461_v45 = vmax.f32 %v1459_v21, 0.0  ;;  %1662 = vmatpush.msra.mxu3 %v3697_v15  ;;  %v1417_v4 = vadd.f32 %v4754_v9, %v1416_v22 }
 0x503   :  { %v1524_v55 = vadd.f32 %v1461_v45, %v1398_v61  ;;  %1663 = vmatpush.msra.mxu3 %v3700_v23  ;;  %v1419_v32 = vmax.f32 %v1417_v4, 0.0  ;;  %v4141_v4 = vld [vmem:[%s4499_s20] ss:$0 sm:$0xff] }
 0x505   :  { %v1525_v7 = vsub.f32 0.0, %v1524_v55  ;;  %1664 = vmatpush.msra.mxu3 %v3703_v6  ;;  %v1437_v55 = vpop.f32.mrf.mxu1 }
 0x507   :  { %v1526_v62 = vmul.f32 1.442695, %v1525_v7  ;;  %1665 = vmatpush.msra.mxu3 %v3706_v28  ;;  %v4135_v7 = vld [vmem:[#allocation15 + $0x70] sm:$0xff] }
 0x508   :  { %v1479_v16 = vpop.f32.mrf.mxu0 }
 0x509   :  { %2543 = vpow2.f32 %v1526_v62  ;;  %v1480_v10 = vadd.f32 %v4755_v63, %v1479_v16  ;;  %1666 = vmatpush.msra.mxu3 %v3709_v29  ;;  %v4131_v29 = vld [vmem:[#allocation15 + $0x78] sm:$0xff] }
 0x50b   :  { %v1482_v47 = vmax.f32 %v1480_v10, 0.0  ;;  %1667 = vmatpush.msra.mxu3 %v3978_v8 }
 0x50d   :  { %v1504_v15 = vadd.f32 %v1482_v47, %v1419_v32  ;;  %1668 = vmatpush.msra.mxu3 %v3984_v38  ;;  %v1500_v10 = vpop.f32.mrf.mxu1  ;;  %v4144_v47 = vld [vmem:[#allocation15 + $0x68] sm:$0xff] }
 0x50e   :  { %4756 = vst [vmem:[#allocation50_spill] sm:$0xff] %v4144_v47 }
 0x50f   :  { %v2544_v23 = vpop.eup %2543  ;;  %v1505_v6 = vsub.f32 0.0, %v1504_v15  ;;  %v4757_v15 = vld [vmem:[#allocation43_spill] sm:$0xff] }
 0x510   :  { %v1528_v45 = vadd.f32 1.0, %v2544_v23  ;;  %v1625_v61 = vpop.f32.mrf.mxu0  ;;  %v833_v23 = vadd.f32 %v4141_v4, %v4757_v15 }
 0x511   :  { %v1506_v22 = vmul.f32 1.442695, %v1505_v6  ;;  %v1626_v28 = vadd.f32 %v3948_v5, %v1625_v61 }
 0x512   :  { %2545 = vrcp.f32 %v1528_v45  ;;  %v1540_v61 = vand.u32 2147483648, %v1528_v45  ;;  %vm1534_vm10 = vweird.f32 %v1528_v45 }
 0x513   :  { %2547 = vpow2.f32 %v1506_v22  ;;  %v4123_v33 = vmax.f32 %v1626_v28, 0.0  ;;  %v4150_v22 = vld [vmem:[#allocation15 + $0x60] sm:$0xff]  ;;  %v1501_v28 = vadd.f32 %v3998_v39, %v1500_v10  ;;  %v4161_v10 = vld [vmem:[#allocation15 + $0x50] sm:$0xff] }
 0x514   :  { %4758 = vst [vmem:[#allocation51_spill] sm:$0xff] %v4150_v22 }
 0x515   :  { %1828 = vrot.lane.b32.xlu1 %v4123_v33, %s2915_s11  ;;  %2454 = vmatmul.msk.f32.vlgmr.msrb.gmra.mxu1 %vm200_vm2, %v4123_v33 }
 0x516   :  { %2456 = vmatmul.msk.f32.vlgmr.msrb.gmra.mxu0 %vm200_vm2, %v4123_v33  ;;  %1832 = vmatpush.msrb.mxu1 %v4131_v29 }
 0x517   :  { %1894 = vmatpush.msrb.mxu0 %v3838_v1 }
 0x518   :  { %v2546_v21 = vpop.eup %2545  ;;  %1833 = vmatpush.msrb.mxu1 %v4135_v7 }
 0x519   :  { %v2548_v62 = vpop.eup %2547  ;;  %v1530_v16 = vmul.f32 %v2546_v21, %v1528_v45  ;;  %1895 = vmatpush.msrb.mxu0 %v3846_v41  ;;  %vm1535_vm9 = vweird.f32 %v2546_v21 }
 0x51a   :  { %v1508_v32 = vadd.f32 1.0, %v2548_v62  ;;  %1834 = vmatpush.msrb.mxu1 %v4144_v47  ;;  %v1538_v62 = vand.u32 2147483647, %v1528_v45  ;;  %v4156_v47 = vld [vmem:[#allocation15 + $0x58] sm:$0xff]  ;;  %vm1536_vm11 = vmor %vm1534_vm10, %vm1535_vm9 }
 0x51b   :  { %v1531_v6 = vsub.f32 1.0, %v1530_v16  ;;  %1896 = vmatpush.msrb.mxu0 %v3854_v34  ;;  %4759 = vst [vmem:[#allocation52_spill] sm:$0xff] %v4156_v47  ;;  %v1438_v16 = vadd.f32 %v4005_v13, %v1437_v55 }
 0x51c   :  { %2549 = vrcp.f32 %v1508_v32  ;;  %1835 = vmatpush.msrb.mxu1 %v4150_v22  ;;  %v1541_v22 = vor.u32 1.1754944e-38, %v1540_v61  ;;  %vm1539_vm12 = vcmp.eq.f32.partialorder %v1538_v62, 8.507059e+37  ;;  %v4169_v61 = vld [vmem:[#allocation15 + $0x40] sm:$0xff]  ;;  %v4173_v62 = vld [vmem:[#allocation15 + $0x38] sm:$0xff]  ;;  %vm1514_vm14 = vweird.f32 %v1508_v32 }
 0x51d   :  { %v1532_v41 = vmul.f32 %v2546_v21, %v1531_v6  ;;  %2358 = vrot.lane.b32.xlu1 %v833_v23, %s2913_s6  ;;  %1897 = vmatpush.msrb.mxu0 %v3862_v57  ;;  %v1503_v6 = vmax.f32 %v1501_v28, 0.0  ;;  %4760 = vst [vmem:[#allocation53_spill] sm:$0xff] %v4173_v62 }
 0x51e   :  { %1836 = vmatpush.msrb.mxu1 %v4156_v47  ;;  %v4165_v47 = vld [vmem:[#allocation15 + $0x48] sm:$0xff] }
 0x51f   :  { %v1533_v15 = vadd.f32 %v2546_v21, %v1532_v41  ;;  %1898 = vmatpush.msrb.mxu0 %v3869_v26  ;;  %v1440_v41 = vmax.f32 %v1438_v16, 0.0  ;;  %v4176_v16 = vld [vmem:[#allocation15 + $0x30] sm:$0xff] }
 0x520   :  { %1837 = vmatpush.msrb.mxu1 %v4161_v10  ;;  %4761 = vst [vmem:[#allocation54_spill] sm:$0xff] %v4176_v16 }
 0x521   :  { %v1537_v23 = vsel %vm1536_vm11, %v2546_v21, %v1533_v15  ;;  %1899 = vmatpush.msrb.mxu0 %v3876_v48 }
 0x522   :  { %v2550_v57 = vpop.eup %2549  ;;  %v1542_v34 = vsel %vm1539_vm12, %v1541_v22, %v1537_v23  ;;  %1838 = vmatpush.msrb.mxu1 %v4165_v47  ;;  %v4179_v23 = vld [vmem:[#allocation15 + $0x28] sm:$0xff] }
 0x523   :  { %v1510_v45 = vmul.f32 %v2550_v57, %v1508_v32  ;;  %v1544_v55 = vmul.f32 %v1542_v34, %v1503_v6  ;;  %1900 = vmatpush.msrb.mxu0 %v3883_v44  ;;  %vm1515_vm13 = vweird.f32 %v2550_v57  ;;  %v1520_v34 = vand.u32 2147483648, %v1508_v32 }
 0x524   :  { %1839 = vmatpush.msrb.mxu1 %v4169_v61  ;;  %v1518_v6 = vand.u32 2147483647, %v1508_v32  ;;  %vm1516_vm15 = vmor %vm1514_vm14, %vm1515_vm13 }
 0x525   :  { %v1511_v28 = vsub.f32 1.0, %v1510_v45  ;;  %v1545_v21 = vadd.f32 %v1544_v55, %v1440_v41  ;;  %1901 = vmatpush.msrb.mxu0 %v3890_v3  ;;  %v4182_v45 = vld [vmem:[#allocation15 + $0x20] sm:$0xff] }
 0x526   :  { %1840 = vmatpush.msrb.mxu1 %v4173_v62  ;;  %vm1519_vm3 = vcmp.eq.f32.partialorder %v1518_v6, 8.507059e+37  ;;  %v4189_v62 = vld [vmem:[#allocation15 + $0x10] sm:$0xff] }
 0x527   :  { %v1512_v22 = vmul.f32 %v2550_v57, %v1511_v28  ;;  %2551 = vtanh.f32 %v1545_v21  ;;  %v1521_v28 = vor.u32 1.1754944e-38, %v1520_v34  ;;  %v1853_v34 = vpop.permute.xlu0 %1852 }
 0x528   :  { %1841 = vmatpush.msrb.mxu1 %v4176_v16  ;;  %v4186_v16 = vld [vmem:[#allocation15 + $0x18] sm:$0xff] }
 0x529   :  { %v1513_v15 = vadd.f32 %v2550_v57, %v1512_v22 }
 0x52a   :  { %1842 = vmatpush.msrb.mxu1 %v4179_v23 }
 0x52b   :  { %v1517_v41 = vsel %vm1516_vm15, %v2550_v57, %v1513_v15  ;;  %v4194_v15 = vld [vmem:[#allocation15 + $0x8] sm:$0xff] }
 0x52c   :  { %1843 = vmatpush.msrb.mxu1 %v4182_v45  ;;  %v1522_v32 = vsel %vm1519_vm3, %v1521_v28, %v1517_v41  ;;  %v4762_v41 = vld [vmem:[#allocation23_spill] sm:$0xff]  ;;  %v4764_v28 = vld [vmem:[#allocation25_spill] sm:$0xff] }
 0x52d   :  { %v2552_v55 = vpop.eup %2551 }
 0x52e   :  { %v1547_v21 = vsub.f32 %v4016_v56, %v2552_v55  ;;  %1844 = vmatpush.msrb.mxu1 %v4186_v16  ;;  %v4205_v56 = vld [vmem:[#allocation15] sm:$0xff] }
 0x530   :  { %v1548_v22 = vmul.f32 %v1547_v21, %v1522_v32  ;;  %1845 = vmatpush.msrb.mxu1 %v4189_v62  ;;  %v4766_v21 = vld [vmem:[#allocation42_spill] sm:$0xff] }
 0x531   :  { %v4769_v32 = vld [vmem:[#allocation34_spill] sm:$0xff] }
 0x532   :  { %v4192_v57 = vadd.f32 %v2552_v55, %v1548_v22  ;;  %1846 = vmatpush.msrb.mxu1 %v4194_v15  ;;  %v4763_v55 = vld [vmem:[#allocation41_spill] sm:$0xff]  ;;  %v4770_v22 = vld [vmem:[#allocation24_spill] sm:$0xff] }
 0x534   :  { %2452 = vmatmul.msk.f32.vlgmr.msrb.gmra.mxu3 %vm200_vm2, %v4192_v57  ;;  %2457 = vmatmul.msk.f32.vlgmr.msra.gmra.mxu1 %vm200_vm2, %v4192_v57 }
 0x535   :  { %2459 = vmatmul.msk.f32.vlgmr.msra.gmra.mxu0 %vm200_vm2, %v4192_v57  ;;  %1724 = vmatpush.msrb.mxu3 %v4024_v0 }
 0x536   :  { %1957 = vmatpush.msra.mxu0 %v3894_v52  ;;  %1847 = vmatpush.msrb.mxu1 %v4205_v56 }
 0x537   :  { %1725 = vmatpush.msrb.mxu3 %v4031_v17 }
 0x538   :  { %2069 = vmatpush.msra.mxu1 %v4028_v36  ;;  %1958 = vmatpush.msra.mxu0 %v3897_v11 }
 0x539   :  { %1726 = vmatpush.msrb.mxu3 %v4038_v53 }
 0x53a   :  { %2070 = vmatpush.msra.mxu1 %v4035_v2  ;;  %1959 = vmatpush.msra.mxu0 %v3900_v27 }
 0x53b   :  { %1727 = vmatpush.msrb.mxu3 %v4045_v51 }
 0x53c   :  { %2071 = vmatpush.msra.mxu1 %v4042_v35  ;;  %2455 = vmatmul.msk.f32.vlgmr.msra.gmra.mxu3 %vm200_vm2, %v4123_v33  ;;  %v1856_v33 = vpop.permute.xlu1 %1855 }
 0x53d   :  { %1960 = vmatpush.msra.mxu0 %v3903_v30  ;;  %1728 = vmatpush.msrb.mxu3 %v4051_v37  ;;  %v1858_v6 = vsel %vm203_vm0, %v1853_v34, %v1856_v33  ;;  %v4772_v33 = vld [vmem:[#allocation38_spill] sm:$0xff]  ;;  %v4773_v34 = vld [vmem:[#allocation27_spill] sm:$0xff] }
 0x53e   :  { %2072 = vmatpush.msra.mxu1 %v4054_v31 }
 0x53f   :  { %1961 = vmatpush.msra.mxu0 %v3906_v40  ;;  %1729 = vmatpush.msrb.mxu3 %v4058_v49 }
 0x540   :  { %2073 = vmatpush.msra.mxu1 %v4061_v14 }
 0x541   :  { %1962 = vmatpush.msra.mxu0 %v3909_v58  ;;  %1730 = vmatpush.msrb.mxu3 %v4065_v42 }
 0x542   :  { %2074 = vmatpush.msra.mxu1 %v4068_v18 }
 0x543   :  { %1963 = vmatpush.msra.mxu0 %v3912_v20  ;;  %1731 = vmatpush.msrb.mxu3 %v4072_v19 }
 0x544   :  { %2075 = vmatpush.msra.mxu1 %v4075_v25  ;;  %2458 = vmatmul.msk.f32.vlgmr.msrb.gmra.mxu3 %vm200_vm2, %v4192_v57 }
 0x545   :  { %1964 = vmatpush.msra.mxu0 %v3915_v59  ;;  %1874 = vmatpush.msra.mxu3 %v3679_v50  ;;  %v4765_v50 = vld [vmem:[#allocation28_spill] sm:$0xff] }
 0x546   :  { %2076 = vmatpush.msra.mxu1 %v4082_v60 }
 0x547   :  { %1875 = vmatpush.msra.mxu3 %v3683_v24  ;;  %v4767_v24 = vld [vmem:[#allocation30_spill] sm:$0xff] }
 0x549   :  { %1876 = vmatpush.msra.mxu3 %v3686_v43  ;;  %v4768_v43 = vld [vmem:[#allocation32_spill] sm:$0xff] }
 0x54b   :  { %1877 = vmatpush.msra.mxu3 %v3690_v12  ;;  %v4771_v12 = vld [vmem:[#allocation26_spill] sm:$0xff] }
 0x54c   :  { %2461 = vmatmul.msk.f32.vlgmr.msra.gmra.mxu3 %vm231_vm1, %v1858_v6  ;;  %v4774_v6 = vld [vmem:[#allocation29_spill] sm:$0xff] }
 0x54d   :  { %1936 = vmatpush.msrb.mxu3 %v4762_v41  ;;  %v4775_v41 = vld [vmem:[#allocation31_spill] sm:$0xff] }
 0x54f   :  { %1937 = vmatpush.msrb.mxu3 %v4763_v55  ;;  %v4776_v55 = vld [vmem:[#allocation33_spill] sm:$0xff] }
 0x551   :  { %1938 = vmatpush.msrb.mxu3 %v4764_v28  ;;  %v4777_v28 = vld [vmem:[#allocation35_spill] sm:$0xff] }
 0x553   :  { %1939 = vmatpush.msrb.mxu3 %v4765_v50 }
 0x555   :  { %1940 = vmatpush.msrb.mxu3 %v4766_v21 }
 0x557   :  { %1941 = vmatpush.msrb.mxu3 %v4767_v24 }
 0x559   :  { %1942 = vmatpush.msrb.mxu3 %v4768_v43 }
 0x55b   :  { %1943 = vmatpush.msrb.mxu3 %v4769_v32 }
 0x55d   :  { %1999 = vmatpush.msra.mxu3 %v4770_v22 }
 0x55f   :  { %2000 = vmatpush.msra.mxu3 %v4771_v12 }
 0x561   :  { %2001 = vmatpush.msra.mxu3 %v4772_v33 }
 0x563   :  { %2002 = vmatpush.msra.mxu3 %v4773_v34 }
 0x565   :  { %2003 = vmatpush.msra.mxu3 %v4774_v6  ;;  %v4263_v6 = vld [vmem:[%s4497_s18] ss:$0 sm:$0xff] }
 0x566   :  { %4779 = vst [vmem:[#allocation44_spill] sm:$0xff] %v4263_v6 }
 0x567   :  { %2004 = vmatpush.msra.mxu3 %v4775_v41 }
 0x569   :  { %2005 = vmatpush.msra.mxu3 %v4776_v55 }
 0x56b   :  { %2006 = vmatpush.msra.mxu3 %v4777_v28 }
 0x581   :  { %v4256_v21 = vpop.f32.mrf.mxu3 }
 0x582   :  { %4778 = vst [vmem:[#allocation55_spill] sm:$0xff] %v4256_v21  ;;  %v1575_v21 = vpop.permute.xlu2 %1574 }
 0x592   :  { %v1649_v50 = vpop.f32.mrf.mxu1 }
 0x593   :  { %v1650_v24 = vadd.f32 %v4753_v46, %v1649_v50 }
 0x595   :  { %v1652_v22 = vmax.f32 %v1650_v24, 0.0 }
 0x5b1   :  { %v1712_v43 = vpop.f32.mrf.mxu1 }
 0x5b2   :  { %v1713_v32 = vadd.f32 %v3942_v54, %v1712_v43  ;;  %v4267_v43 = vld [vmem:[#allocation6 + $0x38] sm:$0xff] }
 0x5b3   :  { %4780 = vst [vmem:[#allocation45_spill] sm:$0xff] %v4267_v43 }
 0x5b4   :  { %v1715_v12 = vmax.f32 %v1713_v32, 0.0  ;;  %v4270_v32 = vld [vmem:[#allocation6 + $0x30] sm:$0xff] }
 0x5b5   :  { %4781 = vst [vmem:[#allocation43_spill] sm:$0xff] %v4270_v32 }
 0x5b6   :  { %v1778_v33 = vadd.f32 %v1715_v12, %v1652_v22  ;;  %v4273_v12 = vld [vmem:[#allocation6 + $0x28] sm:$0xff] }
 0x5b7   :  { %v1570_v34 = vpop.f32.mrf.mxu3  ;;  %4782 = vst [vmem:[#allocation23_spill] sm:$0xff] %v4273_v12 }
 0x5b8   :  { %v1779_v60 = vsub.f32 0.0, %v1778_v33  ;;  %v1571_v41 = vadd.f32 %v4263_v6, %v1570_v34  ;;  %v4276_v33 = vld [vmem:[#allocation6 + $0x20] sm:$0xff]  ;;  %v4280_v34 = vld [vmem:[#allocation6 + $0x18] sm:$0xff] }
 0x5b9   :  { %4783 = vst [vmem:[#allocation41_spill] sm:$0xff] %v4276_v33 }
 0x5ba   :  { %v1780_v55 = vmul.f32 1.442695, %v1779_v60  ;;  %v1573_v28 = vmax.f32 %v1571_v41, 0.0  ;;  %4784 = vst [vmem:[#allocation25_spill] sm:$0xff] %v4280_v34 }
 0x5bc   :  { %2553 = vpow2.f32 %v1780_v55  ;;  %v1577_v50 = vsel %vm200_vm2, %v1573_v28, %v1575_v21  ;;  %v1691_v55 = vpop.f32.mrf.mxu0 }
 0x5bd   :  { %1594 = vmatmul.f32.vlgmr.msrb.gmra.mxu2 %v1577_v50  ;;  %v4284_v50 = vld [vmem:[#allocation6 + $0x10] sm:$0xff] }
 0x5be   :  { %1915 = vmatpush.msrb.mxu2 %v4267_v43  ;;  %4785 = vst [vmem:[#allocation28_spill] sm:$0xff] %v4284_v50 }
 0x5bf   :  { %v1670_v24 = vpop.f32.mrf.mxu3 }
 0x5c0   :  { %1916 = vmatpush.msrb.mxu2 %v4270_v32  ;;  %v1671_v21 = vadd.f32 %v4754_v9, %v1670_v24 }
 0x5c2   :  { %v2554_v22 = vpop.eup %2553  ;;  %1917 = vmatpush.msrb.mxu2 %v4273_v12 }
 0x5c3   :  { %v1782_v60 = vadd.f32 1.0, %v2554_v22  ;;  %v1673_v22 = vmax.f32 %v1671_v21, 0.0 }
 0x5c4   :  { %1918 = vmatpush.msrb.mxu2 %v4276_v33  ;;  %v1754_v54 = vpop.f32.mrf.mxu0 }
 0x5c5   :  { %2555 = vrcp.f32 %v1782_v60  ;;  %vm1788_vm5 = vweird.f32 %v1782_v60 }
 0x5c6   :  { %1919 = vmatpush.msrb.mxu2 %v4280_v34  ;;  %v1794_v34 = vand.u32 2147483648, %v1782_v60 }
 0x5c7   :  { %v1733_v41 = vpop.f32.mrf.mxu3 }
 0x5c8   :  { %v1734_v28 = vadd.f32 %v4755_v63, %v1733_v41  ;;  %1920 = vmatpush.msrb.mxu2 %v4284_v50  ;;  %v1792_v50 = vand.u32 2147483647, %v1782_v60 }
 0x5ca   :  { %v1736_v12 = vmax.f32 %v1734_v28, 0.0  ;;  %1921 = vmatpush.msrb.mxu2 %v3978_v8  ;;  %vm1793_vm7 = vcmp.eq.f32.partialorder %v1792_v50, 8.507059e+37  ;;  %v4788_v50 = vld [vmem:[#allocation49_spill] sm:$0xff] }
 0x5cb   :  { %v2556_v33 = vpop.eup %2555 }
 0x5cc   :  { %v1784_v32 = vmul.f32 %v2556_v33, %v1782_v60  ;;  %v1758_v43 = vadd.f32 %v1736_v12, %v1673_v22  ;;  %1922 = vmatpush.msrb.mxu2 %v3984_v38  ;;  %vm1789_vm4 = vweird.f32 %v2556_v33  ;;  %v1755_v12 = vadd.f32 %v3998_v39, %v1754_v54 }
 0x5cd   :  { %vm1790_vm6 = vmor %vm1788_vm5, %vm1789_vm4  ;;  %v1692_v54 = vadd.f32 %v4005_v13, %v1691_v55  ;;  %v4791_v55 = vld [vmem:[#allocation39_spill] sm:$0xff] }
 0x5ce   :  { %v1785_v9 = vsub.f32 1.0, %v1784_v32  ;;  %v1759_v24 = vsub.f32 0.0, %v1758_v43  ;;  %v1795_v32 = vor.u32 1.1754944e-38, %v1794_v34  ;;  %v4786_v43 = vld [vmem:[#allocation36_spill] sm:$0xff]  ;;  %v4787_v34 = vld [vmem:[#allocation50_spill] sm:$0xff] }
 0x5cf   :  { %v1879_v6 = vpop.f32.mrf.mxu3 }
 0x5d0   :  { %v1786_v46 = vmul.f32 %v2556_v33, %v1785_v9  ;;  %v1760_v63 = vmul.f32 1.442695, %v1759_v24  ;;  %v1880_v41 = vadd.f32 %v3948_v5, %v1879_v6  ;;  %v1757_v5 = vmax.f32 %v1755_v12, 0.0  ;;  %v4789_v24 = vld [vmem:[#allocation40_spill] sm:$0xff] }
 0x5d1   :  { %v1088_v9 = vadd.f32 %v4141_v4, %v4788_v50 }
 0x5d2   :  { %v1787_v21 = vadd.f32 %v2556_v33, %v1786_v46  ;;  %2557 = vpow2.f32 %v1760_v63  ;;  %v4290_v28 = vmax.f32 %v1880_v41, 0.0  ;;  %v1694_v63 = vmax.f32 %v1692_v54, 0.0  ;;  %v4793_v54 = vld [vmem:[#allocation53_spill] sm:$0xff] }
 0x5d4   :  { %v1791_v22 = vsel %vm1790_vm6, %v2556_v33, %v1787_v21  ;;  %2082 = vrot.lane.b32.xlu2 %v4290_v28, %s2915_s11  ;;  %2462 = vmatmul.msk.f32.vlgmr.msrb.gmra.mxu0 %vm200_vm2, %v4290_v28  ;;  %v4792_v21 = vld [vmem:[#allocation52_spill] sm:$0xff] }
 0x5d5   :  { %2464 = vmatmul.msk.f32.vlgmr.msrb.gmra.mxu3 %vm200_vm2, %v4290_v28  ;;  %2086 = vmatpush.msrb.mxu0 %v4131_v29  ;;  %v1796_v46 = vsel %vm1793_vm7, %v1795_v32, %v1791_v22 }
 0x5d6   :  { %2145 = vmatpush.msrb.mxu3 %v3838_v1  ;;  %v1798_v60 = vmul.f32 %v1796_v46, %v1757_v5  ;;  %v4790_v1 = vld [vmem:[#allocation51_spill] sm:$0xff] }
 0x5d7   :  { %2087 = vmatpush.msrb.mxu0 %v4135_v7 }
 0x5d8   :  { %v2558_v6 = vpop.eup %2557  ;;  %2146 = vmatpush.msrb.mxu3 %v4786_v43  ;;  %v1799_v41 = vadd.f32 %v1798_v60, %v1694_v63  ;;  %v2687_v63 = vld [vmem:[#allocation12 + $0x28] sm:$0xff] }
 0x5d9   :  { %v1762_v33 = vadd.f32 1.0, %v2558_v6  ;;  %2088 = vmatpush.msrb.mxu0 %v4787_v34 }
 0x5da   :  { %2147 = vmatpush.msrb.mxu3 %v4789_v24 }
 0x5db   :  { %2559 = vrcp.f32 %v1762_v33  ;;  %2089 = vmatpush.msrb.mxu0 %v4790_v1  ;;  %v1774_v46 = vand.u32 2147483648, %v1762_v33  ;;  %v1772_v5 = vand.u32 2147483647, %v1762_v33  ;;  %vm1768_vm9 = vweird.f32 %v1762_v33 }
 0x5dc   :  { %2362 = vrot.lane.b32.xlu2 %v1088_v9, %s2917_s7  ;;  %2148 = vmatpush.msrb.mxu3 %v4791_v55  ;;  %2561 = vtanh.f32 %v1799_v41  ;;  %v2688_v55 = vld [vmem:[#allocation12 + $0x20] sm:$0xff]  ;;  %v2689_v41 = vld [vmem:[#allocation12 + $0x18] sm:$0xff] }
 0x5dd   :  { %2090 = vmatpush.msrb.mxu0 %v4792_v21  ;;  %v1775_v60 = vor.u32 1.1754944e-38, %v1774_v46  ;;  %vm1773_vm11 = vcmp.eq.f32.partialorder %v1772_v5, 8.507059e+37 }
 0x5de   :  { %2149 = vmatpush.msrb.mxu3 %v3869_v26 }
 0x5df   :  { %2091 = vmatpush.msrb.mxu0 %v4161_v10 }
 0x5e0   :  { %2150 = vmatpush.msrb.mxu3 %v3876_v48  ;;  %v4794_v48 = vld [vmem:[#allocation54_spill] sm:$0xff] }
 0x5e1   :  { %v2560_v12 = vpop.eup %2559  ;;  %2092 = vmatpush.msrb.mxu0 %v4165_v47 }
 0x5e2   :  { %v1764_v22 = vmul.f32 %v2560_v12, %v1762_v33  ;;  %2151 = vmatpush.msrb.mxu3 %v3883_v44  ;;  %vm1769_vm8 = vweird.f32 %v2560_v12  ;;  %v2562_v6 = vpop.eup %2561  ;;  %v2686_v33 = vld [vmem:[#allocation12 + $0x30] sm:$0xff] }
 0x5e3   :  { %2093 = vmatpush.msrb.mxu0 %v4169_v61  ;;  %vm1770_vm10 = vmor %vm1768_vm9, %vm1769_vm8  ;;  %v1801_v44 = vsub.f32 %v4192_v57, %v2562_v6  ;;  %v2684_v57 = vld [vmem:[#allocation8] sm:$0xff] }
 0x5e4   :  { %v1765_v32 = vsub.f32 1.0, %v1764_v22  ;;  %2152 = vmatpush.msrb.mxu3 %v3890_v3  ;;  %v2691_v22 = vld [vmem:[#allocation12 + $0x8] sm:$0xff] }
 0x5e5   :  { %2094 = vmatpush.msrb.mxu0 %v4793_v54 }
 0x5e6   :  { %v1766_v26 = vmul.f32 %v2560_v12, %v1765_v32  ;;  %v2692_v32 = vld [vmem:[#allocation12] sm:$0xff] }
 0x5e7   :  { %2095 = vmatpush.msrb.mxu0 %v4794_v48 }
 0x5e8   :  { %v1767_v43 = vadd.f32 %v2560_v12, %v1766_v26 }
 0x5e9   :  { %2096 = vmatpush.msrb.mxu0 %v4179_v23 }
 0x5ea   :  { %v1771_v50 = vsel %vm1770_vm10, %v2560_v12, %v1767_v43  ;;  %v2690_v12 = vld [vmem:[#allocation12 + $0x10] sm:$0xff] }
 0x5eb   :  { %v1776_v3 = vsel %vm1773_vm11, %v1775_v60, %v1771_v50  ;;  %2097 = vmatpush.msrb.mxu0 %v4182_v45 }
 0x5ec   :  { %v1802_v9 = vmul.f32 %v1801_v44, %v1776_v3  ;;  %v4798_v44 = vld [vmem:[#allocation47_spill] sm:$0xff] }
 0x5ed   :  { %2098 = vmatpush.msrb.mxu0 %v4186_v16 }
 0x5ee   :  { %v4325_v24 = vadd.f32 %v2562_v6, %v1802_v9  ;;  %v4797_v6 = vld [vmem:[#allocation46_spill] sm:$0xff] }
 0x5ef   :  { %2099 = vmatpush.msrb.mxu0 %v4189_v62 }
 0x5f0   :  { %2460 = vmatmul.msk.f32.vlgmr.msra.gmra.mxu2 %vm200_vm2, %v4325_v24  ;;  %2465 = vmatmul.msk.f32.vlgmr.msra.gmra.mxu0 %vm200_vm2, %v4325_v24 }
 0x5f1   :  { %2467 = vmatmul.msk.f32.vlgmr.msra.gmra.mxu3 %vm200_vm2, %v4325_v24  ;;  %1978 = vmatpush.msra.mxu2 %v4024_v0 }
 0x5f2   :  { %2208 = vmatpush.msra.mxu3 %v3894_v52  ;;  %2100 = vmatpush.msrb.mxu0 %v4194_v15  ;;  %v2673_v52 = vld [vmem:[#allocation4 + $0x18] sm:$0xff] }
 0x5f3   :  { %1979 = vmatpush.msra.mxu2 %v4031_v17 }
 0x5f4   :  { %2209 = vmatpush.msra.mxu3 %v3897_v11  ;;  %2101 = vmatpush.msrb.mxu0 %v4205_v56  ;;  %v2674_v11 = vld [vmem:[#allocation4 + $0x10] sm:$0xff] }
 0x5f5   :  { %1980 = vmatpush.msra.mxu2 %v4038_v53 }
 0x5f6   :  { %2320 = vmatpush.msra.mxu0 %v4028_v36  ;;  %2210 = vmatpush.msra.mxu3 %v3900_v27  ;;  %v4795_v27 = vld [vmem:[#allocation48_spill] sm:$0xff]  ;;  %v2676_v36 = vld [vmem:[#allocation4] sm:$0xff] }
 0x5f7   :  { %1981 = vmatpush.msra.mxu2 %v4045_v51 }
 0x5f8   :  { %2321 = vmatpush.msra.mxu0 %v4035_v2  ;;  %2463 = vmatmul.msk.f32.vlgmr.msrb.gmra.mxu2 %vm200_vm2, %v4290_v28  ;;  %v2677_v2 = vld [vmem:[#allocation8 + $0x38] sm:$0xff] }
 0x5f9   :  { %2211 = vmatpush.msra.mxu3 %v3903_v30  ;;  %1982 = vmatpush.msra.mxu2 %v4051_v37  ;;  %v2107_v30 = vpop.permute.xlu0 %2106  ;;  %v2685_v28 = vld [vmem:[#allocation12 + $0x38] sm:$0xff] }
 0x5fa   :  { %2322 = vmatpush.msra.mxu0 %v4042_v35  ;;  %v2679_v35 = vld [vmem:[#allocation8 + $0x28] sm:$0xff] }
 0x5fb   :  { %2212 = vmatpush.msra.mxu3 %v3906_v40  ;;  %1983 = vmatpush.msra.mxu2 %v4058_v49  ;;  %v2675_v40 = vld [vmem:[#allocation4 + $0x8] sm:$0xff] }
 0x5fc   :  { %2323 = vmatpush.msra.mxu0 %v4054_v31  ;;  %v2680_v31 = vld [vmem:[#allocation8 + $0x20] sm:$0xff] }
 0x5fd   :  { %2213 = vmatpush.msra.mxu3 %v3909_v58  ;;  %1984 = vmatpush.msra.mxu2 %v4065_v42  ;;  %v4796_v58 = vld [vmem:[#allocation37_spill] sm:$0xff] }
 0x5fe   :  { %2324 = vmatpush.msra.mxu0 %v4061_v14  ;;  %v2681_v14 = vld [vmem:[#allocation8 + $0x18] sm:$0xff] }
 0x5ff   :  { %2214 = vmatpush.msra.mxu3 %v3912_v20  ;;  %1985 = vmatpush.msra.mxu2 %v4072_v19  ;;  %v2109_v20 = vsel %vm203_vm0, %v4796_v58, %v2107_v30  ;;  %v4799_v30 = vld [vmem:[#allocation44_spill] sm:$0xff] }
 0x600   :  { %2325 = vmatpush.msra.mxu0 %v4068_v18  ;;  %2466 = vmatmul.msk.f32.vlgmr.msra.gmra.mxu2 %vm200_vm2, %v4325_v24  ;;  %v2682_v18 = vld [vmem:[#allocation8 + $0x10] sm:$0xff] }
 0x601   :  { %2215 = vmatpush.msra.mxu3 %v3915_v59  ;;  %2125 = vmatpush.msrb.mxu2 %v2673_v52  ;;  %v2678_v59 = vld [vmem:[#allocation8 + $0x30] sm:$0xff] }
 0x602   :  { %2326 = vmatpush.msra.mxu0 %v4075_v25  ;;  %v2683_v25 = vld [vmem:[#allocation8 + $0x8] sm:$0xff] }
 0x603   :  { %2126 = vmatpush.msrb.mxu2 %v2674_v11 }
 0x604   :  { %2327 = vmatpush.msra.mxu0 %v4795_v27 }
 0x605   :  { %2127 = vmatpush.msrb.mxu2 %v2675_v40 }
 0x607   :  { %2128 = vmatpush.msrb.mxu2 %v2676_v36  ;;  %v1829_v36 = vpop.permute.xlu1 %1828 }
 0x608   :  { %2469 = vmatmul.msk.f32.vlgmr.msrb.gmra.mxu2 %vm231_vm1, %v2109_v20 }
 0x609   :  { %2187 = vmatpush.msra.mxu2 %v2677_v2 }
 0x60b   :  { %2188 = vmatpush.msra.mxu2 %v2678_v59  ;;  %v4800_v59 = vld [vmem:[#allocation45_spill] sm:$0xff] }
 0x60d   :  { %2189 = vmatpush.msra.mxu2 %v2679_v35 }
 0x60f   :  { %2190 = vmatpush.msra.mxu2 %v2680_v31  ;;  %v4801_v31 = vld [vmem:[#allocation43_spill] sm:$0xff] }
 0x611   :  { %2191 = vmatpush.msra.mxu2 %v2681_v14 }
 0x613   :  { %2192 = vmatpush.msra.mxu2 %v2682_v18  ;;  %v4802_v18 = vld [vmem:[#allocation23_spill] sm:$0xff] }
 0x615   :  { %2193 = vmatpush.msra.mxu2 %v2683_v25 }
 0x617   :  { %2194 = vmatpush.msra.mxu2 %v2684_v57  ;;  %v4803_v57 = vld [vmem:[#allocation41_spill] sm:$0xff] }
 0x619   :  { %2250 = vmatpush.msrb.mxu2 %v2685_v28  ;;  %v4380_v28 = vld [vmem:[%s4488_s9] ss:$0 sm:$0xff] }
 0x61b   :  { %2251 = vmatpush.msrb.mxu2 %v2686_v33 }
 0x61d   :  { %2252 = vmatpush.msrb.mxu2 %v2687_v63  ;;  %v4804_v63 = vld [vmem:[#allocation25_spill] sm:$0xff] }
 0x61f   :  { %2253 = vmatpush.msrb.mxu2 %v2688_v55 }
 0x621   :  { %2254 = vmatpush.msrb.mxu2 %v2689_v41 }
 0x623   :  { %2255 = vmatpush.msrb.mxu2 %v2690_v12  ;;  %v4387_v12 = vld [vmem:[%s4494_s15] ss:$0 sm:$0xff] }
 0x625   :  { %2256 = vmatpush.msrb.mxu2 %v2691_v22 }
 0x627   :  { %2257 = vmatpush.msrb.mxu2 %v2692_v32  ;;  %v4805_v32 = vld [vmem:[#allocation28_spill] sm:$0xff] }
 0x640   :  { %v1595_v46 = vpop.f32.mrf.mxu2 }
 0x641   :  { %v1596_v26 = vadd.f32 %v4141_v4, %v1595_v46 }
 0x643   :  { %2370 = vrot.lane.b32.xlu1 %v1596_v26, %s2915_s11 }
 0x651   :  { %v1903_v5 = vpop.f32.mrf.mxu0 }
 0x652   :  { %v1904_v43 = vadd.f32 %v4797_v6, %v1903_v5 }
 0x654   :  { %v1906_v3 = vmax.f32 %v1904_v43, 0.0 }
 0x658   :  { %v1945_v41 = vpop.f32.mrf.mxu3 }
 0x66d   :  { %v1966_v60 = vpop.f32.mrf.mxu0 }
 0x66e   :  { %v1967_v50 = vadd.f32 %v4798_v44, %v1966_v60 }
 0x670   :  { %v1969_v9 = vmax.f32 %v1967_v50, 0.0 }
 0x672   :  { %v2032_v52 = vadd.f32 %v1969_v9, %v1906_v3 }
 0x673   :  { %v1824_v11 = vpop.f32.mrf.mxu2 }
 0x674   :  { %v2033_v27 = vsub.f32 0.0, %v2032_v52  ;;  %v1825_v40 = vadd.f32 %v4799_v30, %v1824_v11  ;;  %v2008_v9 = vpop.f32.mrf.mxu3 }
 0x676   :  { %v2034_v58 = vmul.f32 1.442695, %v2033_v27  ;;  %v1827_v20 = vmax.f32 %v1825_v40, 0.0  ;;  %v2695_v27 = vld [vmem:[%s4660_s0] ss:$0 sm:$0xff] }
 0x678   :  { %2563 = vpow2.f32 %v2034_v58  ;;  %v1831_v2 = vsel %vm200_vm2, %v1827_v20, %v1829_v36 }
 0x679   :  { %1848 = vmatmul.f32.vlgmr.msrb.gmra.mxu1 %v1831_v2 }
 0x67a   :  { %2166 = vmatpush.msrb.mxu1 %v4800_v59 }
 0x67b   :  { %v1924_v35 = vpop.f32.mrf.mxu2 }
 0x67c   :  { %2167 = vmatpush.msrb.mxu1 %v4801_v31  ;;  %v1925_v33 = vadd.f32 %v4380_v28, %v1924_v35  ;;  %v1946_v35 = vadd.f32 %v4005_v13, %v1945_v41 }
 0x67e   :  { %v2564_v14 = vpop.eup %2563  ;;  %2168 = vmatpush.msrb.mxu1 %v4802_v18  ;;  %v1927_v46 = vmax.f32 %v1925_v33, 0.0  ;;  %v1948_v33 = vmax.f32 %v1946_v35, 0.0 }
 0x67f   :  { %v2036_v25 = vadd.f32 1.0, %v2564_v14 }
 0x680   :  { %2169 = vmatpush.msrb.mxu1 %v4803_v57 }
 0x681   :  { %2565 = vrcp.f32 %v2036_v25  ;;  %v2048_v50 = vand.u32 2147483648, %v2036_v25  ;;  %v2046_v58 = vand.u32 2147483647, %v2036_v25  ;;  %vm2042_vm13 = vweird.f32 %v2036_v25 }
 0x682   :  { %2170 = vmatpush.msrb.mxu1 %v4804_v63 }
 0x683   :  { %v1987_v55 = vpop.f32.mrf.mxu2  ;;  %v2049_v2 = vor.u32 1.1754944e-38, %v2048_v50  ;;  %vm2047_vm15 = vcmp.eq.f32.partialorder %v2046_v58, 8.507059e+37 }
 0x684   :  { %v1988_v22 = vadd.f32 %v4387_v12, %v1987_v55  ;;  %2171 = vmatpush.msrb.mxu1 %v4805_v32 }
 0x686   :  { %v1990_v26 = vmax.f32 %v1988_v22, 0.0  ;;  %2172 = vmatpush.msrb.mxu1 %v3978_v8 }
 0x687   :  { %v2566_v5 = vpop.eup %2565 }
 0x688   :  { %v2038_v6 = vmul.f32 %v2566_v5, %v2036_v25  ;;  %v2012_v43 = vadd.f32 %v1990_v26, %v1927_v46  ;;  %2173 = vmatpush.msrb.mxu1 %v3984_v38  ;;  %vm2043_vm12 = vweird.f32 %v2566_v5  ;;  %v2009_v38 = vadd.f32 %v3998_v39, %v2008_v9  ;;  %v4806_v25 = vld [vmem:[#allocation55_spill] sm:$0xff] }
 0x689   :  { %vm2044_vm14 = vmor %vm2042_vm13, %vm2043_vm12  ;;  %v1342_v57 = vadd.f32 %v4141_v4, %v4806_v25 }
 0x68a   :  { %v2039_v60 = vsub.f32 1.0, %v2038_v6  ;;  %v2013_v44 = vsub.f32 0.0, %v2012_v43  ;;  %v2011_v31 = vmax.f32 %v2009_v38, 0.0 }
 0x68b   :  { %v2130_v3 = vpop.f32.mrf.mxu2 }
 0x68c   :  { %v2040_v52 = vmul.f32 %v2566_v5, %v2039_v60  ;;  %v2014_v11 = vmul.f32 1.442695, %v2013_v44  ;;  %v2131_v40 = vadd.f32 %v2695_v27, %v2130_v3 }
 0x68e   :  { %v2041_v8 = vadd.f32 %v2566_v5, %v2040_v52  ;;  %2567 = vpow2.f32 %v2014_v11  ;;  %v2133_v20 = vmax.f32 %v2131_v40, 0.0 }
 0x690   :  { %v2045_v36 = vsel %vm2044_vm14, %v2566_v5, %v2041_v8  ;;  %2333 = vrot.lane.b32.xlu0 %v2133_v20, %s2915_s11  ;;  %2470 = vmatmul.msk.f32.vlgmr.msrb.gmra.mxu3 %vm200_vm2, %v2133_v20 }
 0x691   :  { %2472 = vmatmul.msk.f32.vlgmr.msra.gmra.mxu2 %vm200_vm2, %v2133_v20  ;;  %2337 = vmatpush.msrb.mxu3 %v4131_v29  ;;  %v2050_v59 = vsel %vm2047_vm15, %v2049_v2, %v2045_v36  ;;  %vm2387_vm15 = vcmask 392192  }
 0x692   :  { %v2052_v39 = vmul.f32 %v2050_v59, %v2011_v31 }
 0x693   :  { %2338 = vmatpush.msrb.mxu3 %v4135_v7 }
 0x694   :  { %v2568_v14 = vpop.eup %2567  ;;  %v2053_v29 = vadd.f32 %v2052_v39, %v1948_v33 }
 0x695   :  { %v2016_v18 = vadd.f32 1.0, %v2568_v14  ;;  %2339 = vmatpush.msrb.mxu3 %v4787_v34  ;;  %v2699_v14 = vld [vmem:[%s4489_s10] ss:$0 sm:$0xff] }
 0x697   :  { %2569 = vrcp.f32 %v2016_v18  ;;  %2340 = vmatpush.msrb.mxu3 %v4790_v1  ;;  %v2028_v63 = vand.u32 2147483648, %v2016_v18  ;;  %v2026_v1 = vand.u32 2147483647, %v2016_v18  ;;  %vm2022_vm4 = vweird.f32 %v2016_v18 }
 0x698   :  { %2366 = vrot.lane.b32.xlu0 %v1342_v57, %s2916_s3  ;;  %2571 = vtanh.f32 %v2053_v29 }
 0x699   :  { %2341 = vmatpush.msrb.mxu3 %v4792_v21  ;;  %vm2027_vm6 = vcmp.eq.f32.partialorder %v2026_v1, 8.507059e+37 }
 0x69b   :  { %2342 = vmatpush.msrb.mxu3 %v4161_v10  ;;  %v2029_v10 = vor.u32 1.1754944e-38, %v2028_v63 }
 0x69d   :  { %v2570_v13 = vpop.eup %2569  ;;  %2343 = vmatpush.msrb.mxu3 %v4165_v47 }
 0x69e   :  { %v2018_v7 = vmul.f32 %v2570_v13, %v2016_v18  ;;  %vm2023_vm3 = vweird.f32 %v2570_v13  ;;  %v2572_v41 = vpop.eup %2571 }
 0x69f   :  { %2344 = vmatpush.msrb.mxu3 %v4169_v61  ;;  %vm2024_vm5 = vmor %vm2022_vm4, %vm2023_vm3  ;;  %v2055_v47 = vsub.f32 %v4325_v24, %v2572_v41  ;;  %vm2390_vm3 = vcmask 654336   ;;  %vm2392_vm4 = vcmask 785408  }
 0x6a0   :  { %v2019_v34 = vsub.f32 1.0, %v2018_v7 }
 0x6a1   :  { %2345 = vmatpush.msrb.mxu3 %v4793_v54 }
 0x6a2   :  { %v2020_v55 = vmul.f32 %v2570_v13, %v2019_v34 }
 0x6a3   :  { %2346 = vmatpush.msrb.mxu3 %v4794_v48 }
 0x6a4   :  { %v2021_v21 = vadd.f32 %v2570_v13, %v2020_v55 }
 0x6a5   :  { %2347 = vmatpush.msrb.mxu3 %v4179_v23 }
 0x6a6   :  { %v2025_v22 = vsel %vm2024_vm5, %v2570_v13, %v2021_v21  ;;  %vm2394_vm5 = vcmask 916480  }
 0x6a7   :  { %v2030_v61 = vsel %vm2027_vm6, %v2029_v10, %v2025_v22  ;;  %2348 = vmatpush.msrb.mxu3 %v4182_v45  ;;  %v2697_v45 = vld [vmem:[%s4493_s14] ss:$0 sm:$0xff] }
 0x6a8   :  { %v2056_v54 = vmul.f32 %v2055_v47, %v2030_v61 }
 0x6a9   :  { %2349 = vmatpush.msrb.mxu3 %v4186_v16 }
 0x6aa   :  { %v4418_v32 = vadd.f32 %v2572_v41, %v2056_v54 }
 0x6ab   :  { %2350 = vmatpush.msrb.mxu3 %v4189_v62 }
 0x6ac   :  { %2468 = vmatmul.msk.f32.vlgmr.msra.gmra.mxu1 %vm200_vm2, %v4418_v32  ;;  %2473 = vmatmul.msk.f32.vlgmr.msra.gmra.mxu3 %vm200_vm2, %v4418_v32 }
 0x6ad   :  { %2475 = vmatmul.msk.f32.vlgmr.msrb.gmra.mxu2 %vm200_vm2, %v4418_v32  ;;  %2229 = vmatpush.msra.mxu1 %v4024_v0 }
 0x6ae   :  { %2351 = vmatpush.msrb.mxu3 %v4194_v15 }
 0x6af   :  { %2230 = vmatpush.msra.mxu1 %v4031_v17 }
 0x6b0   :  { %2352 = vmatpush.msrb.mxu3 %v4205_v56 }
 0x6b1   :  { %2231 = vmatpush.msra.mxu1 %v4038_v53 }
 0x6b3   :  { %2232 = vmatpush.msra.mxu1 %v4045_v51 }
 0x6b4   :  { %2471 = vmatmul.msk.f32.vlgmr.msrb.gmra.mxu1 %vm200_vm2, %v2133_v20 }
 0x6b5   :  { %2233 = vmatpush.msra.mxu1 %v4051_v37  ;;  %v2083_v37 = vpop.permute.xlu2 %2082 }
 0x6b7   :  { %2234 = vmatpush.msra.mxu1 %v4058_v49  ;;  %v2696_v49 = vld [vmem:[%s4487_s8] ss:$0 sm:$0xff] }
 0x6b9   :  { %2235 = vmatpush.msra.mxu1 %v4065_v42 }
 0x6bb   :  { %2236 = vmatpush.msra.mxu1 %v4072_v19 }
 0x6bc   :  { %2474 = vmatmul.msk.f32.vlgmr.msra.gmra.mxu1 %vm200_vm2, %v4418_v32 }
 0x6f6   :  { %v1849_v0 = vpop.f32.mrf.mxu1 }
 0x6f7   :  { %v1850_v17 = vadd.f32 %v4141_v4, %v1849_v0 }
 0x6f9   :  { %2374 = vrot.lane.b32.xlu2 %v1850_v17, %s2914_s28 }
 0x713   :  { %v2154_v53 = vpop.f32.mrf.mxu3 }
 0x714   :  { %v2155_v42 = vadd.f32 %v2696_v49, %v2154_v53  ;;  %v2196_v40 = vpop.f32.mrf.mxu2 }
 0x715   :  { %v2197_v39 = vadd.f32 %v2699_v14, %v2196_v40 }
 0x716   :  { %v2157_v48 = vmax.f32 %v2155_v42, 0.0  ;;  %v2334_v42 = vpop.permute.xlu0 %2333 }
 0x717   :  { %v2199_v7 = vmax.f32 %v2197_v39, 0.0 }
 0x729   :  { %v2078_v51 = vpop.f32.mrf.mxu1 }
 0x72a   :  { %v2079_v62 = vadd.f32 %v4799_v30, %v2078_v51 }
 0x72c   :  { %v2081_v16 = vmax.f32 %v2079_v62, 0.0 }
 0x72e   :  { %v2085_v19 = vsel %vm200_vm2, %v2081_v16, %v2083_v37 }
 0x72f   :  { %2102 = vmatmul.f32.vlgmr.msrb.gmra.mxu0 %v2085_v19  ;;  %v2217_v23 = vpop.f32.mrf.mxu3 }
 0x730   :  { %v2218_v15 = vadd.f32 %v2697_v45, %v2217_v23  ;;  %v2259_v38 = vpop.f32.mrf.mxu2 }
 0x731   :  { %v2175_v56 = vpop.f32.mrf.mxu1 }
 0x732   :  { %v2220_v24 = vmax.f32 %v2218_v15, 0.0  ;;  %v2176_v6 = vadd.f32 %v4380_v28, %v2175_v56  ;;  %v2359_v15 = vpop.permute.xlu1 %2358  ;;  %v2363_v56 = vpop.permute.xlu2 %2362 }
 0x734   :  { %v2283_v46 = vadd.f32 %v2220_v24, %v2157_v48  ;;  %v2178_v44 = vmax.f32 %v2176_v6, 0.0  ;;  %v2367_v48 = vpop.permute.xlu0 %2366  ;;  %v4807_v24 = vld [vmem:[#allocation22_spill] sm:$0xff] }
 0x736   :  { %v2284_v26 = vsub.f32 0.0, %v2283_v46  ;;  %v577_v46 = vadd.f32 %v4141_v4, %v4807_v24 }
 0x738   :  { %v2285_v5 = vmul.f32 1.442695, %v2284_v26 }
 0x739   :  { %v2238_v43 = vpop.f32.mrf.mxu1 }
 0x73a   :  { %2573 = vpow2.f32 %v2285_v5  ;;  %v2239_v60 = vadd.f32 %v4387_v12, %v2238_v43  ;;  %v2698_v12 = vld [vmem:[%s4495_s16] ss:$0 sm:$0xff]  ;;  %v2371_v26 = vpop.permute.xlu1 %2370 }
 0x73b   :  { %v2260_v59 = vadd.f32 %v2698_v12, %v2259_v38 }
 0x73c   :  { %v2241_v50 = vmax.f32 %v2239_v60, 0.0 }
 0x73d   :  { %v2262_v57 = vmax.f32 %v2260_v59, 0.0 }
 0x73e   :  { %v2263_v3 = vadd.f32 %v2241_v50, %v2178_v44 }
 0x740   :  { %v2574_v9 = vpop.eup %2573  ;;  %v2264_v52 = vsub.f32 0.0, %v2263_v3 }
 0x741   :  { %v2287_v11 = vadd.f32 1.0, %v2574_v9 }
 0x742   :  { %v2265_v27 = vmul.f32 1.442695, %v2264_v52 }
 0x743   :  { %2575 = vrcp.f32 %v2287_v11  ;;  %v2299_v2 = vand.u32 2147483648, %v2287_v11  ;;  %v2297_v31 = vand.u32 2147483647, %v2287_v11  ;;  %vm2293_vm8 = vweird.f32 %v2287_v11 }
 0x744   :  { %2577 = vpow2.f32 %v2265_v27 }
 0x745   :  { %v2300_v25 = vor.u32 1.1754944e-38, %v2299_v2  ;;  %vm2298_vm10 = vcmp.eq.f32.partialorder %v2297_v31, 8.507059e+37 }
 0x749   :  { %v2576_v58 = vpop.eup %2575 }
 0x74a   :  { %v2578_v8 = vpop.eup %2577  ;;  %v2289_v20 = vmul.f32 %v2576_v58, %v2287_v11  ;;  %vm2294_vm7 = vweird.f32 %v2576_v58 }
 0x74b   :  { %v2267_v36 = vadd.f32 1.0, %v2578_v8  ;;  %vm2295_vm9 = vmor %vm2293_vm8, %vm2294_vm7 }
 0x74c   :  { %v2290_v28 = vsub.f32 1.0, %v2289_v20 }
 0x74d   :  { %2579 = vrcp.f32 %v2267_v36  ;;  %v2279_v21 = vand.u32 2147483648, %v2267_v36  ;;  %vm2273_vm12 = vweird.f32 %v2267_v36  ;;  %v2277_v47 = vand.u32 2147483647, %v2267_v36 }
 0x74e   :  { %v2291_v35 = vmul.f32 %v2576_v58, %v2290_v28 }
 0x74f   :  { %v2280_v54 = vor.u32 1.1754944e-38, %v2279_v21  ;;  %vm2278_vm14 = vcmp.eq.f32.partialorder %v2277_v47, 8.507059e+37 }
 0x750   :  { %v2292_v18 = vadd.f32 %v2576_v58, %v2291_v35 }
 0x752   :  { %v2296_v33 = vsel %vm2295_vm9, %v2576_v58, %v2292_v18 }
 0x753   :  { %v2580_v29 = vpop.eup %2579  ;;  %v2301_v13 = vsel %vm2298_vm10, %v2300_v25, %v2296_v33  ;;  %v2375_v43 = vpop.permute.xlu2 %2374 }
 0x754   :  { %v2303_v34 = vmul.f32 %v2301_v13, %v2262_v57  ;;  %v2269_v63 = vmul.f32 %v2580_v29, %v2267_v36  ;;  %vm2274_vm11 = vweird.f32 %v2580_v29 }
 0x755   :  { %vm2275_vm13 = vmor %vm2273_vm12, %vm2274_vm11 }
 0x756   :  { %v2304_v55 = vadd.f32 %v2303_v34, %v2199_v7  ;;  %v2270_v1 = vsub.f32 1.0, %v2269_v63 }
 0x758   :  { %2581 = vtanh.f32 %v2304_v55  ;;  %v2271_v41 = vmul.f32 %v2580_v29, %v2270_v1 }
 0x75a   :  { %v2272_v10 = vadd.f32 %v2580_v29, %v2271_v41 }
 0x75c   :  { %v2276_v22 = vsel %vm2275_vm13, %v2580_v29, %v2272_v10 }
 0x75d   :  { %v2281_v17 = vsel %vm2278_vm14, %v2280_v54, %v2276_v22 }
 0x75e   :  { %v2582_v61 = vpop.eup %2581 }
 0x75f   :  { %v2306_v0 = vsub.f32 %v4418_v32, %v2582_v61 }
 0x761   :  { %v2307_v53 = vmul.f32 %v2306_v0, %v2281_v17 }
 0x763   :  { %v2308_v51 = vadd.f32 %v2582_v61, %v2307_v53 }
 0x765   :  { %2476 = vmatmul.msk.f32.vlgmr.msra.gmra.mxu0 %vm200_vm2, %v2308_v51  ;;  %2397 = vst.msk [vmem:[#allocation2] sm:$0xff] %vm200_vm2, %v2308_v51 }
 0x766   :  { %2399 = vst.msk [vmem:[%s4501_s22] sm:$0xff] %vm200_vm2, %v2308_v51 }
 0x7ac   :  { %v2103_v62 = vpop.f32.mrf.mxu0 }
 0x7ad   :  { %v2104_v16 = vadd.f32 %v4141_v4, %v2103_v62 }
 0x7af   :  { %2378 = vrot.lane.b32.xlu0 %v2104_v16, %s2918_s4 }
 0x7e2   :  { %v2329_v37 = vpop.f32.mrf.mxu0 }
 0x7e3   :  { %v2330_v32 = vadd.f32 %v4799_v30, %v2329_v37  ;;  %v2385_v30 = vsel %vm203_vm0, %v577_v46, %v2359_v15 }
 0x7e4   :  { %v2386_v5 = vsel %vm231_vm1, %v2385_v30, %v2363_v56 }
 0x7e5   :  { %v2332_v49 = vmax.f32 %v2330_v32, 0.0  ;;  %v2388_v6 = vsel %vm2387_vm15, %v2386_v5, %v2367_v48 }
 0x7e6   :  { %v2389_v44 = vsel %vm200_vm2, %v2388_v6, %v2371_v26 }
 0x7e7   :  { %v2336_v19 = vsel %vm200_vm2, %v2332_v49, %v2334_v42  ;;  %v2391_v50 = vsel %vm2390_vm3, %v2389_v44, %v2375_v43 }
 0x7e8   :  { %2353 = vmatmul.f32.vlgmr.msrb.gmra.mxu3 %v2336_v19 }
 0x821   :  { %v2379_v60 = vpop.permute.xlu0 %2378 }
 0x822   :  { %v2393_v3 = vsel %vm2392_vm4, %v2391_v50, %v2379_v60 }
 0x86b   :  { %v2354_v23 = vpop.f32.mrf.mxu3 }
 0x86c   :  { %v2355_v45 = vadd.f32 %v4141_v4, %v2354_v23 }
 0x86e   :  { %2382 = vrot.lane.b32.xlu1 %v2355_v45, %s2912_s24 }
 0x8e0   :  { %v2383_v9 = vpop.permute.xlu1 %2382 }
 0x8e1   :  { %v2395_v52 = vsel %vm2394_vm5, %v2393_v3, %v2383_v9 }
 0x8e2   :  { %2396 = vst [vmem:[%s4500_s21] sm:$0xff] %v2395_v52 }
 0x8e3   :  { %2408 = vsyncpa [#allocation5], 1 }
 0x8e4   :  { %2409 = vsyncpa [#allocation7], 1 }
 0x8e5   :  { %2410 = vsyncpa [#allocation10], 1 }
 0x8e6   :  { %2411 = vsyncpa [#allocation13], 1 }
 0x8e7   :  { %2412 = vsyncpa [#allocation16], 1 }

</bundles_post_ra>
